<compile_context>
chip_gen: v7x
topology: tpu7x:2x2x1
jax: 0.10.0
libtpu: 0.0.40
codegen_flags: <defaults>
</compile_context>

<pallas_src>
import functools

import jax
import jax.numpy as jnp
import numpy as np
from jax.experimental import pallas as pl
from jax.experimental.pallas import tpu as pltpu


def convnet_kernel(x_ref, w_ref, b_ref, o_ref, *, h, w, pool, cout):
    # x_ref: (Bb*H*W, K)      im2col activations (bf16), K = 9 * padded_cin = 72
    # w_ref: (K, Cout)        weights (bf16)
    # b_ref: (1, Cout)        bias (f32)
    # o_ref: (Bb, Cout*Ho*Wo) flattened output in PyTorch (C, Ho, Wo) order
    bb = o_ref.shape[0]
    ho, wo = h // pool, w // pool

    # conv-as-matmul: one MXU pass, f32 accumulation inside the MXU.
    acc = jnp.dot(x_ref[...], w_ref[...], preferred_element_type=jnp.float32)

    # bias + ReLU on the f32 accumulator.
    y = jnp.maximum(acc + b_ref[...], 0.0)                  # (Bb*H*W, Cout)

    # MaxPool2d(2) o MaxPool2d(5) == MaxPool2d(10) here (stride == kernel, no
    # padding, 10 divides H and W).  Contiguous W-pool first (10x reduction over
    # consecutive rows), then the strided H-pool on the 10x smaller value.
    y = y.reshape(bb * h * wo, pool, cout).max(axis=1)      # (Bb*H*Wo, Cout)
    y = y.reshape(bb * ho, pool, wo, cout).max(axis=1)      # (Bb*Ho, Wo, Cout)

    # Flatten in PyTorch x.view(B, -1) order == (C, Ho, Wo): tiny XLU transpose,
    # then one lane-dense store (last dim 256 = 2*128, no masked vst).
    y = y.reshape(bb, ho * wo, cout)
    y = jnp.swapaxes(y, 1, 2).reshape(bb, cout * ho * wo)
    o_ref[...] = y.astype(o_ref.dtype)


def convnet_forward(x_nchw, w_oihw, bias, *, num_blocks=1):
    # num_blocks=1: whole batch in one grid step (best at this size on every
    # generation).  Only split once per-TC M = Bb*H*W reaches a few thousand rows.
    B, Cin, H, W = x_nchw.shape
    Cout = w_oihw.shape[0]
    CIN_P = 8                     # pad Cin 3 -> 8 for clean packing
    K = 9 * CIN_P                 # 72
    POOL = 10                     # MaxPool2d(2) o MaxPool2d(5)
    assert H % POOL == 0 and W % POOL == 0, "pool fusion requires 10 | H and 10 | W"
    assert Cin <= CIN_P
    Ho, Wo = H // POOL, W // POOL
    assert B % num_blocks == 0
    Bb = B // num_blocks
    assert num_blocks == 1 or Bb % 8 == 0, "output block sublane dim must stay 8-aligned"

    # ---- layout plumbing (plain-JAX glue; fused into the pallas_call input
    # pipeline via allow_input_fusion so the slab is not round-tripped via HBM) ----
    # NCHW -> NHWC, spatial pad=1, channel pad to CIN_P.
    x_nhwc = jnp.transpose(x_nchw, (0, 2, 3, 1))
    x_pad = jnp.pad(x_nhwc, ((0, 0), (1, 1), (1, 1), (0, CIN_P - Cin)))
    # im2col: 9 shifted taps concatenated along channels.  NOTE: tap order
    # (dy outer, dx inner, then ci) must stay in sync with w_mat below.
    taps = [x_pad[:, dy:dy + H, dx:dx + W, :]
            for dy in range(3) for dx in range(3)]
    x_im2col = jnp.concatenate(taps, axis=-1).reshape(B * H * W, K)
    x_im2col = x_im2col.astype(jnp.bfloat16)
    # OIHW -> HWIO, channel pad, flatten to (72, Cout) in the same (dy,dx,ci) order.
    w_hwio = jnp.transpose(w_oihw, (2, 3, 1, 0))
    w_mat = jnp.pad(w_hwio, ((0, 0), (0, 0), (0, CIN_P - Cin), (0, 0)))
    w_mat = w_mat.reshape(K, Cout).astype(jnp.bfloat16)
    b2d = bias.reshape(1, Cout).astype(jnp.float32)

    flat = Cout * Ho * Wo
    cost = pl.CostEstimate(
        flops=2 * B * H * W * K * Cout,
        transcendentals=0,
        bytes_accessed=(B * H * W * K * 2 + K * Cout * 2 + Cout * 4 + B * flat * 4),
    )

    out = pl.pallas_call(
        functools.partial(convnet_kernel, h=H, w=W, pool=POOL, cout=Cout),
        out_shape=jax.ShapeDtypeStruct((B, flat), jnp.float32),
        grid=(num_blocks,),
        in_specs=[
            pl.BlockSpec((Bb * H * W, K), lambda i: (i, 0)),
            pl.BlockSpec((K, Cout), lambda i: (0, 0)),
            pl.BlockSpec((1, Cout), lambda i: (0, 0)),
        ],
        out_specs=pl.BlockSpec((Bb, flat), lambda i: (i, 0)),
        compiler_params=pltpu.CompilerParams(
            dimension_semantics=("parallel",),
            allow_input_fusion=[True, True, True]),
        cost_estimate=cost,
    )(x_im2col, w_mat, b2d)
    # TODO(synk): if batch ever scales up, add an M-tiling grid axis over rows of
    # the (B*H*W, 72) LHS (2k-4k rows/step) instead of whole-batch blocks, to keep
    # VMEM flat (v7x has 64 MiB physical, v5e only 16 MiB scoped by default).
    return out


def reference_forward(x_nchw, w_oihw, bias):
    y = jax.lax.conv_general_dilated(
        x_nchw, w_oihw, window_strides=(1, 1), padding=((1, 1), (1, 1)),
        dimension_numbers=("NCHW", "OIHW", "NCHW"))
    y = y + bias[None, :, None, None]
    y = jnp.maximum(y, 0.0)
    y = jax.lax.reduce_window(y, -jnp.inf, jax.lax.max,
                              (1, 1, 2, 2), (1, 1, 2, 2), "VALID")
    y = jax.lax.reduce_window(y, -jnp.inf, jax.lax.max,
                              (1, 1, 5, 5), (1, 1, 5, 5), "VALID")
    return y.reshape(y.shape[0], -1)


if __name__ == "__main__":
    B, Cin, H, W = 2, 3, 20, 20   # 20 -> conv(pad=1) 20 -> pool2 10 -> pool5 2
    Cout = 64                     # hid_dim = z_dim = 64

    key = jax.random.PRNGKey(0)
    kw, kb, kx = jax.random.split(key, 3)
    w = jax.random.normal(kw, (Cout, Cin, 3, 3), jnp.float32) * 0.1
    b = jax.random.normal(kb, (Cout,), jnp.float32) * 0.1
    x = jax.random.normal(kx, (B, Cin, H, W), jnp.float32)

    out = jax.block_until_ready(jax.jit(convnet_forward)(x, w, b))
    ref = jax.block_until_ready(reference_forward(x, w, b))

    assert out.shape == (B, Cout * (H // 10) * (W // 10)), out.shape
    # bf16 activations/weights (with f32 MXU accumulation) vs. the all-f32
    # reference: tolerance loosened accordingly.
    np.testing.assert_allclose(np.asarray(out), np.asarray(ref),
                               rtol=2e-2, atol=2e-2)
    print("KERNEL_OK")
</pallas_src>

<mosaic_0001>
module attributes {stable_mosaic.version = 11 : i64} {
  func.func @convnet_kernel(%arg0: i32, %arg1: memref<800x72xbf16, #tpu.memory_space<vmem>>, %arg2: memref<72x64xbf16, #tpu.memory_space<vmem>>, %arg3: memref<1x64xf32, #tpu.memory_space<vmem>>, %arg4: memref<2x256xf32, #tpu.memory_space<vmem>>) attributes {dimension_semantics = [#tpu.dimension_semantics<parallel>], iteration_bounds = array<i64: 1>, scalar_prefetch = 0 : i64, scratch_operands = 0 : i64, tpu.core_type = #tpu.core_type<tc>, window_params = [{transform_indices = @transform_0, window_bounds = array<i64: 800, 72>}, {pipeline_mode = #tpu.pipeline_mode<synchronous>, transform_indices = @transform_1, window_bounds = array<i64: 72, 64>}, {pipeline_mode = #tpu.pipeline_mode<synchronous>, transform_indices = @transform_2, window_bounds = array<i64: 1, 64>}, {transform_indices = @transform_3, window_bounds = array<i64: 2, 256>}]} {
    %c0 = arith.constant 0 : index
    %c0_0 = arith.constant 0 : index
    %0 = vector.load %arg1[%c0, %c0_0] : memref<800x72xbf16, #tpu.memory_space<vmem>>, vector<800x72xbf16>
    %c0_1 = arith.constant 0 : index
    %c0_2 = arith.constant 0 : index
    %1 = vector.load %arg2[%c0_1, %c0_2] : memref<72x64xbf16, #tpu.memory_space<vmem>>, vector<72x64xbf16>
    %cst = arith.constant dense<0.000000e+00> : vector<800x64xf32>
    %2 = tpu.matmul %0, %1, %cst {dimension_numbers = #tpu.dot_dimension_numbers<[1], [0], [0], [1], [0, 0, 1, 1], [], []>} : vector<800x72xbf16>, vector<72x64xbf16>, vector<800x64xf32> -> vector<800x64xf32>
    %c0_3 = arith.constant 0 : index
    %c0_4 = arith.constant 0 : index
    %3 = vector.load %arg3[%c0_3, %c0_4] : memref<1x64xf32, #tpu.memory_space<vmem>>, vector<1x64xf32>
    %4 = vector.broadcast %3 : vector<1x64xf32> to vector<800x64xf32>
    %5 = arith.addf %2, %4 : vector<800x64xf32>
    %cst_5 = arith.constant 0.000000e+00 : f32
    %6 = vector.broadcast %cst_5 : f32 to vector<800x64xf32>
    %7 = arith.maximumf %5, %6 : vector<800x64xf32>
    %8 = vector.shape_cast %7 : vector<800x64xf32> to vector<80x10x64xf32>
    %cst_6 = arith.constant dense<0xFF800000> : vector<80x64xf32>
    %9 = vector.multi_reduction <maximumf>, %8, %cst_6 [1] : vector<80x10x64xf32> to vector<80x64xf32>
    %10 = vector.shape_cast %9 : vector<80x64xf32> to vector<4x10x2x64xf32>
    %cst_7 = arith.constant dense<0xFF800000> : vector<4x2x64xf32>
    %11 = vector.multi_reduction <maximumf>, %10, %cst_7 [1] : vector<4x10x2x64xf32> to vector<4x2x64xf32>
    %12 = vector.shape_cast %11 : vector<4x2x64xf32> to vector<2x4x64xf32>
    %13 = tpu.transpose %12, [0, 2, 1] : vector<2x4x64xf32> -> vector<2x64x4xf32>
    %14 = vector.shape_cast %13 : vector<2x64x4xf32> to vector<2x256xf32>
    %c0_8 = arith.constant 0 : index
    %c0_9 = arith.constant 0 : index
    %15 = vector.load %arg4[%c0_8, %c0_9] : memref<2x256xf32, #tpu.memory_space<vmem>>, vector<2x256xf32>
    tpu.vector_store %arg4[%c0_8, %c0_9], %14 {strides = array<i32>} : memref<2x256xf32, #tpu.memory_space<vmem>>, vector<2x256xf32>,
    return
  }
  func.func @transform_0(%arg0: i32) -> (i32, i32) {
    %c0_i32 = arith.constant 0 : i32
    %c0_i32_0 = arith.constant 0 : i32
    return %arg0, %c0_i32 : i32, i32
  }
  func.func @transform_1(%arg0: i32) -> (i32, i32) {
    %c0_i32 = arith.constant 0 : i32
    %c0_i32_0 = arith.constant 0 : i32
    %c0_i32_1 = arith.constant 0 : i32
    return %c0_i32, %c0_i32_0 : i32, i32
  }
  func.func @transform_2(%arg0: i32) -> (i32, i32) {
    %c0_i32 = arith.constant 0 : i32
    %c0_i32_0 = arith.constant 0 : i32
    %c0_i32_1 = arith.constant 0 : i32
    return %c0_i32, %c0_i32_0 : i32, i32
  }
  func.func @transform_3(%arg0: i32) -> (i32, i32) {
    %c0_i32 = arith.constant 0 : i32
    %c0_i32_0 = arith.constant 0 : i32
    return %arg0, %c0_i32 : i32, i32
  }
}

</mosaic_0001>

<bundles_post_ra>
// kernel: convnet_forward.2
= control target key start
LH: loop header
LB: loop body
LE: loop exit
PB: predicated region body
PF: predicated region fallthrough
CT: control target
= control target key end

     0   :  { %vm9691_vm0 = vcmask 588800   ;;  %vm563_vm1 = vcmask 1043456   ;;  %s9658_s0 = inlined_call_operand.vmem [shape: bf16[800,72], index: 0, kind: input, shape index: {}]   ;;  %s9659_s1 = inlined_call_operand.vmem [shape: bf16[72,64], index: 1, kind: input, shape index: {}]   ;;  %s9660_s2 = inlined_call_operand.vmem [shape: f32[64], index: 2, kind: input, shape index: {}]   ;;  %s9661_s3 = inlined_call_operand.hbm [shape: f32[2,256], index: 3, kind: output, shape index: {}]  }
   0x1   :  { %v7149_v0 = vld [vmem:[%s9659_s1] sm:$0xff]   ;;  %v7150_v1 = vld [vmem:[%s9659_s1 + $0x8] sm:$0xff]   ;;  %v7151_v2 = vld [vmem:[%s9659_s1 + $0x10] sm:$0xff]  }
   0x2   :  { %6992 = vmatprep.subr.bf16.mxu0 %v7149_v0  ;;  %7102 = vmatprep.subr.bf16.mxu1 %v7149_v0  ;;  %v7154_v3 = vld [vmem:[%s9658_s0] sm:$0xff]   ;;  %v7155_v4 = vld [vmem:[%s9658_s0 + $0xd0] sm:$0xff]   ;;  %v7152_v5 = vld [vmem:[%s9659_s1 + $0x18] sm:$0xff]  }
   0x3   :  { %6993 = vmatpush3.bf16.msra.mxu0 %v7149_v0  ;;  %7107 = vmatpush3.bf16.msra.mxu1 %v7149_v0  ;;  %v7153_v6 = vld [vmem:[%s9659_s1 + $0x20] ss:$0 sps:$4 sm:$0xff]   ;;  %v7156_v8 = vld [vmem:[%s9658_s0 + $0x8] sm:$0xff]   ;;  %v7157_v9 = vld [vmem:[%s9658_s0 + $0xd8] sm:$0xff]  }
   0x4   :  { %6994 = vmatprep.subr.bf16.mxu0 %v7150_v1  ;;  %7103 = vmatprep.subr.bf16.mxu1 %v7150_v1  ;;  %v565_v7 = vsel %vm563_vm1, %v7153_v6, 0  ;;  %v7158_v10 = vld [vmem:[%s9658_s0 + $0x10] sm:$0xff]   ;;  %v7159_v11 = vld [vmem:[%s9658_s0 + $0xe0] sm:$0xff]   ;;  %v7160_v12 = vld [vmem:[%s9658_s0 + $0x18] sm:$0xff]  }
   0x5   :  { %7002 = vmatprep.mubr.msk.bf16.mxu0 %vm9691_vm0, %v7154_v3  ;;  %7054 = vmatprep.mubr.msk.bf16.mxu1 %vm9691_vm0, %v7155_v4  ;;  %v7161_v13 = vld [vmem:[%s9658_s0 + $0xe8] sm:$0xff]   ;;  %v7162_v14 = vld [vmem:[%s9658_s0 + $0x20] sm:$0xff]   ;;  %v7163_v15 = vld [vmem:[%s9658_s0 + $0xf0] sm:$0xff]  }
   0x6   :  { %v7164_v16 = vld [vmem:[%s9658_s0 + $0x28] sm:$0xff]   ;;  %v7165_v17 = vld [vmem:[%s9658_s0 + $0xf8] sm:$0xff]   ;;  %v7166_v18 = vld [vmem:[%s9658_s0 + $0x30] sm:$0xff]  }
   0x7   :  { %6995 = vmatpush3.bf16.msra.mxu0 %v7150_v1  ;;  %7108 = vmatpush3.bf16.msra.mxu1 %v7150_v1  ;;  %v7167_v19 = vld [vmem:[%s9658_s0 + $0x100] sm:$0xff]   ;;  %v7168_v20 = vld [vmem:[%s9658_s0 + $0x38] sm:$0xff]   ;;  %v7169_v21 = vld [vmem:[%s9658_s0 + $0x108] sm:$0xff]  }
   0x8   :  { %6996 = vmatprep.subr.bf16.mxu0 %v7151_v2  ;;  %7104 = vmatprep.subr.bf16.mxu1 %v7151_v2  ;;  %v7170_v22 = vld [vmem:[%s9658_s0 + $0x40] sm:$0xff]   ;;  %v7171_v23 = vld [vmem:[%s9658_s0 + $0x110] sm:$0xff]   ;;  %v7172_v24 = vld [vmem:[%s9658_s0 + $0x48] sm:$0xff]  }
   0x9   :  { %v7173_v25 = vld [vmem:[%s9658_s0 + $0x118] sm:$0xff]   ;;  %v7174_v26 = vld [vmem:[%s9658_s0 + $0x50] sm:$0xff]   ;;  %v7175_v27 = vld [vmem:[%s9658_s0 + $0x120] sm:$0xff]  }
   0xa   :  { %v15_v28 = vld [vmem:[%s9660_s2] sm:$0x1] }
   0xb   :  { %6997 = vmatpush3.bf16.msra.mxu0 %v7151_v2  ;;  %7109 = vmatpush3.bf16.msra.mxu1 %v7151_v2  ;;  %17 = vst [vmem:[#allocation4] sm:$0x1] %v15_v28 }
   0xc   :  { %6998 = vmatprep.subr.bf16.mxu0 %v7152_v5  ;;  %7105 = vmatprep.subr.bf16.mxu1 %v7152_v5 }
   0xf   :  { %6999 = vmatpush3.bf16.msra.mxu0 %v7152_v5  ;;  %7110 = vmatpush3.bf16.msra.mxu1 %v7152_v5 }
  0x10   :  { %7112 = vmatprep.subr.msk.bf16.mxu0 %vm563_vm1, %v7153_v6  ;;  %7113 = vmatprep.subr.msk.bf16.mxu1 %vm563_vm1, %v7153_v6 }
  0x13   :  { %7001 = vmatpush3.bf16.msra.mxu0 %v565_v7  ;;  %7111 = vmatpush3.bf16.msra.mxu1 %v565_v7 }
  0x16   :  { %7003 = vmatmul.mubr.msk.bf16.vlgmr.msra.gmra.mrb[0].mxu0 %vm9691_vm0, %v7156_v8  ;;  %7055 = vmatmul.mubr.msk.bf16.vlgmr.msra.gmra.mrb[0].mxu1 %vm9691_vm0, %v7157_v9 }
  0x17   :  { %7006 = vmatprep.mubr.msk.bf16.mxu0 %vm9691_vm0, %v7158_v10  ;;  %7058 = vmatprep.mubr.msk.bf16.mxu1 %vm9691_vm0, %v7159_v11 }
  0x1e   :  { %7007 = vmatmul.mubr.msk.bf16.gmra.mrb[4].mxu0 %vm9691_vm0, %v7160_v12  ;;  %7059 = vmatmul.mubr.msk.bf16.gmra.mrb[4].mxu1 %vm9691_vm0, %v7161_v13 }
  0x1f   :  { %7010 = vmatprep.mubr.msk.bf16.mxu0 %vm9691_vm0, %v7162_v14  ;;  %7062 = vmatprep.mubr.msk.bf16.mxu1 %vm9691_vm0, %v7163_v15 }
  0x26   :  { %7011 = vmatmul.mubr.msk.bf16.gmra.mrb[8].mxu0 %vm9691_vm0, %v7164_v16  ;;  %7063 = vmatmul.mubr.msk.bf16.gmra.mrb[8].mxu1 %vm9691_vm0, %v7165_v17 }
  0x27   :  { %7014 = vmatprep.mubr.msk.bf16.mxu0 %vm9691_vm0, %v7166_v18  ;;  %7066 = vmatprep.mubr.msk.bf16.mxu1 %vm9691_vm0, %v7167_v19 }
  0x2e   :  { %7015 = vmatmul.mubr.msk.bf16.gmra.mrb[12].mxu0 %vm9691_vm0, %v7168_v20  ;;  %7067 = vmatmul.mubr.msk.bf16.gmra.mrb[12].mxu1 %vm9691_vm0, %v7169_v21 }
  0x2f   :  { %7018 = vmatprep.mubr.msk.bf16.mxu0 %vm9691_vm0, %v7170_v22  ;;  %7070 = vmatprep.mubr.msk.bf16.mxu1 %vm9691_vm0, %v7171_v23 }
  0x36   :  { %7019 = vmatmul.mubr.msk.bf16.gmra.mrb[16].mxu0 %vm9691_vm0, %v7172_v24  ;;  %7071 = vmatmul.mubr.msk.bf16.gmra.mrb[16].mxu1 %vm9691_vm0, %v7173_v25 }
  0x37   :  { %7022 = vmatprep.mubr.msk.bf16.mxu0 %vm9691_vm0, %v7174_v26  ;;  %7074 = vmatprep.mubr.msk.bf16.mxu1 %vm9691_vm0, %v7175_v27 }
  0x38   :  { %8 = vsyncpa [#allocation3], 0  ;;  %v7176_v29 = vld [vmem:[%s9658_s0 + $0x58] sm:$0xff]   ;;  %v7177_v30 = vld [vmem:[%s9658_s0 + $0x128] sm:$0xff]   ;;  %v7231_v57 = vmov 1983009808   ;;  %v1204_v59 = vlaneseq }
  0x39   :  { %v7178_v31 = vld [vmem:[%s9658_s0 + $0x60] sm:$0xff]   ;;  %v7179_v32 = vld [vmem:[%s9658_s0 + $0x130] sm:$0xff]   ;;  %v7180_v33 = vld [vmem:[%s9658_s0 + $0x68] sm:$0xff]   ;;  %v1202_v58 = vunpack.c.l.s4 %v7231_v57  ;;  %vm4982_vm2 = vcmask 517120   ;;  %vm9686_vm3 = vcmask 523264   ;;  %vm5862_vm4 = vcmask 1041409  }
  0x3a   :  { %v7181_v34 = vld [vmem:[%s9658_s0 + $0x138] sm:$0xff]   ;;  %v7182_v35 = vld [vmem:[%s9658_s0 + $0x70] sm:$0xff]   ;;  %v7183_v36 = vld [vmem:[%s9658_s0 + $0x140] sm:$0xff]   ;;  %v7504_v61 = vshrl.u32 %v1204_v59, 7  ;;  %vm5864_vm5 = vcmask 1042434   ;;  %vm5866_vm6 = vcmask 1043459  }
  0x3b   :  { %v7184_v37 = vld [vmem:[%s9658_s0 + $0x78] sm:$0xff]   ;;  %v7185_v38 = vld [vmem:[%s9658_s0 + $0x148] sm:$0xff]   ;;  %v7186_v39 = vld [vmem:[%s9658_s0 + $0x80] sm:$0xff]   ;;  %v1203_v60 = vunpack.c.0.s8 %v1202_v58  ;;  %s7235_s10 = smov 4   ;;  %s7236_s11 = smov 40   ;;  %vm6713_vm7 = vcmask 31744  }
  0x3c   :  { %v7187_v40 = vld [vmem:[%s9658_s0 + $0x150] sm:$0xff]   ;;  %v7188_v41 = vld [vmem:[%s9658_s0 + $0x88] sm:$0xff]   ;;  %v7189_v42 = vld [vmem:[%s9658_s0 + $0x158] sm:$0xff]   ;;  %9693 = vst [vmem:[#allocation6_spill] sm:$0xff] %v7504_v61  ;;  %s7237_s12 = smov 12   ;;  %s7238_s13 = smov 16  }
  0x3d   :  { %v7190_v43 = vld [vmem:[%s9658_s0 + $0x90] sm:$0xff]   ;;  %v7191_v44 = vld [vmem:[%s9658_s0 + $0x160] sm:$0xff]   ;;  %v7192_v45 = vld [vmem:[%s9658_s0 + $0x98] sm:$0xff]   ;;  %v7512_v2 = vsub.s32 %v1203_v60, %v7504_v61  ;;  %s7239_s14 = smov 24   ;;  %s7240_s15 = smov 20   ;;  %vm6715_vm8 = vcmask 64512  }
  0x3e   :  { %7023 = vmatmul.mubr.msk.bf16.gmra.mrb[20].mxu0 %vm9691_vm0, %v7176_v29  ;;  %7075 = vmatmul.mubr.msk.bf16.gmra.mrb[20].mxu1 %vm9691_vm0, %v7177_v30  ;;  %v7193_v46 = vld [vmem:[%s9658_s0 + $0x168] sm:$0xff]   ;;  %v7194_v47 = vld [vmem:[%s9658_s0 + $0xa0] sm:$0xff]   ;;  %v7195_v48 = vld [vmem:[%s9658_s0 + $0x170] sm:$0xff]   ;;  %s7241_s16 = smov 48   ;;  %s7242_s17 = smov 28   ;;  %vm6717_vm9 = vcmask 97280  }
  0x3f   :  { %7026 = vmatprep.mubr.msk.bf16.mxu0 %vm9691_vm0, %v7178_v31  ;;  %7078 = vmatprep.mubr.msk.bf16.mxu1 %vm9691_vm0, %v7179_v32  ;;  %v7196_v49 = vld [vmem:[%s9658_s0 + $0xa8] sm:$0xff]   ;;  %v7197_v50 = vld [vmem:[%s9658_s0 + $0x178] sm:$0xff]   ;;  %v7198_v51 = vld [vmem:[%s9658_s0 + $0xb0] sm:$0xff]   ;;  %9694 = vst [vmem:[#allocation7_spill] sm:$0xff] %v7512_v2  ;;  %s7243_s18 = smov 56   ;;  %s7244_s2 = smov 32  }
  0x40   :  { %v7199_v52 = vld [vmem:[%s9658_s0 + $0x180] sm:$0xff]   ;;  %v7200_v53 = vld [vmem:[%s9658_s0 + $0xb8] sm:$0xff]   ;;  %v7201_v54 = vld [vmem:[%s9658_s0 + $0x188] sm:$0xff]   ;;  %s7245_s19 = smov 64   ;;  %s7246_s20 = smov 36   ;;  %vm6719_vm10 = vcmask 130048  }
  0x41   :  { %v7202_v55 = vld [vmem:[%s9658_s0 + $0xc0] sm:$0xff]   ;;  %v7203_v56 = vld [vmem:[%s9658_s0 + $0xc8] sm:$0xff]   ;;  %s7234_s0 = smov 8   ;;  %s7247_s21 = smov 72   ;;  %vm6721_vm11 = vcmask 162816   ;;  %vm6723_vm12 = vcmask 195584  }
  0x42   :  { %v7506_v62 = vld [vmem:[#allocation4] ss:$0 sm:$0xff]  ;;  %s7248_s22 = smov 44   ;;  %s7249_s23 = smov 68   ;;  %vm6725_vm13 = vcmask 228352   ;;  %vm6727_vm14 = vcmask 261120  }
  0x43   :  { %s7250_s24 = smov 76   ;;  %s7251_s25 = smov 80   ;;  %vm6729_vm15 = vcmask 293888   ;;  %vm6731_vm1 = vcmask 326656  }
  0x44   :  { %s7252_s26 = smov 52   ;;  %s7253_s27 = smov 88  }
  0x45   :  { %s7254_s28 = smov 60   ;;  %s7255_s29 = smov 84  }
  0x46   :  { %7027 = vmatmul.mubr.msk.bf16.gmra.mrb[24].mxu0 %vm9691_vm0, %v7180_v33  ;;  %7079 = vmatmul.mubr.msk.bf16.gmra.mrb[24].mxu1 %vm9691_vm0, %v7181_v34  ;;  %s7256_s30 = smov 92   ;;  %s7257_s4 = smov 96  }
  0x47   :  { %7030 = vmatprep.mubr.msk.bf16.mxu0 %vm9691_vm0, %v7182_v35  ;;  %7082 = vmatprep.mubr.msk.bf16.mxu1 %vm9691_vm0, %v7183_v36  ;;  %s7258_s1 = smov 104   ;;  %s7259_s5 = smov 100  }
  0x48   :  { %s7260_s6 = smov 108   ;;  %s7261_s7 = smov 112  }
  0x49   :  { %s7262_s8 = smov 120   ;;  %s7263_s9 = smov 116  }
  0x4e   :  { %7031 = vmatmul.mubr.msk.bf16.gmra.mrb[28].mxu0 %vm9691_vm0, %v7184_v37  ;;  %7083 = vmatmul.mubr.msk.bf16.gmra.mrb[28].mxu1 %vm9691_vm0, %v7185_v38 }
  0x4f   :  { %7034 = vmatprep.mubr.msk.bf16.mxu0 %vm9691_vm0, %v7186_v39  ;;  %7086 = vmatprep.mubr.msk.bf16.mxu1 %vm9691_vm0, %v7187_v40 }
  0x56   :  { %7035 = vmatmul.mubr.msk.bf16.gmra.mrb[32].mxu0 %vm9691_vm0, %v7188_v41  ;;  %7087 = vmatmul.mubr.msk.bf16.gmra.mrb[32].mxu1 %vm9691_vm0, %v7189_v42 }
  0x57   :  { %7038 = vmatprep.mubr.msk.bf16.mxu0 %vm9691_vm0, %v7190_v43  ;;  %7090 = vmatprep.mubr.msk.bf16.mxu1 %vm9691_vm0, %v7191_v44 }
  0x5e   :  { %7039 = vmatmul.mubr.msk.bf16.gmra.mrb[36].mxu0 %vm9691_vm0, %v7192_v45  ;;  %7091 = vmatmul.mubr.msk.bf16.gmra.mrb[36].mxu1 %vm9691_vm0, %v7193_v46 }
  0x5f   :  { %7042 = vmatprep.mubr.msk.bf16.mxu0 %vm9691_vm0, %v7194_v47  ;;  %7094 = vmatprep.mubr.msk.bf16.mxu1 %vm9691_vm0, %v7195_v48 }
  0x66   :  { %7043 = vmatmul.mubr.msk.bf16.gmra.mrb[40].mxu0 %vm9691_vm0, %v7196_v49  ;;  %7095 = vmatmul.mubr.msk.bf16.gmra.mrb[40].mxu1 %vm9691_vm0, %v7197_v50 }
  0x67   :  { %7046 = vmatprep.mubr.msk.bf16.mxu0 %vm9691_vm0, %v7198_v51  ;;  %7098 = vmatprep.mubr.msk.bf16.mxu1 %vm9691_vm0, %v7199_v52 }
  0x6e   :  { %7047 = vmatmul.mubr.msk.bf16.gmra.mrb[44].mxu0 %vm9691_vm0, %v7200_v53  ;;  %7099 = vmatmul.mubr.msk.bf16.gmra.mrb[44].mxu1 %vm9691_vm0, %v7201_v54 }
  0x6f   :  { %7050 = vmatprep.mubr.msk.bf16.mxu0 %vm9691_vm0, %v7202_v55 }
  0x76   :  { %7051 = vmatmul.mubr.msk.bf16.gmra.mrb[48].mxu0 %vm9691_vm0, %v7203_v56 }
  0xe9   :  { %v7004_v63 = vpop.f32.mrb[0].mxu0  ;;  %v7508_v0 = vpop.f32.mrb[0].mxu1 }
  0xea   :  { %v610_v1 = vadd.f32 %v7004_v63, %v7506_v62  ;;  %v601_v3 = vpop.f32.mrb[1].mxu0  ;;  %v7514_v4 = vpop.f32.mrb[1].mxu1 }
  0xeb   :  { %v602_v5 = vadd.f32 %v7506_v62, %v601_v3  ;;  %v7005_v6 = vpop.f32.mrb[2].mxu0  ;;  %v7517_v7 = vpop.f32.mrb[2].mxu1 }
  0xec   :  { %v1002_v8 = vmax.f32 %v610_v1, 0.0  ;;  %v613_v9 = vadd.f32 %v7005_v6, %v7506_v62  ;;  %v604_v10 = vpop.f32.mrb[3].mxu0  ;;  %v7520_v11 = vpop.f32.mrb[3].mxu1 }
  0xed   :  { %v1000_v12 = vmax.f32 %v602_v5, 0.0  ;;  %v605_v13 = vadd.f32 %v7506_v62, %v604_v10 }
  0xee   :  { %v1234_v14 = vcombine.high %v1002_v8, %v1002_v8  ;;  %v1241_v15 = vrot.slane %v1002_v8, %v7512_v2  ;;  %v1003_v16 = vmax.f32 %v613_v9, 0.0 }
  0xef   :  { %v1200_v17 = vcombine.high %v1000_v12, %v1000_v12  ;;  %v1207_v18 = vrot.slane %v1000_v12, %v7512_v2  ;;  %v1001_v19 = vmax.f32 %v605_v13, 0.0 }
  0xf0   :  { %v1248_v20 = vrot.slane %v1234_v14, %v7512_v2  ;;  %v1249_v21 = vcombine.high %v1241_v15, %v1241_v15  ;;  %v1251_v22 = vcombine.high %v1003_v16, %v1003_v16  ;;  %v1258_v23 = vrot.slane %v1003_v16, %v7512_v2 }
  0xf1   :  { %v1214_v24 = vrot.slane %v1200_v17, %v7512_v2  ;;  %v1215_v25 = vcombine.high %v1207_v18, %v1207_v18  ;;  %v1217_v26 = vcombine.high %v1001_v19, %v1001_v19  ;;  %v1224_v27 = vrot.slane %v1001_v19, %v7512_v2  ;;  %v7008_v28 = vpop.f32.mrb[4].mxu0  ;;  %v7529_v29 = vpop.f32.mrb[4].mxu1 }
  0xf2   :  { %v1250_v30 = vcombine.high %v1248_v20, %v1248_v20  ;;  %v7532_v31 = vrot.slane %v1251_v22, %v7512_v2  ;;  %v1266_v32 = vcombine.high %v1258_v23, %v1258_v23  ;;  %v617_v33 = vpop.f32.mrb[5].mxu0  ;;  %v7534_v34 = vpop.f32.mrb[5].mxu1  ;;  %v2947_v41 = vrot.slane %v1249_v21, %v7512_v2 }
  0xf3   :  { %v1216_v35 = vcombine.high %v1214_v24, %v1214_v24  ;;  %v2900_v36 = vcombine.low %v1207_v18, %v1215_v25  ;;  %v1231_v37 = vrot.slane %v1217_v26, %v7512_v2  ;;  %v1232_v38 = vcombine.high %v1224_v27, %v1224_v27  ;;  %v7009_v39 = vpop.f32.mrb[6].mxu0  ;;  %v7537_v40 = vpop.f32.mrb[6].mxu1 }
  0xf4   :  { %v2948_v42 = vcombine.low %v1248_v20, %v1250_v30  ;;  %v2949_v43 = vcombine.low %v1258_v23, %v1266_v32  ;;  %v2971_v44 = vrot.slane %v7532_v31, %v7512_v2  ;;  %v620_v45 = vpop.f32.mrb[7].mxu0  ;;  %v7542_v46 = vpop.f32.mrb[7].mxu1  ;;  %v2923_v51 = vrot.slane %v1224_v27, %v7512_v2 }
  0xf5   :  { %v2901_v47 = vcombine.low %v1214_v24, %v1216_v35  ;;  %v1233_v48 = vcombine.high %v1231_v37, %v1231_v37  ;;  %v2924_v52 = vcombine.low %v1232_v38, %v1231_v37  ;;  %v2908_v53 = vrot.slane %v2900_v36, %v7512_v2 }
  0xf6   :  { %v2956_v49 = vrot.slane %v2948_v42, %v7512_v2  ;;  %v2963_v50 = vrot.slane %v2949_v43, %v7512_v2  ;;  %v626_v56 = vadd.f32 %v7008_v28, %v7506_v62  ;;  %v4992_v57 = vsel %vm4982_vm2, %v2947_v41, -inf }
  0xf7   :  { %v2915_v54 = vrot.slane %v2901_v47, %v7512_v2  ;;  %v2925_v55 = vcombine.low %v1233_v48, %v1241_v15  ;;  %v5001_v59 = vsel %vm4982_vm2, %v2971_v44, -inf  ;;  %v618_v60 = vadd.f32 %v7506_v62, %v617_v33 }
  0xf8   :  { %v2964_v58 = vcombine.low %v2956_v49, %v2963_v50  ;;  %v2932_v1 = vrot.slane %v2924_v52, %v7512_v2  ;;  %v1006_v5 = vmax.f32 %v626_v56, 0.0  ;;  %v4983_v10 = vsel %vm4982_vm2, %v2923_v51, -inf }
  0xf9   :  { %v2916_v63 = vcombine.low %v2908_v53, %v2915_v54  ;;  %v2939_v3 = vrot.slane %v2925_v55, %v7512_v2  ;;  %v7555_v6 = vpop.f32.mrb[8].mxu0  ;;  %v7557_v8 = vpop.f32.mrb[8].mxu1  ;;  %v1004_v12 = vmax.f32 %v618_v60, 0.0  ;;  %v629_v13 = vadd.f32 %v7009_v39, %v7506_v62 }
  0xfa   :  { %v5000_v9 = vsel %vm9686_vm3, %v2964_v58, -inf  ;;  %v7562_v14 = vpop.f32.mrb[9].mxu0  ;;  %v7564_v15 = vpop.f32.mrb[9].mxu1  ;;  %v1302_v19 = vcombine.high %v1006_v5, %v1006_v5  ;;  %v7572_v23 = vrot.slane %v1006_v5, %v7512_v2  ;;  %v1267_v33 = vcombine.high %v7532_v31, %v7532_v31 }
  0xfb   :  { %v5002_v16 = vmax.f32 %v5000_v9, %v5001_v59  ;;  %v2940_v17 = vcombine.low %v2932_v1, %v2939_v3  ;;  %v4981_v18 = vsel %vm9686_vm3, %v2916_v63, -inf  ;;  %v7567_v20 = vpop.f32.mrb[10].mxu0  ;;  %v7569_v21 = vpop.f32.mrb[10].mxu1  ;;  %v1268_v24 = vcombine.high %v1004_v12, %v1004_v12 }
  0xfc   :  { %v4984_v22 = vmax.f32 %v4981_v18, %v4983_v10  ;;  %v1275_v25 = vrot.slane %v1004_v12, %v7512_v2  ;;  %v7575_v26 = vpop.f32.mrb[11].mxu0  ;;  %v7577_v27 = vpop.f32.mrb[11].mxu1  ;;  %v1316_v32 = vrot.slane %v1302_v19, %v7512_v2  ;;  %v1317_v37 = vcombine.high %v7572_v23, %v7572_v23 }
  0xfd   :  { %v5003_v28 = vrot.slane %v5002_v16, 4  ;;  %v4991_v30 = vsel %vm9686_vm3, %v2940_v17, -inf  ;;  %v1007_v38 = vmax.f32 %v629_v13, 0.0  ;;  %v1282_v41 = vrot.slane %v1268_v24, %v7512_v2 }
  0xfe   :  { %v4985_v35 = vrot.slane %v4984_v22, 4  ;;  %v4993_v36 = vmax.f32 %v4991_v30, %v4992_v57  ;;  %v1283_v42 = vcombine.high %v1275_v25, %v1275_v25  ;;  %v2972_v43 = vcombine.low %v1267_v33, %v1275_v25 }
  0xff   :  { %v5004_v39 = vmax.f32 %v5002_v16, %v5003_v28  ;;  %v3019_v48 = vrot.slane %v7572_v23, %v7512_v2  ;;  %v621_v49 = vadd.f32 %v7506_v62, %v620_v45  ;;  %v3020_v31 = vcombine.low %v1317_v37, %v1316_v32 }
 0x100   :  { %v4986_v44 = vmax.f32 %v4984_v22, %v4985_v35  ;;  %v4994_v47 = vrot.slane %v4993_v36, 4  ;;  %v1284_v51 = vcombine.high %v1282_v41, %v1282_v41  ;;  %v2973_v52 = vcombine.low %v1283_v42, %v1282_v41 }
 0x101   :  { %v5005_v50 = vrot.slane %v5004_v39, 2  ;;  %v7589_v53 = vpop.f32.mrb[12].mxu0  ;;  %v2980_v56 = vrot.slane %v2972_v43, %v7512_v2  ;;  %v1318_v57 = vcombine.high %v1316_v32, %v1316_v32  ;;  %v1319_v1 = vcombine.high %v1007_v38, %v1007_v38  ;;  %v7601_v13 = vpop.f32.mrb[12].mxu1 }
 0x102   :  { %v4987_v54 = vrot.slane %v4986_v44, 2  ;;  %v4995_v55 = vmax.f32 %v4993_v36, %v4994_v47  ;;  %v7592_v58 = vpop.f32.mrb[13].mxu0  ;;  %v2987_v60 = vrot.slane %v2973_v52, %v7512_v2  ;;  %v2995_v63 = vrot.slane %v1284_v51, %v7512_v2  ;;  %v7605_v28 = vpop.f32.mrb[13].mxu1 }
 0x103   :  { %v5006_v59 = vmax.f32 %v5004_v39, %v5005_v50  ;;  %v7596_v45 = vpop.f32.mrb[14].mxu0  ;;  %v1326_v9 = vrot.slane %v1007_v38, %v7512_v2  ;;  %v1005_v10 = vmax.f32 %v621_v49, 0.0  ;;  %v1333_v19 = vrot.slane %v1319_v1, %v7512_v2 }
 0x104   :  { %v4988_v3 = vmax.f32 %v4986_v44, %v4987_v54  ;;  %v4996_v5 = vrot.slane %v4995_v55, 2  ;;  %v7599_v12 = vpop.f32.mrb[15].mxu0  ;;  %v2988_v17 = vcombine.low %v2980_v56, %v2987_v60  ;;  %v5010_v18 = vsel %vm4982_vm2, %v2995_v63, -inf }
 0x105   :  { %v5007_v16 = vrot.slane %v5006_v59, 1  ;;  %v1334_v24 = vcombine.high %v1326_v9, %v1326_v9  ;;  %v3021_v25 = vcombine.low %v1318_v57, %v1326_v9  ;;  %v1335_v33 = vcombine.high %v1333_v19, %v1333_v19 }
 0x106   :  { %v4989_v22 = vrot.slane %v4988_v3, 1  ;;  %v4997_v23 = vmax.f32 %v4995_v55, %v4996_v5  ;;  %v5009_v32 = vsel %vm9686_vm3, %v2988_v17, -inf  ;;  %v1285_v35 = vcombine.high %v1005_v10, %v1005_v10 }
 0x107   :  { %v5008_v30 = vmax.f32 %v5006_v59, %v5007_v16  ;;  %v3028_v37 = vrot.slane %v3020_v31, %v7512_v2  ;;  %v5011_v38 = vmax.f32 %v5009_v32, %v5010_v18  ;;  %v3035_v39 = vrot.slane %v3021_v25, %v7512_v2 }
 0x108   :  { %v4990_v36 = vmax.f32 %v4988_v3, %v4989_v22  ;;  %v3043_v42 = vrot.slane %v1334_v24, %v7512_v2  ;;  %v1292_v43 = vrot.slane %v1005_v10, %v7512_v2  ;;  %v642_v44 = vadd.f32 %v7555_v6, %v7506_v62 }
 0x109   :  { %v7611_v41 = vsel %vm9686_vm3, %v5008_v30, -inf  ;;  %v7617_v47 = vpop.f32.mrb[16].mxu0  ;;  %v4998_v49 = vrot.slane %v4997_v23, 1  ;;  %v5012_v31 = vrot.slane %v5011_v38, 4  ;;  %v3036_v51 = vcombine.low %v3028_v37, %v3035_v39  ;;  %v7644_v37 = vpop.f32.mrb[14].mxu1 }
 0x10a   :  { %v7620_v50 = vsel %vm9686_vm3, %v4990_v36, -inf  ;;  %v7622_v52 = vpop.f32.mrb[17].mxu0  ;;  %v5019_v55 = vsel %vm4982_vm2, %v3019_v48, -inf  ;;  %v7627_v56 = vcombine.low %v1333_v19, %v1335_v33  ;;  %v1299_v57 = vrot.slane %v1285_v35, %v7512_v2 }
 0x10b   :  { %v7630_v6 = vpop.f32.mrb[18].mxu0  ;;  %v5013_v59 = vmax.f32 %v5011_v38, %v5012_v31  ;;  %v5027_v60 = vsel %vm9686_vm3, %v3036_v51, -inf  ;;  %v5028_v63 = vsel %vm4982_vm2, %v3043_v42, -inf  ;;  %v1300_v1 = vcombine.high %v1292_v43, %v1292_v43  ;;  %v7650_v42 = vpop.f32.mrb[15].mxu1 }
 0x10c   :  { %v7634_v3 = vpop.f32.mrb[19].mxu0  ;;  %v5029_v5 = vmax.f32 %v5027_v60, %v5028_v63  ;;  %v1301_v9 = vcombine.high %v1299_v57, %v1299_v57  ;;  %v1010_v10 = vmax.f32 %v642_v44, 0.0  ;;  %v634_v48 = vadd.f32 %v7506_v62, %v7562_v14 }
 0x10d   :  { %v4999_v16 = vmax.f32 %v4997_v23, %v4998_v49  ;;  %v5014_v17 = vrot.slane %v5013_v59, 2  ;;  %v2996_v18 = vcombine.low %v1292_v43, %v1300_v1  ;;  %v645_v19 = vadd.f32 %v7567_v20, %v7506_v62 }
 0x10e   :  { %v5030_v22 = vrot.slane %v5029_v5, 4  ;;  %v2997_v24 = vcombine.low %v1299_v57, %v1301_v9  ;;  %v1370_v25 = vcombine.high %v1010_v10, %v1010_v10  ;;  %v1377_v30 = vrot.slane %v1010_v10, %v7512_v2 }
 0x10f   :  { %v5015_v32 = vmax.f32 %v5013_v59, %v5014_v17  ;;  %v3004_v33 = vrot.slane %v2996_v18, %v7512_v2  ;;  %v1008_v35 = vmax.f32 %v634_v48, 0.0  ;;  %v7642_v36 = vmax.f32 %v645_v19, 0.0 }
 0x110   :  { %v5031_v14 = vmax.f32 %v5029_v5, %v5030_v22  ;;  %v3011_v23 = vrot.slane %v2997_v24, %v7512_v2  ;;  %v1384_v38 = vrot.slane %v1370_v25, %v7512_v2  ;;  %v1385_v39 = vcombine.high %v1377_v30, %v1377_v30 }
 0x111   :  { %v7648_v20 = vpop.f32.mrb[20].mxu0  ;;  %v5016_v43 = vrot.slane %v5015_v32, 1  ;;  %v5721_v44 = vsel %vm9686_vm3, %v4999_v16, -inf  ;;  %v1336_v49 = vcombine.high %v1008_v35, %v1008_v35  ;;  %v1343_v31 = vrot.slane %v1008_v35, %v7512_v2 }
 0x112   :  { %v7654_v51 = vpop.f32.mrb[21].mxu0  ;;  %v5032_v57 = vrot.slane %v5031_v14, 2  ;;  %v3012_v59 = vcombine.low %v3004_v33, %v3011_v23  ;;  %v1386_v60 = vcombine.high %v1384_v38, %v1384_v38  ;;  %v3092_v63 = vcombine.low %v1377_v30, %v1385_v39 }
 0x113   :  { %v7656_v1 = vpop.f32.mrb[22].mxu0  ;;  %v5017_v5 = vmax.f32 %v5015_v32, %v5016_v43  ;;  %v1350_v9 = vrot.slane %v1336_v49, %v7512_v2  ;;  %v1351_v10 = vcombine.high %v1343_v31, %v1343_v31  ;;  %v637_v48 = vadd.f32 %v7506_v62, %v7575_v26 }
 0x114   :  { %v7661_v17 = vpop.f32.mrb[23].mxu0  ;;  %v5033_v16 = vmax.f32 %v5031_v14, %v5032_v57  ;;  %v5018_v18 = vsel %vm9686_vm3, %v3012_v59, -inf  ;;  %v3093_v19 = vcombine.low %v1384_v38, %v1386_v60  ;;  %v1394_v22 = vrot.slane %v7642_v36, %v7512_v2 }
 0x115   :  { %v5722_v24 = vsel %vm9686_vm3, %v5017_v5, -inf  ;;  %v5020_v25 = vmax.f32 %v5018_v18, %v5019_v55  ;;  %v3045_v30 = vcombine.low %v1343_v31, %v1351_v10  ;;  %v3067_v32 = vrot.slane %v1350_v9, %v7512_v2 }
 0x116   :  { %v5034_v33 = vrot.slane %v5033_v16, 1  ;;  %v5723_v35 = vmax.f32 %v5721_v44, %v5722_v24  ;;  %v3100_v23 = vrot.slane %v3092_v63, %v7512_v2  ;;  %v3107_v26 = vrot.slane %v3093_v19, %v7512_v2 }
 0x117   :  { %v3052_v14 = vrot.slane %v7627_v56, %v7512_v2  ;;  %v5021_v39 = vrot.slane %v5020_v25, 4  ;;  %v3059_v38 = vrot.slane %v3045_v30, %v7512_v2  ;;  %v818_v43 = vadd.f32 %v7508_v0, %v7506_v62 }
 0x118   :  { %v5035_v49 = vmax.f32 %v5033_v16, %v5034_v33  ;;  %v3108_v55 = vcombine.low %v3100_v23, %v3107_v26  ;;  %v3115_v31 = vrot.slane %v1394_v22, %v7512_v2  ;;  %v1009_v57 = vmax.f32 %v637_v48, 0.0 }
 0x119   :  { %v7676_v59 = vpop.f32.mrb[24].mxu0  ;;  %v5022_v44 = vmax.f32 %v5020_v25, %v5021_v39  ;;  %v3060_v60 = vcombine.low %v3052_v14, %v3059_v38  ;;  %v5037_v63 = vsel %vm4982_vm2, %v3067_v32, -inf  ;;  %v1387_v56 = vcombine.high %v7642_v36, %v7642_v36 }
 0x11a   :  { %v5724_v5 = vsel %vm9686_vm3, %v5035_v49, -inf  ;;  %v5054_v10 = vsel %vm9686_vm3, %v3108_v55, -inf  ;;  %v1352_v18 = vcombine.high %v1350_v9, %v1350_v9  ;;  %v1353_v0 = vcombine.high %v1009_v57, %v1009_v57  ;;  %v7689_v36 = vpop.f32.mrb[25].mxu0 }
 0x11b   :  { %v7683_v16 = vmax.f32 %v5723_v35, %v5724_v5  ;;  %v5023_v19 = vrot.slane %v5022_v44, 2  ;;  %v5036_v48 = vsel %vm9686_vm3, %v3060_v60, -inf  ;;  %v5055_v24 = vsel %vm4982_vm2, %v3115_v31, -inf  ;;  %v7701_v54 = vpop.f32.mrb[26].mxu0 }
 0x11c   :  { %v5038_v25 = vmax.f32 %v5036_v48, %v5037_v63  ;;  %v5056_v30 = vmax.f32 %v5054_v10, %v5055_v24  ;;  %v1360_v32 = vrot.slane %v1009_v57, %v7512_v2  ;;  %v1367_v33 = vrot.slane %v1353_v0, %v7512_v2 }
 0x11d   :  { %9695 = vst [vmem:[#allocation8_spill] sm:$0xff] %v7683_v16  ;;  %v5024_v23 = vmax.f32 %v5022_v44, %v5023_v19  ;;  %v7692_v26 = vrot.slane %v1387_v56, %v7512_v2  ;;  %v658_v9 = vadd.f32 %v7589_v53, %v7506_v62  ;;  %v1054_v35 = vmax.f32 %v818_v43, 0.0 }
 0x11e   :  { %v5039_v14 = vrot.slane %v5038_v25, 4  ;;  %v5057_v39 = vrot.slane %v5056_v30, 4  ;;  %v1368_v38 = vcombine.high %v1360_v32, %v1360_v32  ;;  %v1369_v49 = vcombine.high %v1367_v33, %v1367_v33 }
 0x11f   :  { %v5025_v55 = vrot.slane %v5024_v23, 1  ;;  %v1402_v31 = vcombine.high %v1394_v22, %v1394_v22  ;;  %v3068_v60 = vcombine.low %v1352_v18, %v1360_v32  ;;  %v1014_v57 = vmax.f32 %v658_v9, 0.0 }
 0x120   :  { %v5040_v63 = vmax.f32 %v5038_v25, %v5039_v14  ;;  %v5058_v5 = vmax.f32 %v5056_v30, %v5057_v39  ;;  %v3069_v10 = vcombine.low %v1368_v38, %v1367_v33  ;;  %v3091_v56 = vrot.slane %v1369_v49, %v7512_v2  ;;  %v7711_v14 = vpop.f32.mrb[27].mxu0 }
 0x121   :  { %v5026_v0 = vmax.f32 %v5024_v23, %v5025_v55  ;;  %v3076_v44 = vrot.slane %v3068_v60, %v7512_v2  ;;  %v810_v53 = vadd.f32 %v7506_v62, %v7514_v4  ;;  %v2118_v24 = vcombine.high %v1054_v35, %v1054_v35 }
 0x122   :  { %v5041_v43 = vrot.slane %v5040_v63, 2  ;;  %v5059_v19 = vrot.slane %v5058_v5, 2  ;;  %v3083_v48 = vrot.slane %v3069_v10, %v7512_v2  ;;  %v3116_v18 = vcombine.low %v1402_v31, %v7692_v26 }
 0x123   :  { %v5705_v22 = vsel %vm9686_vm3, %v5026_v0, -inf  ;;  %v1438_v25 = vcombine.high %v1014_v57, %v1014_v57  ;;  %v7706_v30 = vrot.slane %v1054_v35, %v7512_v2  ;;  %v9696_v4 = vmax.f32 %v7620_v50, %v7611_v41 }
 0x124   :  { %v5042_v32 = vmax.f32 %v5040_v63, %v5041_v43  ;;  %v5060_v33 = vmax.f32 %v5058_v5, %v5059_v19  ;;  %v3084_v9 = vcombine.low %v3076_v44, %v3083_v48  ;;  %v5046_v39 = vsel %vm4982_vm2, %v3091_v56, -inf }
 0x125   :  { %v5706_v23 = vmax.f32 %v9696_v4, %v5705_v22  ;;  %v7715_v38 = vrot.slane %v1014_v57, %v7512_v2  ;;  %v1052_v49 = vmax.f32 %v810_v53, 0.0  ;;  %v821_v55 = vadd.f32 %v7517_v7, %v7506_v62 }
 0x126   :  { %v5043_v35 = vrot.slane %v5042_v32, 1  ;;  %v5061_v31 = vrot.slane %v5060_v33, 1  ;;  %v5045_v60 = vsel %vm9686_vm3, %v3084_v9, -inf  ;;  %v650_v41 = vadd.f32 %v7506_v62, %v7592_v58 }
 0x127   :  { %v3124_v50 = vrot.slane %v3116_v18, %v7512_v2  ;;  %v5047_v63 = vmax.f32 %v5045_v60, %v5046_v39  ;;  %v2132_v5 = vrot.slane %v2118_v24, %v7512_v2  ;;  %v2133_v57 = vcombine.high %v7706_v30, %v7706_v30 }
 0x128   :  { %v5044_v10 = vmax.f32 %v5042_v32, %v5043_v35  ;;  %v5062_v0 = vmax.f32 %v5060_v33, %v5061_v31  ;;  %v1452_v44 = vrot.slane %v1438_v25, %v7512_v2  ;;  %v1012_v7 = vmax.f32 %v650_v41, 0.0 }
 0x129   :  { %v5048_v56 = vrot.slane %v5047_v63, 4  ;;  %v1453_v53 = vcombine.high %v7715_v38, %v7715_v38  ;;  %v1403_v58 = vcombine.high %v7692_v26, %v7692_v26  ;;  %v2084_v43 = vcombine.high %v1052_v49, %v1052_v49 }
 0x12a   :  { %v5707_v19 = vsel %vm9686_vm3, %v5044_v10, -inf  ;;  %v5709_v48 = vsel %vm9686_vm3, %v5062_v0, -inf  ;;  %v1404_v24 = vcombine.high %v1012_v7, %v1012_v7  ;;  %v1411_v22 = vrot.slane %v1012_v7, %v7512_v2 }
 0x12b   :  { %v5708_v18 = vmax.f32 %v5706_v23, %v5707_v19  ;;  %v5049_v32 = vmax.f32 %v5047_v63, %v5048_v56  ;;  %v7734_v33 = vcombine.low %v2133_v57, %v2132_v5  ;;  %v2098_v25 = vrot.slane %v2084_v43, %v7512_v2 }
 0x12c   :  { %v1418_v4 = vrot.slane %v1404_v24, %v7512_v2  ;;  %v1419_v9 = vcombine.high %v1411_v22, %v1411_v22  ;;  %v3117_v39 = vcombine.low %v1403_v58, %v1411_v22  ;;  %v661_v26 = vadd.f32 %v7596_v45, %v7506_v62  ;;  %v7755_v24 = vpop.f32.mrb[16].mxu1 }
 0x12d   :  { %v7740_v35 = vmax.f32 %v5708_v18, %v5709_v48  ;;  %v5050_v31 = vrot.slane %v5049_v32, 2  ;;  %v1454_v60 = vcombine.high %v1452_v44, %v1452_v44  ;;  %v2134_v41 = vcombine.high %v2132_v5, %v2132_v5  ;;  %9699 = vst [vmem:[#allocation11_spill] sm:$0xff] %v7755_v24  ;;  %v7763_v18 = vpop.f32.mrb[17].mxu1 }
 0x12e   :  { %v7742_v10 = vcombine.low %v1453_v53, %v1452_v44  ;;  %v3131_v23 = vrot.slane %v3117_v39, %v7512_v2  ;;  %v3139_v63 = vrot.slane %v1419_v9, %v7512_v2  ;;  %v7747_v57 = vrot.slane %v1052_v49, %v7512_v2  ;;  %9700 = vst [vmem:[#allocation12_spill] sm:$0xff] %v7763_v18 }
 0x12f   :  { %9697 = vst [vmem:[#allocation9_spill] sm:$0xff] %v7740_v35  ;;  %v2100_v0 = vcombine.high %v2098_v25, %v2098_v25  ;;  %v1015_v7 = vmax.f32 %v661_v26, 0.0  ;;  %v1055_v56 = vmax.f32 %v821_v55, 0.0  ;;  %v1420_v58 = vcombine.high %v1418_v4, %v1418_v4  ;;  %v7766_v26 = vpop.f32.mrb[28].mxu0 }
 0x130   :  { %9698 = vst [vmem:[#allocation10_spill] sm:$0xff] %v7747_v57  ;;  %v3132_v43 = vcombine.low %v3124_v50, %v3131_v23  ;;  %v813_v5 = vadd.f32 %v7506_v62, %v7520_v11  ;;  %v5051_v44 = vmax.f32 %v5049_v32, %v5050_v31  ;;  %v3187_v53 = vrot.slane %v1454_v60, %v7512_v2 }
 0x131   :  { %v3955_v19 = vrot.slane %v2134_v41, %v7512_v2  ;;  %v2135_v48 = vcombine.high %v1055_v56, %v1055_v56  ;;  %v5064_v22 = vsel %vm4982_vm2, %v3139_v63, -inf  ;;  %v2099_v50 = vcombine.high %v7747_v57, %v7747_v57  ;;  %9701 = vst [vmem:[#allocation13_spill] sm:$0xff] %v7766_v26  ;;  %v7771_v63 = vpop.f32.mrb[18].mxu1 }
 0x132   :  { %v5063_v55 = vsel %vm9686_vm3, %v3132_v43, -inf  ;;  %v3908_v32 = vcombine.low %v2098_v25, %v2100_v0  ;;  %v1455_v9 = vcombine.high %v1015_v7, %v1015_v7  ;;  %v2142_v39 = vrot.slane %v1055_v56, %v7512_v2  ;;  %9702 = vst [vmem:[#allocation14_spill] sm:$0xff] %v7771_v63  ;;  %v7779_v56 = vpop.f32.mrb[29].mxu0 }
 0x133   :  { %v5065_v11 = vmax.f32 %v5063_v55, %v5064_v22  ;;  %v3140_v31 = vcombine.low %v1418_v4, %v1420_v58  ;;  %v2149_v60 = vrot.slane %v2135_v48, %v7512_v2  ;;  %v653_v41 = vadd.f32 %v7506_v62, %v7599_v12  ;;  %9703 = vst [vmem:[#allocation15_spill] sm:$0xff] %v7779_v56 }
 0x134   :  { %v1053_v23 = vmax.f32 %v813_v5, 0.0  ;;  %v5052_v43 = vrot.slane %v5051_v44, 1  ;;  %v7774_v49 = vsel %vm4982_vm2, %v3187_v53, -inf  ;;  %v7777_v25 = vsel %vm4982_vm2, %v3955_v19, -inf }
 0x135   :  { %v5066_v0 = vrot.slane %v5065_v11, 4  ;;  %v7782_v4 = vrot.slane %v2099_v50, %v7512_v2  ;;  %v1462_v58 = vrot.slane %v1015_v7, %v7512_v2  ;;  %v1013_v48 = vmax.f32 %v653_v41, 0.0 }
 0x136   :  { %v2101_v12 = vcombine.high %v1053_v23, %v1053_v23  ;;  %v3916_v5 = vrot.slane %v3908_v32, %v7512_v2  ;;  %v1469_v55 = vrot.slane %v1455_v9, %v7512_v2  ;;  %v2150_v22 = vcombine.high %v2142_v39, %v2142_v39 }
 0x137   :  { %v2108_v53 = vrot.slane %v1053_v23, %v7512_v2  ;;  %v3148_v19 = vrot.slane %v3140_v31, %v7512_v2  ;;  %v2151_v45 = vcombine.high %v2149_v60, %v2149_v60  ;;  %v1421_v61 = vcombine.high %v1013_v48, %v1013_v48 }
 0x138   :  { %v1428_v16 = vrot.slane %v1013_v48, %v7512_v2  ;;  %v7790_v35 = vmax.f32 %v5051_v44, %v5052_v43  ;;  %v5067_v50 = vmax.f32 %v5065_v11, %v5066_v0  ;;  %v2115_v7 = vrot.slane %v2101_v12, %v7512_v2 }
 0x139   :  { %v2116_v41 = vcombine.high %v2108_v53, %v2108_v53  ;;  %v1470_v57 = vcombine.high %v1462_v58, %v1462_v58  ;;  %v1435_v32 = vrot.slane %v1421_v61, %v7512_v2  ;;  %v834_v9 = vadd.f32 %v7529_v29, %v7506_v62 }
 0x13a   :  { %v1436_v56 = vcombine.high %v1428_v16, %v1428_v16  ;;  %v1471_v23 = vcombine.high %v1469_v55, %v1469_v55  ;;  %v3956_v63 = vcombine.low %v2142_v39, %v2150_v22  ;;  %v2117_v31 = vcombine.high %v2115_v7, %v2115_v7 }
 0x13b   :  { %v3909_v26 = vcombine.low %v2108_v53, %v2116_v41  ;;  %v3957_v18 = vcombine.low %v2149_v60, %v2151_v45  ;;  %v1437_v24 = vcombine.high %v1435_v32, %v1435_v32  ;;  %v3931_v44 = vrot.slane %v2115_v7, %v7512_v2 }
 0x13c   :  { %v3141_v48 = vcombine.low %v1428_v16, %v1436_v56  ;;  %v5068_v11 = vrot.slane %v5067_v50, 2  ;;  %v3163_v43 = vrot.slane %v1435_v32, %v7512_v2  ;;  %v3932_v61 = vcombine.low %v2117_v31, %v7706_v30 }
 0x13d   :  { %v3923_v0 = vrot.slane %v3909_v26, %v7512_v2  ;;  %v7800_v12 = vcombine.low %v1462_v58, %v1470_v57  ;;  %v3164_v39 = vcombine.low %v1437_v24, %v7715_v38  ;;  %v1058_v22 = vmax.f32 %v834_v9, 0.0 }
 0x13e   :  { %v3155_v29 = vrot.slane %v3141_v48, %v7512_v2  ;;  %v3964_v45 = vrot.slane %v3956_v63, %v7512_v2  ;;  %v3940_v16 = vrot.slane %v3932_v61, %v7512_v2  ;;  %v5361_v56 = vsel %vm4982_vm2, %v3931_v44, -inf }
 0x13f   :  { %v3924_v60 = vcombine.low %v3916_v5, %v3923_v0  ;;  %v3971_v53 = vrot.slane %v3957_v18, %v7512_v2  ;;  %v3172_v26 = vrot.slane %v3164_v39, %v7512_v2  ;;  %v826_v30 = vadd.f32 %v7506_v62, %v7534_v34  ;;  %v7816_v5 = vpop.f32.mrb[19].mxu1  ;;  %v7822_v34 = vpop.f32.mrb[30].mxu0 }
 0x140   :  { %v3156_v7 = vcombine.low %v3148_v19, %v3155_v29  ;;  %v5069_v57 = vmax.f32 %v5067_v50, %v5068_v11  ;;  %v5073_v58 = vsel %vm4982_vm2, %v3163_v43, -inf  ;;  %v9704_v38 = vrot.slane %v7734_v33, %v7512_v2 }
 0x141   :  { %v5360_v63 = vsel %vm9686_vm3, %v3924_v60, -inf  ;;  %v9705_v18 = vrot.slane %v7742_v10, %v7512_v2  ;;  %v2186_v9 = vcombine.high %v1058_v22, %v1058_v22  ;;  %v2193_v33 = vrot.slane %v1058_v22, %v7512_v2 }
 0x142   :  { %v3948_v24 = vcombine.low %v3940_v16, %v9704_v38  ;;  %v5072_v41 = vsel %vm9686_vm3, %v3156_v7, -inf  ;;  %v5362_v32 = vmax.f32 %v5360_v63, %v5361_v56  ;;  %v1056_v48 = vmax.f32 %v826_v30, 0.0  ;;  %v7836_v63 = vpop.f32.mrb[20].mxu1 }
 0x143   :  { %v3180_v19 = vcombine.low %v3172_v26, %v9705_v18  ;;  %v5074_v50 = vmax.f32 %v5072_v41, %v5073_v58  ;;  %v3972_v44 = vcombine.low %v3964_v45, %v3971_v53  ;;  %v5070_v10 = vrot.slane %v5069_v57, 1 }
 0x144   :  { %v5369_v31 = vsel %vm9686_vm3, %v3948_v24, -inf  ;;  %v5363_v43 = vrot.slane %v5362_v32, 4  ;;  %v3189_v61 = vcombine.low %v1469_v55, %v1471_v23  ;;  %v2200_v56 = vrot.slane %v2186_v9, %v7512_v2  ;;  %v7842_v9 = vpop.f32.mrb[31].mxu0 }
 0x145   :  { %v5081_v11 = vsel %vm9686_vm3, %v3180_v19, -inf  ;;  %v5371_v0 = vmax.f32 %v5369_v31, %v7777_v25  ;;  %v5075_v29 = vrot.slane %v5074_v50, 4  ;;  %v2159_v7 = vrot.slane %v1056_v48, %v7512_v2 }
 0x146   :  { %v5083_v39 = vmax.f32 %v5081_v11, %v7774_v49  ;;  %v5364_v60 = vmax.f32 %v5362_v32, %v5363_v43  ;;  %v2201_v30 = vcombine.high %v2193_v33, %v2193_v33  ;;  %v2152_v45 = vcombine.high %v1056_v48, %v1056_v48 }
 0x147   :  { %v5372_v16 = vrot.slane %v5371_v0, 4  ;;  %v5076_v26 = vmax.f32 %v5074_v50, %v5075_v29  ;;  %v3979_v38 = vrot.slane %v2159_v7, %v7512_v2  ;;  %v5378_v25 = vsel %vm9686_vm3, %v3972_v44, -inf }
 0x148   :  { %v5084_v22 = vrot.slane %v5083_v39, 4  ;;  %v5365_v53 = vrot.slane %v5364_v60, 2  ;;  %v3203_v55 = vrot.slane %v3189_v61, %v7512_v2  ;;  %v2167_v49 = vcombine.high %v2159_v7, %v2159_v7 }
 0x149   :  { %v5373_v58 = vmax.f32 %v5371_v0, %v5372_v16  ;;  %v5077_v23 = vrot.slane %v5076_v26, 2  ;;  %v837_v24 = vadd.f32 %v7537_v40, %v7506_v62  ;;  %v5071_v18 = vmax.f32 %v5069_v57, %v5070_v10 }
 0x14a   :  { %v4027_v19 = vrot.slane %v2200_v56, %v7512_v2  ;;  %v5379_v41 = vsel %vm4982_vm2, %v3979_v38, -inf  ;;  %v674_v32 = vadd.f32 %v7617_v47, %v7506_v62  ;;  %v5085_v50 = vmax.f32 %v5083_v39, %v5084_v22 }
 0x14b   :  { %v5366_v31 = vmax.f32 %v5364_v60, %v5365_v53  ;;  %v7845_v48 = vrot.slane %v2152_v45, %v7512_v2  ;;  %v5380_v44 = vmax.f32 %v5378_v25, %v5379_v41  ;;  %v3196_v40 = vrot.slane %v7800_v12, %v7512_v2  ;;  %v7876_v25 = vpop.f32.mrb[21].mxu1 }
 0x14c   :  { %v5374_v11 = vrot.slane %v5373_v58, 2  ;;  %v7849_v57 = vcombine.low %v2193_v33, %v2201_v30  ;;  %v1059_v43 = vmax.f32 %v837_v24, 0.0  ;;  %v7853_v0 = vsel %vm9686_vm3, %v7790_v35, -inf  ;;  %v7884_v41 = vpop.f32.mrb[22].mxu1 }
 0x14d   :  { %9706 = vst [vmem:[#allocation16_spill] sm:$0xff] %v7853_v0  ;;  %v7857_v47 = vsel %vm4982_vm2, %v7782_v4, -inf  ;;  %v5078_v10 = vmax.f32 %v5076_v26, %v5077_v23  ;;  %v7860_v61 = vcombine.low %v2167_v49, %v7845_v48  ;;  %v7863_v29 = vsel %vm9686_vm3, %v5071_v18, -inf }
 0x14e   :  { %9707 = vst [vmem:[#allocation17_spill] sm:$0xff] %v7857_v47  ;;  %9708 = vst [vmem:[#allocation18_spill] sm:$0xff] %v7863_v29  ;;  %v3204_v12 = vcombine.low %v3196_v40, %v3203_v55  ;;  %v1018_v39 = vmax.f32 %v674_v32, 0.0  ;;  %v2202_v33 = vcombine.high %v2200_v56, %v2200_v56  ;;  %v5086_v60 = vrot.slane %v5085_v50, 2 }
 0x14f   :  { %v5367_v16 = vrot.slane %v5366_v31, 1  ;;  %v7866_v7 = vsel %vm4982_vm2, %v4027_v19, -inf  ;;  %v2203_v35 = vcombine.high %v1059_v43, %v1059_v43  ;;  %v5375_v22 = vmax.f32 %v5373_v58, %v5374_v11 }
 0x150   :  { %v2210_v26 = vrot.slane %v1059_v43, %v7512_v2  ;;  %v666_v30 = vadd.f32 %v7506_v62, %v7622_v52  ;;  %v5079_v45 = vrot.slane %v5078_v10, 1  ;;  %v3988_v53 = vrot.slane %v7860_v61, %v7512_v2 }
 0x151   :  { %v5381_v56 = vrot.slane %v5380_v44, 4  ;;  %v2217_v38 = vrot.slane %v2203_v35, %v7512_v2  ;;  %v1506_v55 = vcombine.high %v1018_v39, %v1018_v39  ;;  %v7878_v24 = vmax.f32 %v5085_v50, %v5086_v60 }
 0x152   :  { %v2218_v23 = vcombine.high %v2210_v26, %v2210_v26  ;;  %v4028_v58 = vcombine.low %v2202_v33, %v2210_v26  ;;  %v1016_v49 = vmax.f32 %v666_v30, 0.0  ;;  %v7880_v18 = vmax.f32 %v5366_v31, %v5367_v16 }
 0x153   :  { %9709 = vst [vmem:[#allocation19_spill] sm:$0xff] %v7878_v24  ;;  %v2219_v19 = vcombine.high %v2217_v38, %v2217_v38  ;;  %v829_v52 = vadd.f32 %v7506_v62, %v7542_v46  ;;  %v5376_v32 = vrot.slane %v5375_v22, 1  ;;  %v1513_v40 = vrot.slane %v1018_v39, %v7512_v2 }
 0x154   :  { %9710 = vst [vmem:[#allocation20_spill] sm:$0xff] %v7880_v18  ;;  %v4029_v11 = vcombine.low %v2218_v23, %v2217_v38  ;;  %v4036_v43 = vrot.slane %v4028_v58, %v7512_v2  ;;  %v5382_v61 = vmax.f32 %v5380_v44, %v5381_v56  ;;  %v7890_v50 = vrot.slane %v1016_v49, %v7512_v2 }
 0x155   :  { %v4051_v33 = vrot.slane %v2219_v19, %v7512_v2  ;;  %v1057_v31 = vmax.f32 %v829_v52, 0.0  ;;  %v7892_v60 = vmax.f32 %v5078_v10, %v5079_v45  ;;  %v7895_v16 = vrot.slane %v1506_v55, %v7512_v2  ;;  %v7906_v10 = vpop.f32.mrb[23].mxu1 }
 0x156   :  { %v4043_v46 = vrot.slane %v4029_v11, %v7512_v2  ;;  %v677_v39 = vadd.f32 %v7630_v6, %v7506_v62  ;;  %v3211_v44 = vrot.slane %v7890_v50, %v7512_v2  ;;  %v5090_v26 = vsel %vm9686_vm3, %v3204_v12, -inf }
 0x157   :  { %9711 = vst [vmem:[#allocation21_spill] sm:$0xff] %v7892_v60  ;;  %v5406_v35 = vsel %vm4982_vm2, %v4051_v33, -inf  ;;  %v2168_v30 = vcombine.high %v7845_v48, %v7845_v48  ;;  %v2169_v56 = vcombine.high %v1057_v31, %v1057_v31  ;;  %v2176_v38 = vrot.slane %v1057_v31, %v7512_v2 }
 0x158   :  { %v4044_v45 = vcombine.low %v4036_v43, %v4043_v46  ;;  %v1019_v55 = vmax.f32 %v677_v39, 0.0  ;;  %v7909_v23 = vmax.f32 %v5375_v22, %v5376_v32  ;;  %v5383_v6 = vrot.slane %v5382_v61, 2 }
 0x159   :  { %v1521_v58 = vcombine.high %v1513_v40, %v1513_v40  ;;  %v5091_v19 = vsel %vm4982_vm2, %v3211_v44, -inf  ;;  %v2183_v12 = vrot.slane %v2169_v56, %v7512_v2  ;;  %v2184_v33 = vcombine.high %v2176_v38, %v2176_v38 }
 0x15a   :  { %9712 = vst [vmem:[#allocation22_spill] sm:$0xff] %v7909_v23  ;;  %v5405_v52 = vsel %vm9686_vm3, %v4044_v45, -inf  ;;  %v5092_v11 = vmax.f32 %v5090_v26, %v5091_v19  ;;  %v3981_v4 = vcombine.low %v2168_v30, %v2176_v38  ;;  %v1522_v43 = vcombine.high %v7895_v16, %v7895_v16 }
 0x15b   :  { %v5407_v48 = vmax.f32 %v5405_v52, %v5406_v35  ;;  %v1523_v46 = vcombine.high %v1019_v55, %v1019_v55  ;;  %v1472_v31 = vcombine.high %v1016_v49, %v1016_v49  ;;  %v2185_v39 = vcombine.high %v2183_v12, %v2183_v12  ;;  %v7922_v35 = vpop.f32.mrb[24].mxu1 }
 0x15c   :  { %v4003_v22 = vrot.slane %v2184_v33, %v7512_v2  ;;  %v1530_v32 = vrot.slane %v1019_v55, %v7512_v2  ;;  %v3995_v44 = vrot.slane %v3981_v4, %v7512_v2  ;;  %v669_v45 = vadd.f32 %v7506_v62, %v7634_v3  ;;  %v7925_v55 = vpop.f32.mrb[25].mxu1  ;;  %v7929_v62 = vpop.f32.mrb[32].mxu0 }
 0x15d   :  { %v5408_v29 = vrot.slane %v5407_v48, 4  ;;  %v1537_v26 = vrot.slane %v1523_v46, %v7512_v2  ;;  %v5093_v30 = vrot.slane %v5092_v11, 4  ;;  %v4004_v56 = vcombine.low %v2183_v12, %v2185_v39 }
 0x15e   :  { %v5388_v38 = vsel %vm4982_vm2, %v4003_v22, -inf  ;;  %v1538_v49 = vcombine.high %v1530_v32, %v1530_v32  ;;  %v3996_v52 = vcombine.low %v3988_v53, %v3995_v44  ;;  %v3260_v0 = vcombine.low %v1522_v43, %v1530_v32 }
 0x15f   :  { %v5409_v19 = vmax.f32 %v5407_v48, %v5408_v29  ;;  %v1539_v33 = vcombine.high %v1537_v26, %v1537_v26  ;;  %v1486_v4 = vrot.slane %v1472_v31, %v7512_v2  ;;  %v4012_v46 = vrot.slane %v4004_v56, %v7512_v2 }
 0x160   :  { %v3261_v60 = vcombine.low %v1538_v49, %v1537_v26  ;;  %v1017_v24 = vmax.f32 %v669_v45, 0.0  ;;  %v3237_v3 = vcombine.low %v1513_v40, %v1521_v58  ;;  %v1487_v12 = vcombine.high %v7890_v50, %v7890_v50 }
 0x161   :  { %v5387_v39 = vsel %vm9686_vm3, %v3996_v52, -inf  ;;  %v3268_v29 = vrot.slane %v3260_v0, %v7512_v2  ;;  %v9713_v53 = vrot.slane %v7849_v57, %v7512_v2  ;;  %v3283_v22 = vrot.slane %v1539_v33, %v7512_v2 }
 0x162   :  { %v5389_v43 = vmax.f32 %v5387_v39, %v5388_v38  ;;  %v3275_v31 = vrot.slane %v3261_v60, %v7512_v2  ;;  %v5384_v32 = vmax.f32 %v5382_v61, %v5383_v6  ;;  %v5410_v44 = vrot.slane %v5409_v19, 2  ;;  %v7946_v6 = vld [vmem:[#allocation4] ss:$0 sm:$0xff] }
 0x163   :  { %v4020_v48 = vcombine.low %v4012_v46, %v9713_v53  ;;  %v5094_v26 = vmax.f32 %v5092_v11, %v5093_v30  ;;  %v1489_v40 = vcombine.high %v1017_v24, %v1017_v24  ;;  %v1488_v56 = vcombine.high %v1486_v4, %v1486_v4 }
 0x164   :  { %v5390_v58 = vrot.slane %v5389_v43, 4  ;;  %v3276_v45 = vcombine.low %v3268_v29, %v3275_v31  ;;  %v3212_v49 = vcombine.low %v1487_v12, %v1486_v4  ;;  %v1496_v57 = vrot.slane %v1017_v24, %v7512_v2 }
 0x165   :  { %v5396_v50 = vsel %vm9686_vm3, %v4020_v48, -inf  ;;  %v1503_v38 = vrot.slane %v1489_v40, %v7512_v2  ;;  %v5118_v61 = vsel %vm4982_vm2, %v3283_v22, -inf  ;;  %v850_v11 = vadd.f32 %v7946_v6, %v7557_v8 }
 0x166   :  { %v5398_v0 = vmax.f32 %v5396_v50, %v7866_v7  ;;  %v5391_v52 = vmax.f32 %v5389_v43, %v5390_v58  ;;  %v5117_v60 = vsel %vm9686_vm3, %v3276_v45, -inf  ;;  %v5411_v30 = vmax.f32 %v5409_v19, %v5410_v44 }
 0x167   :  { %v5095_v33 = vrot.slane %v5094_v26, 2  ;;  %v5119_v46 = vmax.f32 %v5117_v60, %v5118_v61  ;;  %v1504_v4 = vcombine.high %v1496_v57, %v1496_v57  ;;  %v1505_v7 = vcombine.high %v1503_v38, %v1503_v38 }
 0x168   :  { %v5399_v12 = vrot.slane %v5398_v0, 4  ;;  %v3213_v39 = vcombine.low %v1488_v56, %v1496_v57  ;;  %v1062_v24 = vmax.f32 %v850_v11, 0.0  ;;  %v3251_v29 = vrot.slane %v3237_v3, %v7512_v2 }
 0x169   :  { %v3259_v53 = vrot.slane %v7895_v16, %v7512_v2  ;;  %v3220_v48 = vrot.slane %v3212_v49, %v7512_v2  ;;  %v5392_v43 = vrot.slane %v5391_v52, 2  ;;  %v3235_v8 = vrot.slane %v1504_v4, %v7512_v2 }
 0x16a   :  { %v3227_v31 = vrot.slane %v3213_v39, %v7512_v2  ;;  %v3236_v19 = vcombine.low %v1503_v38, %v1505_v7  ;;  %v2254_v22 = vcombine.high %v1062_v24, %v1062_v24  ;;  %v5385_v44 = vrot.slane %v5384_v32, 1 }
 0x16b   :  { %v5412_v40 = vrot.slane %v5411_v30, 1  ;;  %v7956_v58 = vmax.f32 %v5094_v26, %v5095_v33  ;;  %v7959_v50 = vrot.slane %v1062_v24, %v7512_v2  ;;  %v5400_v3 = vmax.f32 %v5398_v0, %v5399_v12 }
 0x16c   :  { %v3228_v45 = vcombine.low %v3220_v48, %v3227_v31  ;;  %v3244_v16 = vrot.slane %v3236_v19, %v7512_v2  ;;  %v2268_v56 = vrot.slane %v2254_v22, %v7512_v2  ;;  %v5109_v49 = vsel %vm4982_vm2, %v3259_v53, -inf  ;;  %v7985_v31 = vpop.f32.mrb[33].mxu0 }
 0x16d   :  { %v5120_v57 = vrot.slane %v5119_v46, 4  ;;  %v2269_v38 = vcombine.high %v7959_v50, %v7959_v50  ;;  %v842_v60 = vadd.f32 %v7946_v6, %v7564_v15  ;;  %v7968_v26 = vmax.f32 %v5391_v52, %v5392_v43  ;;  %v7978_v15 = vpop.f32.mrb[26].mxu1 }
 0x16e   :  { %v3252_v61 = vcombine.low %v3244_v16, %v3251_v29  ;;  %v5099_v11 = vsel %vm9686_vm3, %v3228_v45, -inf  ;;  %v5100_v0 = vsel %vm4982_vm2, %v3235_v8, -inf  ;;  %v7972_v33 = vmax.f32 %v5384_v32, %v5385_v44 }
 0x16f   :  { %v5101_v12 = vmax.f32 %v5099_v11, %v5100_v0  ;;  %v2270_v7 = vcombine.high %v2268_v56, %v2268_v56  ;;  %v7975_v39 = vmax.f32 %v5411_v30, %v5412_v40  ;;  %v5401_v24 = vrot.slane %v5400_v3, 2 }
 0x170   :  { %v5108_v53 = vsel %vm9686_vm3, %v3252_v61, -inf  ;;  %v1060_v48 = vmax.f32 %v842_v60, 0.0  ;;  %v7980_v52 = vmax.f32 %v5119_v46, %v5120_v57  ;;  %v4099_v32 = vrot.slane %v2269_v38, %v7512_v2 }
 0x171   :  { %v5102_v29 = vrot.slane %v5101_v12, 4  ;;  %v7982_v43 = vmax.f32 %v5108_v53, %v5109_v49  ;;  %v690_v22 = vadd.f32 %v7946_v6, %v7648_v20  ;;  %v4100_v40 = vcombine.low %v2268_v56, %v2270_v7  ;;  %v8007_v53 = vpop.f32.mrb[27].mxu1 }
 0x172   :  { %v2220_v19 = vcombine.high %v1060_v48, %v1060_v48  ;;  %v2227_v30 = vrot.slane %v1060_v48, %v7512_v2  ;;  %v853_v46 = vadd.f32 %v7946_v6, %v7569_v21  ;;  %v682_v45 = vadd.f32 %v7946_v6, %v7654_v51 }
 0x173   :  { %v5103_v44 = vmax.f32 %v5101_v12, %v5102_v29  ;;  %v7995_v16 = vmax.f32 %v5400_v3, %v5401_v24  ;;  %v1022_v38 = vmax.f32 %v690_v22, 0.0  ;;  %v8000_v61 = vsel %vm4982_vm2, %v4099_v32, -inf }
 0x174   :  { %v2234_v49 = vrot.slane %v2220_v19, %v7512_v2  ;;  %v2235_v57 = vcombine.high %v2227_v30, %v2227_v30  ;;  %v1063_v20 = vmax.f32 %v853_v46, 0.0  ;;  %v1020_v11 = vmax.f32 %v682_v45, 0.0 }
 0x175   :  { %v1574_v12 = vcombine.high %v1022_v38, %v1022_v38  ;;  %v8003_v21 = vrot.slane %v1022_v38, %v7512_v2  ;;  %v5104_v51 = vrot.slane %v5103_v44, 2  ;;  %v4108_v3 = vrot.slane %v4100_v40, %v7512_v2 }
 0x176   :  { %v2236_v56 = vcombine.high %v2234_v49, %v2234_v49  ;;  %v4052_v0 = vcombine.low %v2227_v30, %v2235_v57  ;;  %v2271_v7 = vcombine.high %v1063_v20, %v1063_v20  ;;  %v2278_v24 = vrot.slane %v1063_v20, %v7512_v2 }
 0x177   :  { %v1588_v32 = vrot.slane %v1574_v12, %v7512_v2  ;;  %v1589_v19 = vcombine.high %v8003_v21, %v8003_v21  ;;  %v1540_v46 = vcombine.high %v1020_v11, %v1020_v11  ;;  %v845_v40 = vadd.f32 %v7946_v6, %v7577_v27 }
 0x178   :  { %v4053_v48 = vcombine.low %v2234_v49, %v2236_v56  ;;  %v4060_v29 = vrot.slane %v4052_v0, %v7512_v2  ;;  %v8014_v30 = vrot.slane %v2271_v7, %v7512_v2  ;;  %v2286_v22 = vcombine.high %v2278_v24, %v2278_v24  ;;  %v8026_v7 = vpop.f32.mrb[34].mxu0 }
 0x179   :  { %v1590_v49 = vcombine.high %v1588_v32, %v1588_v32  ;;  %v1547_v38 = vrot.slane %v1020_v11, %v7512_v2  ;;  %v8021_v20 = vmax.f32 %v5103_v44, %v5104_v51  ;;  %v1554_v12 = vrot.slane %v1540_v46, %v7512_v2 }
 0x17a   :  { %v4067_v57 = vrot.slane %v4053_v48, %v7512_v2  ;;  %v4101_v56 = vcombine.low %v2278_v24, %v2286_v22  ;;  %v4123_v0 = vrot.slane %v8014_v30, %v7512_v2  ;;  %v8029_v27 = vrot.slane %v1589_v19, %v7512_v2 }
 0x17b   :  { %v3332_v45 = vcombine.low %v1588_v32, %v1590_v49  ;;  %v1555_v8 = vcombine.high %v1547_v38, %v1547_v38  ;;  %v1556_v44 = vcombine.high %v1554_v12, %v1554_v12  ;;  %v1061_v51 = vmax.f32 %v845_v40, 0.0 }
 0x17c   :  { %v4068_v60 = vcombine.low %v4060_v29, %v4067_v57  ;;  %v4115_v48 = vrot.slane %v4101_v56, %v7512_v2  ;;  %v5433_v11 = vsel %vm4982_vm2, %v4123_v0, -inf  ;;  %v693_v46 = vadd.f32 %v7946_v6, %v7656_v1 }
 0x17d   :  { %v3340_v24 = vrot.slane %v3332_v45, %v7512_v2  ;;  %v3284_v22 = vcombine.low %v1547_v38, %v1555_v8  ;;  %v3285_v57 = vcombine.low %v1554_v12, %v1556_v44  ;;  %v2237_v19 = vcombine.high %v1061_v51, %v1061_v51  ;;  %v8046_v45 = vpop.f32.mrb[28].mxu1 }
 0x17e   :  { %v5414_v4 = vsel %vm9686_vm3, %v4068_v60, -inf  ;;  %v4116_v29 = vcombine.low %v4108_v3, %v4115_v48  ;;  %v2244_v32 = vrot.slane %v1061_v51, %v7512_v2  ;;  %v1023_v56 = vmax.f32 %v693_v46, 0.0  ;;  %9714 = vst [vmem:[#allocation23_spill] sm:$0xff] %v8046_v45  ;;  %v8050_v51 = vpop.f32.mrb[35].mxu0 }
 0x17f   :  { %v3292_v49 = vrot.slane %v3284_v22, %v7512_v2  ;;  %v685_v0 = vadd.f32 %v7946_v6, %v7661_v17  ;;  %v866_v40 = vadd.f32 %v7946_v6, %v7601_v13  ;;  %v3299_v60 = vrot.slane %v3285_v57, %v7512_v2  ;;  %9715 = vst [vmem:[#allocation24_spill] sm:$0xff] %v8050_v51 }
 0x180   :  { %v5432_v8 = vsel %vm9686_vm3, %v4116_v29, -inf  ;;  %v2251_v1 = vrot.slane %v2237_v19, %v7512_v2  ;;  %v2252_v3 = vcombine.high %v2244_v32, %v2244_v32  ;;  %v4075_v12 = vrot.slane %v2244_v32, %v7512_v2 }
 0x181   :  { %v5434_v38 = vmax.f32 %v5432_v8, %v5433_v11  ;;  %v1591_v48 = vcombine.high %v1023_v56, %v1023_v56  ;;  %v1598_v44 = vrot.slane %v1023_v56, %v7512_v2  ;;  %v3300_v17 = vcombine.low %v3292_v49, %v3299_v60 }
 0x182   :  { %v2253_v22 = vcombine.high %v2251_v1, %v2251_v1  ;;  %v4076_v13 = vcombine.low %v2252_v3, %v2251_v1  ;;  %v1021_v46 = vmax.f32 %v685_v0, 0.0  ;;  %v5415_v57 = vsel %vm4982_vm2, %v4075_v12, -inf }
 0x183   :  { %v5435_v29 = vrot.slane %v5434_v38, 4  ;;  %v8054_v19 = vrot.slane %v1591_v48, %v7512_v2  ;;  %v1606_v23 = vcombine.high %v1598_v44, %v1598_v44  ;;  %v5416_v8 = vmax.f32 %v5414_v4, %v5415_v57 }
 0x184   :  { %v4077_v11 = vcombine.low %v2253_v22, %v7959_v50  ;;  %v4084_v32 = vrot.slane %v4076_v13, %v7512_v2  ;;  %v1557_v47 = vcombine.high %v1021_v46, %v1021_v46  ;;  %v1564_v0 = vrot.slane %v1021_v46, %v7512_v2 }
 0x185   :  { %v5436_v56 = vmax.f32 %v5434_v38, %v5435_v29  ;;  %v3333_v18 = vcombine.low %v1598_v44, %v1606_v23  ;;  %v3355_v49 = vrot.slane %v8054_v19, %v7512_v2  ;;  %v5417_v1 = vrot.slane %v5416_v8, 4 }
 0x186   :  { %v4091_v60 = vrot.slane %v4077_v11, %v7512_v2  ;;  %v1571_v3 = vrot.slane %v1557_v47, %v7512_v2  ;;  %v5126_v12 = vsel %vm9686_vm3, %v3300_v17, -inf  ;;  %v1572_v22 = vcombine.high %v1564_v0, %v1564_v0 }
 0x187   :  { %v5437_v48 = vrot.slane %v5436_v56, 2  ;;  %v3347_v50 = vrot.slane %v3333_v18, %v7512_v2  ;;  %v5145_v4 = vsel %vm4982_vm2, %v3355_v49, -inf  ;;  %v5418_v23 = vmax.f32 %v5416_v8, %v5417_v1 }
 0x188   :  { %v4092_v38 = vcombine.low %v4084_v32, %v4091_v60  ;;  %v1573_v44 = vcombine.high %v1571_v3, %v1571_v3  ;;  %v3307_v13 = vrot.slane %v1564_v0, %v7512_v2  ;;  %v3308_v57 = vcombine.low %v1572_v22, %v1571_v3 }
 0x189   :  { %v5438_v29 = vmax.f32 %v5436_v56, %v5437_v48  ;;  %v3348_v46 = vcombine.low %v3340_v24, %v3347_v50  ;;  %v1066_v11 = vmax.f32 %v866_v40, 0.0  ;;  %v5419_v51 = vrot.slane %v5418_v23, 2 }
 0x18a   :  { %v5423_v47 = vsel %vm9686_vm3, %v4092_v38, -inf  ;;  %v3309_v17 = vcombine.low %v1573_v44, %v8003_v21  ;;  %v5127_v45 = vsel %vm4982_vm2, %v3307_v13, -inf  ;;  %v3316_v8 = vrot.slane %v3308_v57, %v7512_v2 }
 0x18b   :  { %v5439_v18 = vrot.slane %v5438_v29, 1  ;;  %v5425_v49 = vmax.f32 %v5423_v47, %v8000_v61  ;;  %v5144_v32 = vsel %vm9686_vm3, %v3348_v46, -inf  ;;  %v5420_v60 = vmax.f32 %v5418_v23, %v5419_v51  ;;  %v8090_v51 = vpop.f32.mrb[29].mxu1 }
 0x18c   :  { %v5146_v0 = vmax.f32 %v5144_v32, %v5145_v4  ;;  %v3323_v24 = vrot.slane %v3309_v17, %v7512_v2  ;;  %v5128_v56 = vmax.f32 %v5126_v12, %v5127_v45  ;;  %v8076_v40 = vsel %vm9686_vm3, %v7972_v33, -inf }
 0x18d   :  { %9716 = vst [vmem:[#allocation25_spill] sm:$0xff] %v8076_v40  ;;  %v8080_v21 = vsel %vm9686_vm3, %v7975_v39, -inf  ;;  %v9718_v1 = vrot.slane %v7956_v58, 1  ;;  %v8088_v3 = vrot.slane %v1066_v11, %v7512_v2  ;;  %v9720_v45 = vrot.slane %v7968_v26, 1  ;;  %v8096_v39 = vpop.f32.mrb[30].mxu1 }
 0x18e   :  { %9717 = vst [vmem:[#allocation26_spill] sm:$0xff] %v8080_v21  ;;  %v5403_v33 = vrot.slane %v7995_v16, 1  ;;  %v5426_v48 = vrot.slane %v5425_v49, 4  ;;  %v3324_v50 = vcombine.low %v3316_v8, %v3323_v24  ;;  %v5106_v4 = vrot.slane %v8021_v20, 1  ;;  %v8104_v44 = vpop.f32.mrb[31].mxu1 }
 0x18f   :  { %v8085_v61 = vmax.f32 %v7956_v58, %v9718_v1  ;;  %v5395_v12 = vmax.f32 %v7968_v26, %v9720_v45  ;;  %v9721_v58 = vrot.slane %v7982_v43, 4  ;;  %v5440_v38 = vmax.f32 %v5438_v29, %v5439_v18 }
 0x190   :  { %v2322_v23 = vcombine.high %v1066_v11, %v1066_v11  ;;  %v9723_v13 = vrot.slane %v7980_v52, 2  ;;  %v5136_v46 = vsel %vm4982_vm2, %v8029_v27, -inf  ;;  %v5421_v57 = vrot.slane %v5420_v60, 1 }
 0x191   :  { %9719 = vst [vmem:[#allocation27_spill] sm:$0xff] %v8085_v61  ;;  %v8102_v22 = vmax.f32 %v7982_v43, %v9721_v58  ;;  %v5135_v47 = vsel %vm9686_vm3, %v3324_v50, -inf  ;;  %v5147_v17 = vrot.slane %v5146_v0, 4  ;;  %v5129_v32 = vrot.slane %v5128_v56, 4  ;;  %v8134_v50 = vpop.f32.mrb[32].mxu1 }
 0x192   :  { %v8109_v26 = vmax.f32 %v7980_v52, %v9723_v13  ;;  %v8114_v8 = vmax.f32 %v5135_v47, %v5136_v46  ;;  %v2337_v43 = vcombine.high %v8088_v3, %v8088_v3  ;;  %v8119_v29 = vmax.f32 %v7995_v16, %v5403_v33 }
 0x193   :  { %9722 = vst [vmem:[#allocation28_spill] sm:$0xff] %v8102_v22  ;;  %v8122_v11 = vsel %vm9686_vm3, %v5395_v12, -inf  ;;  %v5427_v52 = vmax.f32 %v5425_v49, %v5426_v48  ;;  %v858_v27 = vadd.f32 %v7946_v6, %v7605_v28  ;;  %v8127_v18 = vmax.f32 %v8021_v20, %v5106_v4  ;;  %v8140_v12 = vpop.f32.mrb[33].mxu1 }
 0x194   :  { %9724 = vst [vmem:[#allocation29_spill] sm:$0xff] %v8109_v26  ;;  %9725 = vst [vmem:[#allocation30_spill] sm:$0xff] %v8119_v29  ;;  %v8131_v1 = vsel %vm9686_vm3, %v5440_v38, -inf  ;;  %v2336_v45 = vrot.slane %v2322_v23, %v7512_v2  ;;  %v5422_v16 = vmax.f32 %v5420_v60, %v5421_v57  ;;  %v2287_v49 = vcombine.high %v8014_v30, %v8014_v30 }
 0x195   :  { %9726 = vst [vmem:[#allocation31_spill] sm:$0xff] %v8122_v11  ;;  %9727 = vst [vmem:[#allocation32_spill] sm:$0xff] %v8127_v18  ;;  %v1064_v33 = vmax.f32 %v858_v27, 0.0  ;;  %v869_v28 = vadd.f32 %v7946_v6, %v7644_v37  ;;  %v8142_v20 = vmax.f32 %v5146_v0, %v5147_v17  ;;  %v5130_v48 = vmax.f32 %v5128_v56, %v5129_v32 }
 0x196   :  { %9728 = vst [vmem:[#allocation33_spill] sm:$0xff] %v8131_v1  ;;  %v4172_v4 = vcombine.low %v2337_v43, %v2336_v45  ;;  %v861_v58 = vadd.f32 %v7946_v6, %v7650_v42  ;;  %v5428_v38 = vrot.slane %v5427_v52, 2  ;;  %v4171_v30 = vrot.slane %v8088_v3, %v7512_v2 }
 0x197   :  { %9729 = vst [vmem:[#allocation34_spill] sm:$0xff] %v8142_v20  ;;  %v2288_v23 = vcombine.high %v1064_v33, %v1064_v33  ;;  %v2295_v60 = vrot.slane %v1064_v33, %v7512_v2  ;;  %v1067_v13 = vmax.f32 %v869_v28, 0.0  ;;  %v2338_v46 = vcombine.high %v2336_v45, %v2336_v45 }
 0x198   :  { %v1065_v57 = vmax.f32 %v861_v58, 0.0  ;;  %v706_v37 = vadd.f32 %v7946_v6, %v7676_v59  ;;  %v8152_v0 = vsel %vm9686_vm3, %v5422_v16, -inf  ;;  %v4180_v17 = vrot.slane %v4172_v4, %v7512_v2 }
 0x199   :  { %9730 = vst [vmem:[#allocation35_spill] sm:$0xff] %v8152_v0  ;;  %v2302_v56 = vrot.slane %v2288_v23, %v7512_v2  ;;  %v2303_v47 = vcombine.high %v2295_v60, %v2295_v60  ;;  %v4124_v42 = vcombine.low %v2287_v49, %v2295_v60  ;;  %v2346_v32 = vrot.slane %v1067_v13, %v7512_v2  ;;  %v8195_v0 = vpop.f32.mrb[34].mxu1 }
 0x19a   :  { %v2305_v43 = vcombine.high %v1065_v57, %v1065_v57  ;;  %v2312_v27 = vrot.slane %v1065_v57, %v7512_v2  ;;  %v1026_v28 = vmax.f32 %v706_v37, 0.0  ;;  %v5131_v23 = vrot.slane %v5130_v48, 2 }
 0x19b   :  { %v2304_v3 = vcombine.high %v2302_v56, %v2302_v56  ;;  %v4125_v45 = vcombine.low %v2303_v47, %v2302_v56  ;;  %v4132_v33 = vrot.slane %v4124_v42, %v7512_v2  ;;  %v2354_v59 = vcombine.high %v2346_v32, %v2346_v32 }
 0x19c   :  { %v4173_v58 = vcombine.low %v2338_v46, %v2346_v32  ;;  %v2319_v16 = vrot.slane %v2305_v43, %v7512_v2  ;;  %v2320_v24 = vcombine.high %v2312_v27, %v2312_v27  ;;  %v2339_v60 = vcombine.high %v1067_v13, %v1067_v13  ;;  %v8167_v32 = vpop.f32.mrb[36].mxu0 }
 0x19d   :  { %v4139_v49 = vrot.slane %v4125_v45, %v7512_v2  ;;  %v4147_v4 = vrot.slane %v2304_v3, %v7512_v2  ;;  %v4195_v57 = vrot.slane %v2354_v59, %v7512_v2  ;;  %v1642_v42 = vcombine.high %v1026_v28, %v1026_v28 }
 0x19e   :  { %v4187_v21 = vrot.slane %v4173_v58, %v7512_v2  ;;  %v2321_v11 = vcombine.high %v2319_v16, %v2319_v16  ;;  %v4148_v56 = vcombine.low %v2312_v27, %v2320_v24  ;;  %v698_v46 = vadd.f32 %v7946_v6, %v7689_v36 }
 0x19f   :  { %v4140_v47 = vcombine.low %v4132_v33, %v4139_v49  ;;  %v5442_v37 = vsel %vm4982_vm2, %v4147_v4, -inf  ;;  %v5460_v45 = vsel %vm4982_vm2, %v4195_v57, -inf  ;;  %v5429_v58 = vmax.f32 %v5427_v52, %v5428_v38 }
 0x1a0   :  { %v4188_v43 = vcombine.low %v4180_v17, %v4187_v21  ;;  %v4149_v3 = vcombine.low %v2319_v16, %v2321_v11  ;;  %v4156_v13 = vrot.slane %v4148_v56, %v7512_v2  ;;  %v5138_v59 = vrot.slane %v8114_v8, 4 }
 0x1a1   :  { %v5441_v24 = vsel %vm9686_vm3, %v4140_v47, -inf  ;;  %v2353_v27 = vrot.slane %v2339_v60, %v7512_v2  ;;  %v8177_v4 = vrot.slane %v1026_v28, %v7512_v2  ;;  %v8179_v21 = vmax.f32 %v5130_v48, %v5131_v23 }
 0x1a2   :  { %v5443_v33 = vmax.f32 %v5441_v24, %v5442_v37  ;;  %v5459_v49 = vsel %vm9686_vm3, %v4188_v43, -inf  ;;  %v4163_v36 = vrot.slane %v4149_v3, %v7512_v2  ;;  %v5451_v11 = vsel %vm4982_vm2, %v4171_v30, -inf }
 0x1a3   :  { %9731 = vst [vmem:[#allocation36_spill] sm:$0xff] %v8179_v21  ;;  %v5461_v17 = vmax.f32 %v5459_v49, %v5460_v45  ;;  %v1024_v52 = vmax.f32 %v698_v46, 0.0  ;;  %v1656_v57 = vrot.slane %v1642_v42, %v7512_v2  ;;  %v709_v60 = vadd.f32 %v7946_v6, %v7701_v54 }
 0x1a4   :  { %v5444_v38 = vrot.slane %v5443_v33, 4  ;;  %v4164_v16 = vcombine.low %v4156_v13, %v4163_v36  ;;  %v2355_v56 = vcombine.high %v2353_v27, %v2353_v27  ;;  %v1657_v48 = vcombine.high %v8177_v4, %v8177_v4 }
 0x1a5   :  { %v5462_v47 = vrot.slane %v5461_v17, 4  ;;  %v1608_v37 = vcombine.high %v1024_v52, %v1024_v52  ;;  %v1615_v43 = vrot.slane %v1024_v52, %v7512_v2  ;;  %v1607_v30 = vcombine.high %v8054_v19, %v8054_v19 }
 0x1a6   :  { %v5450_v28 = vsel %vm9686_vm3, %v4164_v16, -inf  ;;  %v1027_v23 = vmax.f32 %v709_v60, 0.0  ;;  %v5445_v46 = vmax.f32 %v5443_v33, %v5444_v38  ;;  %v5430_v54 = vrot.slane %v5429_v58, 1 }
 0x1a7   :  { %v5452_v45 = vmax.f32 %v5450_v28, %v5451_v11  ;;  %v1622_v42 = vrot.slane %v1608_v37, %v7512_v2  ;;  %v1623_v3 = vcombine.high %v1615_v43, %v1615_v43  ;;  %v3356_v13 = vcombine.low %v1607_v30, %v1615_v43  ;;  %v8207_v30 = vpop.f32.mrb[37].mxu0 }
 0x1a8   :  { %v1658_v24 = vcombine.high %v1656_v57, %v1656_v57  ;;  %v1666_v49 = vrot.slane %v1027_v23, %v7512_v2  ;;  %v8193_v36 = vcombine.low %v2353_v27, %v2355_v56  ;;  %v5463_v52 = vmax.f32 %v5461_v17, %v5462_v47  ;;  %v8246_v40 = vpop.f32.mrb[38].mxu0 }
 0x1a9   :  { %v1624_v16 = vcombine.high %v1622_v42, %v1622_v42  ;;  %v3357_v1 = vcombine.low %v1623_v3, %v1622_v42  ;;  %v8199_v33 = vmax.f32 %v8114_v8, %v5138_v59  ;;  %v3404_v11 = vcombine.low %v1657_v48, %v1656_v57 }
 0x1aa   :  { %v1674_v38 = vcombine.high %v1666_v49, %v1666_v49  ;;  %v5446_v60 = vrot.slane %v5445_v46, 2  ;;  %v3364_v37 = vrot.slane %v3356_v13, %v7512_v2  ;;  %v8204_v56 = vmax.f32 %v5429_v58, %v5430_v54 }
 0x1ab   :  { %9732 = vst [vmem:[#allocation37_spill] sm:$0xff] %v8199_v33  ;;  %v3371_v43 = vrot.slane %v3357_v1, %v7512_v2  ;;  %v3379_v27 = vrot.slane %v1624_v16, %v7512_v2  ;;  %v1659_v47 = vcombine.high %v1027_v23, %v1027_v23  ;;  %v3405_v28 = vcombine.low %v1658_v24, %v1666_v49 }
 0x1ac   :  { %9733 = vst [vmem:[#allocation38_spill] sm:$0xff] %v8204_v56  ;;  %v5464_v59 = vrot.slane %v5463_v52, 2  ;;  %v5453_v42 = vrot.slane %v5452_v45, 4  ;;  %v3412_v1 = vrot.slane %v3404_v11, %v7512_v2  ;;  %v3427_v3 = vrot.slane %v1674_v38, %v7512_v2  ;;  %v9735_v38 = vld [vmem:[#allocation12_spill] sm:$0xff]  ;;  %v9737_v56 = vld [vmem:[#allocation14_spill] sm:$0xff] }
 0x1ad   :  { %v3372_v48 = vcombine.low %v3364_v37, %v3371_v43  ;;  %v3419_v58 = vrot.slane %v3405_v28, %v7512_v2  ;;  %v8216_v54 = vmax.f32 %v5445_v46, %v5446_v60  ;;  %v5154_v13 = vsel %vm4982_vm2, %v3379_v27, -inf  ;;  %v9734_v43 = vld [vmem:[#allocation11_spill] sm:$0xff]  ;;  %v9736_v60 = vld [vmem:[#allocation13_spill] sm:$0xff] }
 0x1ae   :  { %v701_v24 = vadd.f32 %v7946_v6, %v7711_v14  ;;  %v1673_v16 = vrot.slane %v1659_v47, %v7512_v2  ;;  %v882_v11 = vadd.f32 %v7946_v6, %v9734_v43  ;;  %v5465_v28 = vmax.f32 %v5463_v52, %v5464_v59 }
 0x1af   :  { %v5153_v23 = vsel %vm9686_vm3, %v3372_v48, -inf  ;;  %v3420_v37 = vcombine.low %v3412_v1, %v3419_v58  ;;  %v874_v46 = vadd.f32 %v7946_v6, %v9735_v38  ;;  %v722_v48 = vadd.f32 %v7946_v6, %v9736_v60  ;;  %v8236_v38 = vpop.f32.mrb[35].mxu1 }
 0x1b0   :  { %v8222_v49 = vmax.f32 %v5153_v23, %v5154_v13  ;;  %v1025_v17 = vmax.f32 %v701_v24, 0.0  ;;  %v5454_v27 = vmax.f32 %v5452_v45, %v5453_v42  ;;  %v5172_v14 = vsel %vm4982_vm2, %v3427_v3, -inf }
 0x1b1   :  { %v5171_v19 = vsel %vm9686_vm3, %v3420_v37, -inf  ;;  %v1070_v23 = vmax.f32 %v882_v11, 0.0  ;;  %v5448_v47 = vrot.slane %v8216_v54, 1  ;;  %v1675_v52 = vcombine.high %v1673_v16, %v1673_v16 }
 0x1b2   :  { %v5173_v1 = vmax.f32 %v5171_v19, %v5172_v14  ;;  %v1625_v58 = vcombine.high %v1025_v17, %v1025_v17  ;;  %v1632_v13 = vrot.slane %v1025_v17, %v7512_v2  ;;  %v1068_v43 = vmax.f32 %v874_v46, 0.0 }
 0x1b3   :  { %v2390_v59 = vcombine.high %v1070_v23, %v1070_v23  ;;  %v2397_v24 = vrot.slane %v1070_v23, %v7512_v2  ;;  %v1030_v37 = vmax.f32 %v722_v48, 0.0  ;;  %v885_v23 = vadd.f32 %v7946_v6, %v9737_v56 }
 0x1b4   :  { %v5174_v60 = vrot.slane %v5173_v1, 4  ;;  %v1639_v45 = vrot.slane %v1625_v58, %v7512_v2  ;;  %v1640_v42 = vcombine.high %v1632_v13, %v1632_v13  ;;  %v2356_v8 = vcombine.high %v1068_v43, %v1068_v43 }
 0x1b5   :  { %v2404_v3 = vrot.slane %v2390_v59, %v7512_v2  ;;  %v2405_v11 = vcombine.high %v2397_v24, %v2397_v24  ;;  %v2363_v19 = vrot.slane %v1068_v43, %v7512_v2  ;;  %v1710_v57 = vcombine.high %v1030_v37, %v1030_v37 }
 0x1b6   :  { %v1641_v14 = vcombine.high %v1639_v45, %v1639_v45  ;;  %v3380_v17 = vcombine.low %v1632_v13, %v1640_v42  ;;  %v8244_v61 = vrot.slane %v2356_v8, %v7512_v2  ;;  %v5466_v48 = vrot.slane %v5465_v28, 1 }
 0x1b7   :  { %v2406_v46 = vcombine.high %v2404_v3, %v2404_v3  ;;  %v4244_v18 = vcombine.low %v2397_v24, %v2405_v11  ;;  %v2371_v58 = vcombine.high %v2363_v19, %v2363_v19  ;;  %v5455_v59 = vrot.slane %v5454_v27, 2 }
 0x1b8   :  { %v5175_v21 = vmax.f32 %v5173_v1, %v5174_v60  ;;  %v3381_v26 = vcombine.low %v1639_v45, %v1641_v14  ;;  %v4219_v42 = vrot.slane %v8244_v61, %v7512_v2  ;;  %v8251_v56 = vcombine.low %v1673_v16, %v1675_v52 }
 0x1b9   :  { %v4245_v20 = vcombine.low %v2404_v3, %v2406_v46  ;;  %v4252_v43 = vrot.slane %v4244_v18, %v7512_v2  ;;  %v4197_v13 = vcombine.low %v2363_v19, %v2371_v58  ;;  %v3388_v24 = vrot.slane %v3380_v17, %v7512_v2 }
 0x1ba   :  { %v3395_v8 = vrot.slane %v3381_v26, %v7512_v2  ;;  %v1717_v11 = vrot.slane %v1030_v37, %v7512_v2  ;;  %v1724_v60 = vrot.slane %v1710_v57, %v7512_v2  ;;  %v8259_v45 = vmax.f32 %v885_v23, 0.0  ;;  %v8267_v26 = vpop.f32.mrb[39].mxu0 }
 0x1bb   :  { %v4259_v22 = vrot.slane %v4245_v20, %v7512_v2  ;;  %v4211_v1 = vrot.slane %v4197_v13, %v7512_v2  ;;  %v8261_v18 = vmax.f32 %v5454_v27, %v5455_v59  ;;  %v9738_v16 = vrot.slane %v8177_v4, %v7512_v2 }
 0x1bc   :  { %v5176_v3 = vrot.slane %v5175_v21, 2  ;;  %v3396_v19 = vcombine.low %v3388_v24, %v3395_v8  ;;  %v9739_v20 = vrot.slane %v8193_v36, %v7512_v2  ;;  %v5469_v57 = vsel %vm4982_vm2, %v4219_v42, -inf  ;;  %v9742_v24 = vld [vmem:[#allocation15_spill] sm:$0xff] }
 0x1bd   :  { %v5163_v52 = vsel %vm4982_vm2, %v9738_v16, -inf  ;;  %v4260_v37 = vcombine.low %v4252_v43, %v4259_v22  ;;  %v8275_v27 = vrot.slane %v8259_v45, %v7512_v2  ;;  %v8278_v17 = vmax.f32 %v8216_v54, %v5448_v47 }
 0x1be   :  { %v4212_v14 = vcombine.low %v9739_v20, %v4211_v1  ;;  %v8280_v4 = vmax.f32 %v5465_v28, %v5466_v48  ;;  %v5162_v23 = vsel %vm9686_vm3, %v3396_v19, -inf  ;;  %v1725_v46 = vcombine.high %v1717_v11, %v1717_v11 }
 0x1bf   :  { %9740 = vst [vmem:[#allocation11_spill] sm:$0xff] %v8278_v17  ;;  %v3436_v22 = vrot.slane %v8251_v56, %v7512_v2  ;;  %v5164_v58 = vmax.f32 %v5162_v23, %v5163_v52  ;;  %v1726_v59 = vcombine.high %v1724_v60, %v1724_v60  ;;  %v5457_v43 = vrot.slane %v8261_v18, 1  ;;  %v8293_v56 = vpop.f32.mrb[36].mxu1 }
 0x1c0   :  { %9741 = vst [vmem:[#allocation12_spill] sm:$0xff] %v8280_v4  ;;  %v5468_v36 = vsel %vm9686_vm3, %v4212_v14, -inf  ;;  %v5177_v13 = vmax.f32 %v5175_v21, %v5176_v3  ;;  %v4267_v54 = vrot.slane %v8275_v27, %v7512_v2  ;;  %v5486_v48 = vsel %vm9686_vm3, %v4260_v37, -inf }
 0x1c1   :  { %v5470_v42 = vmax.f32 %v5468_v36, %v5469_v57  ;;  %v5165_v47 = vrot.slane %v5164_v58, 4  ;;  %v714_v8 = vadd.f32 %v7946_v6, %v9742_v24  ;;  %v3476_v16 = vcombine.low %v1717_v11, %v1725_v46 }
 0x1c2   :  { %v5487_v52 = vsel %vm4982_vm2, %v4267_v54, -inf  ;;  %v877_v21 = vadd.f32 %v7946_v6, %v7816_v5  ;;  %v3477_v19 = vcombine.low %v1724_v60, %v1726_v59  ;;  %v5178_v57 = vrot.slane %v5177_v13, 1 }
 0x1c3   :  { %v5471_v1 = vrot.slane %v5470_v42, 4  ;;  %v5166_v3 = vmax.f32 %v5164_v58, %v5165_v47  ;;  %v5488_v20 = vmax.f32 %v5486_v48, %v5487_v52  ;;  %v1028_v14 = vmax.f32 %v714_v8, 0.0  ;;  %v8311_v47 = vpop.f32.mrb[37].mxu1 }
 0x1c4   :  { %v1069_v36 = vmax.f32 %v877_v21, 0.0  ;;  %v2372_v37 = vcombine.high %v8244_v61, %v8244_v61  ;;  %v725_v11 = vadd.f32 %v7946_v6, %v7822_v34  ;;  %v2407_v5 = vcombine.high %v8259_v45, %v8259_v45 }
 0x1c5   :  { %v5472_v23 = vmax.f32 %v5470_v42, %v5471_v1  ;;  %v5489_v24 = vrot.slane %v5488_v20, 4  ;;  %v1676_v28 = vcombine.high %v1028_v14, %v1028_v14  ;;  %v1683_v4 = vrot.slane %v1028_v14, %v7512_v2 }
 0x1c6   :  { %v5167_v46 = vrot.slane %v5166_v3, 2  ;;  %v2373_v60 = vcombine.high %v1069_v36, %v1069_v36  ;;  %v2380_v58 = vrot.slane %v1069_v36, %v7512_v2  ;;  %v3484_v59 = vrot.slane %v3476_v16, %v7512_v2 }
 0x1c7   :  { %v3491_v42 = vrot.slane %v3477_v19, %v7512_v2  ;;  %v8309_v61 = vrot.slane %v1676_v28, %v7512_v2  ;;  %v1691_v54 = vcombine.high %v1683_v4, %v1683_v4  ;;  %v2422_v34 = vcombine.high %v8275_v27, %v8275_v27 }
 0x1c8   :  { %v2387_v48 = vrot.slane %v2373_v60, %v7512_v2  ;;  %v2388_v8 = vcombine.high %v2380_v58, %v2380_v58  ;;  %v4220_v45 = vcombine.low %v2372_v37, %v2380_v58  ;;  %v5473_v1 = vrot.slane %v5472_v23, 2 }
 0x1c9   :  { %v5490_v52 = vmax.f32 %v5488_v20, %v5489_v24  ;;  %v3429_v21 = vcombine.low %v1683_v4, %v1691_v54  ;;  %v1031_v14 = vmax.f32 %v725_v11, 0.0  ;;  %v5168_v16 = vmax.f32 %v5166_v3, %v5167_v46 }
 0x1ca   :  { %v2389_v36 = vcombine.high %v2387_v48, %v2387_v48  ;;  %v4221_v19 = vcombine.low %v2388_v8, %v2387_v48  ;;  %v4228_v28 = vrot.slane %v4220_v45, %v7512_v2  ;;  %v8318_v17 = vmax.f32 %v8261_v18, %v5457_v43  ;;  %v8331_v43 = vpop.f32.mrb[38].mxu1 }
 0x1cb   :  { %v3492_v33 = vcombine.low %v3484_v59, %v3491_v42  ;;  %v3443_v29 = vrot.slane %v3429_v21, %v7512_v2  ;;  %v3451_v27 = vrot.slane %v8309_v61, %v7512_v2  ;;  %v5179_v60 = vmax.f32 %v5177_v13, %v5178_v57 }
 0x1cc   :  { %9743 = vst [vmem:[#allocation13_spill] sm:$0xff] %v8318_v17  ;;  %v8324_v37 = vrot.slane %v2407_v5, %v7512_v2  ;;  %v4235_v4 = vrot.slane %v4221_v19, %v7512_v2  ;;  %v4243_v3 = vrot.slane %v2389_v36, %v7512_v2  ;;  %v5474_v20 = vmax.f32 %v5472_v23, %v5473_v1  ;;  %v8337_v5 = vpop.f32.mrb[39].mxu1 }
 0x1cd   :  { %v5491_v24 = vrot.slane %v5490_v52, 2  ;;  %v3444_v11 = vcombine.low %v3436_v22, %v3443_v29  ;;  %v8329_v18 = vrot.slane %v1031_v14, %v7512_v2  ;;  %v5169_v46 = vrot.slane %v5168_v16, 1 }
 0x1ce   :  { %v8334_v58 = vcombine.low %v2422_v34, %v8324_v37  ;;  %v4236_v13 = vcombine.low %v4228_v28, %v4235_v4  ;;  %v5478_v57 = vsel %vm4982_vm2, %v4243_v3, -inf  ;;  %v5181_v23 = vsel %vm4982_vm2, %v3451_v27, -inf }
 0x1cf   :  { %v5180_v59 = vsel %vm9686_vm3, %v3444_v11, -inf  ;;  %v3499_v29 = vrot.slane %v8329_v18, %v7512_v2  ;;  %v5198_v22 = vsel %vm9686_vm3, %v3492_v33, -inf  ;;  %v898_v34 = vadd.f32 %v7946_v6, %v7836_v63  ;;  %v8352_v33 = vpop.f32.mrb[40].mxu0 }
 0x1d0   :  { %v5182_v42 = vmax.f32 %v5180_v59, %v5181_v23  ;;  %v5477_v54 = vsel %vm9686_vm3, %v4236_v13, -inf  ;;  %v717_v48 = vadd.f32 %v7946_v6, %v7842_v9  ;;  %v5475_v8 = vrot.slane %v5474_v20, 1 }
 0x1d1   :  { %v5492_v45 = vmax.f32 %v5490_v52, %v5491_v24  ;;  %v8349_v1 = vmax.f32 %v5477_v54, %v5478_v57  ;;  %v5199_v21 = vsel %vm4982_vm2, %v3499_v29, -inf  ;;  %v1727_v19 = vcombine.high %v1031_v14, %v1031_v14 }
 0x1d2   :  { %v5183_v36 = vrot.slane %v5182_v42, 4  ;;  %v5200_v28 = vmax.f32 %v5198_v22, %v5199_v21  ;;  %v1029_v27 = vmax.f32 %v717_v48, 0.0  ;;  %v9744_v4 = vrot.slane %v8222_v49, 4 }
 0x1d3   :  { %v8360_v63 = vsel %vm9686_vm3, %v5179_v60, -inf  ;;  %v1692_v9 = vcombine.high %v8309_v61, %v8309_v61  ;;  %v890_v52 = vadd.f32 %v7946_v6, %v7876_v25  ;;  %v5170_v24 = vmax.f32 %v5168_v16, %v5169_v46 }
 0x1d4   :  { %v8357_v3 = vmax.f32 %v8222_v49, %v9744_v4  ;;  %9746 = vst [vmem:[#allocation15_spill] sm:$0xff] %v8360_v63  ;;  %v5184_v14 = vmax.f32 %v5182_v42, %v5183_v36  ;;  %v5201_v11 = vrot.slane %v5200_v28, 4  ;;  %v1074_v13 = vmax.f32 %v898_v34, 0.0 }
 0x1d5   :  { %v8366_v57 = vmax.f32 %v5474_v20, %v5475_v8  ;;  %v4276_v59 = vrot.slane %v8334_v58, %v7512_v2  ;;  %v1693_v49 = vcombine.high %v1029_v27, %v1029_v27  ;;  %v1700_v23 = vrot.slane %v1029_v27, %v7512_v2 }
 0x1d6   :  { %9745 = vst [vmem:[#allocation14_spill] sm:$0xff] %v8357_v3  ;;  %v5493_v60 = vrot.slane %v5492_v45, 1  ;;  %v5185_v29 = vrot.slane %v5184_v14, 2  ;;  %v8372_v22 = vrot.slane %v1727_v19, %v7512_v2  ;;  %v5202_v61 = vmax.f32 %v5200_v28, %v5201_v11 }
 0x1d7   :  { %9747 = vst [vmem:[#allocation39_spill] sm:$0xff] %v8366_v57  ;;  %v1707_v25 = vrot.slane %v1693_v49, %v7512_v2  ;;  %v1708_v16 = vcombine.high %v1700_v23, %v1700_v23  ;;  %v3452_v46 = vcombine.low %v1692_v9, %v1700_v23  ;;  %v1072_v42 = vmax.f32 %v890_v52, 0.0 }
 0x1d8   :  { %v5186_v54 = vmax.f32 %v5184_v14, %v5185_v29  ;;  %v5203_v20 = vrot.slane %v5202_v61, 2  ;;  %v5740_v34 = vsel %vm9686_vm3, %v5170_v24, -inf  ;;  %v2458_v48 = vcombine.high %v1074_v13, %v1074_v13 }
 0x1d9   :  { %v8377_v58 = vrot.slane %v1074_v13, %v7512_v2  ;;  %v1709_v8 = vcombine.high %v1707_v25, %v1707_v25  ;;  %v3453_v21 = vcombine.low %v1708_v16, %v1707_v25  ;;  %v3460_v36 = vrot.slane %v3452_v46, %v7512_v2  ;;  %v8396_v25 = vpop.f32.mrb[41].mxu0 }
 0x1da   :  { %v8380_v19 = vmax.f32 %v5492_v45, %v5493_v60  ;;  %v5187_v28 = vrot.slane %v5186_v54, 1  ;;  %v5204_v27 = vmax.f32 %v5202_v61, %v5203_v20  ;;  %v2423_v4 = vcombine.high %v8324_v37, %v8324_v37  ;;  %v8389_v45 = vpop.f32.mrb[40].mxu1 }
 0x1db   :  { %v5480_v9 = vrot.slane %v8349_v1, 4  ;;  %v3467_v52 = vrot.slane %v3453_v21, %v7512_v2  ;;  %v3475_v24 = vrot.slane %v1709_v8, %v7512_v2  ;;  %v2424_v14 = vcombine.high %v1072_v42, %v1072_v42 }
 0x1dc   :  { %9748 = vst [vmem:[#allocation40_spill] sm:$0xff] %v8380_v19  ;;  %v5188_v11 = vmax.f32 %v5186_v54, %v5187_v28  ;;  %v5205_v13 = vrot.slane %v5204_v27, 1  ;;  %v2472_v49 = vrot.slane %v2458_v48, %v7512_v2  ;;  %v2431_v23 = vrot.slane %v1072_v42, %v7512_v2 }
 0x1dd   :  { %v2473_v60 = vcombine.high %v8377_v58, %v8377_v58  ;;  %v3468_v29 = vcombine.low %v3460_v36, %v3467_v52  ;;  %v2438_v37 = vrot.slane %v2424_v14, %v7512_v2  ;;  %v901_v61 = vadd.f32 %v7946_v6, %v7884_v41 }
 0x1de   :  { %v5741_v16 = vsel %vm9686_vm3, %v5188_v11, -inf  ;;  %v5206_v46 = vmax.f32 %v5204_v27, %v5205_v13  ;;  %v2439_v54 = vcombine.high %v2431_v23, %v2431_v23  ;;  %v4269_v20 = vcombine.low %v2423_v4, %v2431_v23  ;;  %v8408_v23 = vld [vmem:[#allocation4] ss:$0 sm:$0xff] }
 0x1df   :  { %v5742_v48 = vmax.f32 %v5740_v34, %v5741_v16  ;;  %v5189_v42 = vsel %vm9686_vm3, %v3468_v29, -inf  ;;  %v5190_v8 = vsel %vm4982_vm2, %v3475_v24, -inf  ;;  %v1075_v21 = vmax.f32 %v901_v61, 0.0  ;;  %v8412_v29 = vpop.f32.mrb[41].mxu1 }
 0x1e0   :  { %v5743_v36 = vsel %vm9686_vm3, %v5206_v46, -inf  ;;  %v5191_v28 = vmax.f32 %v5189_v42, %v5190_v8  ;;  %v4283_v52 = vrot.slane %v4269_v20, %v7512_v2  ;;  %v4291_v41 = vrot.slane %v2439_v54, %v7512_v2 }
 0x1e1   :  { %v8404_v6 = vmax.f32 %v5742_v48, %v5743_v36  ;;  %v2440_v14 = vcombine.high %v2438_v37, %v2438_v37  ;;  %v2475_v11 = vcombine.high %v1075_v21, %v1075_v21  ;;  %v2482_v27 = vrot.slane %v1075_v21, %v7512_v2 }
 0x1e2   :  { %v5192_v4 = vrot.slane %v5191_v28, 4  ;;  %v4284_v34 = vcombine.low %v4276_v59, %v4283_v52  ;;  %v5496_v13 = vsel %vm4982_vm2, %v4291_v41, -inf  ;;  %v893_v24 = vadd.f32 %v8408_v23, %v7906_v10 }
 0x1e3   :  { %9749 = vst [vmem:[#allocation41_spill] sm:$0xff] %v8404_v6  ;;  %v5481_v61 = vmax.f32 %v8349_v1, %v5480_v9  ;;  %v2474_v16 = vcombine.high %v2472_v49, %v2472_v49  ;;  %v2489_v46 = vrot.slane %v2475_v11, %v7512_v2  ;;  %v2490_v54 = vcombine.high %v2482_v27, %v2482_v27 }
 0x1e4   :  { %v5193_v20 = vmax.f32 %v5191_v28, %v5192_v4  ;;  %v5495_v48 = vsel %vm9686_vm3, %v4284_v34, -inf  ;;  %v1073_v42 = vmax.f32 %v893_v24, 0.0  ;;  %v914_v59 = vadd.f32 %v8408_v23, %v7922_v35  ;;  %v8424_v34 = vpop.f32.mrb[42].mxu0  ;;  %v8431_v24 = vpop.f32.mrb[42].mxu1 }
 0x1e5   :  { %v4292_v8 = vcombine.low %v2438_v37, %v2440_v14  ;;  %v5497_v21 = vmax.f32 %v5495_v48, %v5496_v13  ;;  %v2491_v36 = vcombine.high %v2489_v46, %v2489_v46  ;;  %v4340_v52 = vcombine.low %v2482_v27, %v2490_v54  ;;  %v8440_v57 = vpop.f32.mrb[43].mxu0 }
 0x1e6   :  { %v1742_v10 = vcombine.high %v8329_v18, %v8329_v18  ;;  %v4317_v41 = vcombine.low %v2473_v60, %v2472_v49  ;;  %v2441_v1 = vcombine.high %v1073_v42, %v1073_v42  ;;  %v2448_v9 = vrot.slane %v1073_v42, %v7512_v2 }
 0x1e7   :  { %v5194_v11 = vrot.slane %v5193_v20, 2  ;;  %v5498_v19 = vrot.slane %v5497_v21, 4  ;;  %v4341_v28 = vcombine.low %v2489_v46, %v2491_v36  ;;  %v906_v4 = vadd.f32 %v8408_v23, %v7925_v55 }
 0x1e8   :  { %v4348_v35 = vrot.slane %v4340_v52, %v7512_v2  ;;  %v2455_v37 = vrot.slane %v2441_v1, %v7512_v2  ;;  %v2456_v14 = vcombine.high %v2448_v9, %v2448_v9  ;;  %v1078_v27 = vmax.f32 %v914_v59, 0.0 }
 0x1e9   :  { %v5482_v13 = vrot.slane %v5481_v61, 2  ;;  %v4339_v18 = vrot.slane %v2474_v16, %v7512_v2  ;;  %v4300_v49 = vrot.slane %v4292_v8, %v7512_v2  ;;  %v4355_v60 = vrot.slane %v4341_v28, %v7512_v2 }
 0x1ea   :  { %v2457_v46 = vcombine.high %v2455_v37, %v2455_v37  ;;  %v4293_v54 = vcombine.low %v2448_v9, %v2456_v14  ;;  %v4315_v55 = vrot.slane %v2455_v37, %v7512_v2  ;;  %v2526_v48 = vcombine.high %v1078_v27, %v1078_v27 }
 0x1eb   :  { %v8435_v42 = vcombine.low %v1742_v10, %v8372_v22  ;;  %v5195_v36 = vmax.f32 %v5193_v20, %v5194_v11  ;;  %v5499_v52 = vmax.f32 %v5497_v21, %v5498_v19  ;;  %v1076_v59 = vmax.f32 %v906_v4, 0.0 }
 0x1ec   :  { %v4331_v1 = vrot.slane %v4317_v41, %v7512_v2  ;;  %v4356_v16 = vcombine.low %v4348_v35, %v4355_v60  ;;  %v4307_v8 = vrot.slane %v4293_v54, %v7512_v2  ;;  %v4316_v28 = vcombine.low %v2457_v46, %v8377_v58 }
 0x1ed   :  { %v8442_v17 = vmax.f32 %v5481_v61, %v5482_v13  ;;  %v5514_v9 = vsel %vm4982_vm2, %v4339_v18, -inf  ;;  %v2533_v37 = vrot.slane %v1078_v27, %v7512_v2  ;;  %v2499_v10 = vrot.slane %v1076_v59, %v7512_v2  ;;  %v8451_v61 = vpop.f32.mrb[43].mxu1 }
 0x1ee   :  { %v4308_v20 = vcombine.low %v4300_v49, %v4307_v8  ;;  %v4324_v19 = vrot.slane %v4316_v28, %v7512_v2  ;;  %v5505_v21 = vsel %vm4982_vm2, %v4315_v55, -inf  ;;  %v2540_v41 = vrot.slane %v2526_v48, %v7512_v2 }
 0x1ef   :  { %9750 = vst [vmem:[#allocation42_spill] sm:$0xff] %v8442_v17  ;;  %v5196_v11 = vrot.slane %v5195_v36, 1  ;;  %v5500_v4 = vrot.slane %v5499_v52, 2  ;;  %v2492_v58 = vcombine.high %v1076_v59, %v1076_v59  ;;  %v4363_v35 = vrot.slane %v2499_v10, %v7512_v2  ;;  %v9753_v17 = vld [vmem:[#allocation23_spill] sm:$0xff] }
 0x1f0   :  { %v4332_v14 = vcombine.low %v4324_v19, %v4331_v1  ;;  %v5504_v13 = vsel %vm9686_vm3, %v4308_v20, -inf  ;;  %v5522_v27 = vsel %vm9686_vm3, %v4356_v16, -inf  ;;  %v738_v18 = vadd.f32 %v8408_v23, %v7929_v62 }
 0x1f1   :  { %v8457_v49 = vmax.f32 %v5504_v13, %v5505_v21  ;;  %v2541_v60 = vcombine.high %v2533_v37, %v2533_v37  ;;  %v5523_v46 = vsel %vm4982_vm2, %v4363_v35, -inf  ;;  %v917_v54 = vadd.f32 %v8408_v23, %v7978_v15 }
 0x1f2   :  { %v5513_v55 = vsel %vm9686_vm3, %v4332_v14, -inf  ;;  %v4411_v48 = vrot.slane %v2540_v41, %v7512_v2  ;;  %v5524_v59 = vmax.f32 %v5522_v27, %v5523_v46  ;;  %v1034_v1 = vmax.f32 %v738_v18, 0.0 }
 0x1f3   :  { %v3508_v16 = vrot.slane %v8435_v42, %v7512_v2  ;;  %v8466_v8 = vmax.f32 %v5513_v55, %v5514_v9  ;;  %v1079_v62 = vmax.f32 %v917_v54, 0.0  ;;  %v2542_v28 = vcombine.high %v2540_v41, %v2540_v41 }
 0x1f4   :  { %v5197_v20 = vmax.f32 %v5195_v36, %v5196_v11  ;;  %v2507_v19 = vcombine.high %v2499_v10, %v2499_v10  ;;  %v5525_v21 = vrot.slane %v5524_v59, 4  ;;  %v730_v35 = vadd.f32 %v8408_v23, %v7985_v31 }
 0x1f5   :  { %v8471_v14 = vmax.f32 %v5499_v52, %v5500_v4  ;;  %v2543_v13 = vcombine.high %v1079_v62, %v1079_v62  ;;  %v2550_v27 = vrot.slane %v1079_v62, %v7512_v2  ;;  %v8474_v18 = vcombine.low %v2533_v37, %v2541_v60 }
 0x1f6   :  { %v8477_v42 = vsel %vm4982_vm2, %v4411_v48, -inf  ;;  %v2506_v9 = vrot.slane %v2492_v58, %v7512_v2  ;;  %v1778_v36 = vcombine.high %v1034_v1, %v1034_v1  ;;  %v1032_v31 = vmax.f32 %v730_v35, 0.0 }
 0x1f7   :  { %9751 = vst [vmem:[#allocation43_spill] sm:$0xff] %v8471_v14  ;;  %v2557_v10 = vrot.slane %v2543_v13, %v7512_v2  ;;  %v2558_v41 = vcombine.high %v2550_v27, %v2550_v27  ;;  %v4412_v11 = vcombine.low %v2542_v28, %v2550_v27  ;;  %v8482_v46 = vsel %vm9686_vm3, %v5197_v20, -inf }
 0x1f8   :  { %9752 = vst [vmem:[#allocation44_spill] sm:$0xff] %v8482_v46  ;;  %v8484_v52 = vcombine.low %v2507_v19, %v2506_v9  ;;  %v5526_v4 = vmax.f32 %v5524_v59, %v5525_v21  ;;  %v8487_v37 = vrot.slane %v1034_v1, %v7512_v2  ;;  %v1792_v28 = vrot.slane %v1778_v36, %v7512_v2 }
 0x1f9   :  { %v2559_v54 = vcombine.high %v2557_v10, %v2557_v10  ;;  %v4413_v55 = vcombine.low %v2558_v41, %v2557_v10  ;;  %v4420_v58 = vrot.slane %v4412_v11, %v7512_v2  ;;  %v1743_v20 = vcombine.high %v8372_v22, %v8372_v22  ;;  %v8506_v10 = vpop.f32.mrb[44].mxu0  ;;  %v8508_v22 = vpop.f32.mrb[44].mxu1 }
 0x1fa   :  { %v1751_v19 = vrot.slane %v1032_v31, %v7512_v2  ;;  %v909_v21 = vadd.f32 %v8408_v23, %v8007_v53  ;;  %v4372_v35 = vrot.slane %v8484_v52, %v7512_v2  ;;  %v5527_v13 = vrot.slane %v5526_v4, 2  ;;  %v8511_v60 = vpop.f32.mrb[45].mxu0 }
 0x1fb   :  { %v4427_v59 = vrot.slane %v4413_v55, %v7512_v2  ;;  %v4435_v1 = vrot.slane %v2559_v54, %v7512_v2  ;;  %v1793_v27 = vcombine.high %v8487_v37, %v8487_v37  ;;  %v1744_v36 = vcombine.high %v1032_v31, %v1032_v31  ;;  %v8536_v3 = vpop.f32.mrb[46].mxu0 }
 0x1fc   :  { %v1759_v54 = vcombine.high %v1751_v19, %v1751_v19  ;;  %v3501_v55 = vcombine.low %v1743_v20, %v1751_v19  ;;  %v1794_v53 = vcombine.high %v1792_v28, %v1792_v28  ;;  %v1077_v15 = vmax.f32 %v909_v21, 0.0  ;;  %9755 = vst [vmem:[#allocation45_spill] sm:$0xff] %v8536_v3 }
 0x1fd   :  { %v4428_v41 = vcombine.low %v4420_v58, %v4427_v59  ;;  %v5550_v11 = vsel %vm4982_vm2, %v4435_v1, -inf  ;;  %v2508_v62 = vcombine.high %v2506_v9, %v2506_v9  ;;  %v741_v52 = vadd.f32 %v8408_v23, %v8026_v7 }
 0x1fe   :  { %v3515_v31 = vrot.slane %v3501_v55, %v7512_v2  ;;  %v3523_v14 = vrot.slane %v1759_v54, %v7512_v2  ;;  %v930_v58 = vadd.f32 %v8408_v23, %v9753_v17  ;;  %v5528_v59 = vmax.f32 %v5526_v4, %v5527_v13 }
 0x1ff   :  { %v5549_v48 = vsel %vm9686_vm3, %v4428_v41, -inf  ;;  %v8520_v1 = vcombine.low %v1793_v27, %v1792_v28  ;;  %v2509_v19 = vcombine.high %v1077_v15, %v1077_v15  ;;  %v1758_v21 = vrot.slane %v1744_v36, %v7512_v2 }
 0x200   :  { %v5551_v20 = vmax.f32 %v5549_v48, %v5550_v11  ;;  %v3516_v9 = vcombine.low %v3508_v16, %v3515_v31  ;;  %v2516_v63 = vrot.slane %v1077_v15, %v7512_v2  ;;  %v1035_v7 = vmax.f32 %v741_v52, 0.0  ;;  %v8529_v31 = vpop.f32.mrb[45].mxu1 }
 0x201   :  { %v5208_v41 = vsel %vm4982_vm2, %v3523_v14, -inf  ;;  %v2523_v55 = vrot.slane %v2509_v19, %v7512_v2  ;;  %v1082_v54 = vmax.f32 %v930_v58, 0.0  ;;  %v5529_v13 = vrot.slane %v5528_v59, 1  ;;  %9754 = vst [vmem:[#allocation23_spill] sm:$0xff] %v8529_v31 }
 0x202   :  { %v5552_v46 = vrot.slane %v5551_v20, 4  ;;  %v5207_v6 = vsel %vm9686_vm3, %v3516_v9, -inf  ;;  %v2524_v17 = vcombine.high %v2516_v63, %v2516_v63  ;;  %v4365_v4 = vcombine.low %v2508_v62, %v2516_v63 }
 0x203   :  { %v1795_v28 = vcombine.high %v1035_v7, %v1035_v7  ;;  %v5209_v27 = vmax.f32 %v5207_v6, %v5208_v41  ;;  %v2525_v11 = vcombine.high %v2523_v55, %v2523_v55  ;;  %v1760_v36 = vcombine.high %v1758_v21, %v1758_v21 }
 0x204   :  { %v5553_v48 = vmax.f32 %v5551_v20, %v5552_v46  ;;  %v4379_v16 = vrot.slane %v4365_v4, %v7512_v2  ;;  %v4387_v15 = vrot.slane %v2524_v17, %v7512_v2  ;;  %v2594_v52 = vcombine.high %v1082_v54, %v1082_v54 }
 0x205   :  { %v5210_v19 = vrot.slane %v5209_v27, 4  ;;  %v4388_v58 = vcombine.low %v2523_v55, %v2525_v11  ;;  %v1802_v9 = vrot.slane %v1035_v7, %v7512_v2  ;;  %v3571_v63 = vrot.slane %v1794_v53, %v7512_v2 }
 0x206   :  { %v5554_v14 = vrot.slane %v5553_v48, 2  ;;  %v4380_v62 = vcombine.low %v4372_v35, %v4379_v16  ;;  %v5532_v46 = vsel %vm4982_vm2, %v4387_v15, -inf  ;;  %v1809_v6 = vrot.slane %v1795_v28, %v7512_v2 }
 0x207   :  { %v5530_v20 = vmax.f32 %v5528_v59, %v5529_v13  ;;  %v5211_v4 = vmax.f32 %v5209_v27, %v5210_v19  ;;  %v4396_v17 = vrot.slane %v4388_v58, %v7512_v2  ;;  %v9756_v31 = vrot.slane %v8457_v49, 4 }
 0x208   :  { %v5555_v41 = vmax.f32 %v5553_v48, %v5554_v14  ;;  %v8543_v7 = vcombine.low %v1758_v21, %v1760_v36  ;;  %v5531_v35 = vsel %vm9686_vm3, %v4380_v62, -inf  ;;  %v2608_v53 = vrot.slane %v2594_v52, %v7512_v2  ;;  %v8555_v36 = vpop.f32.mrb[46].mxu1  ;;  %v8567_v62 = vpop.f32.mrb[47].mxu0 }
 0x209   :  { %v8541_v55 = vmax.f32 %v8457_v49, %v9756_v31  ;;  %v9757_v59 = vrot.slane %v8474_v18, %v7512_v2  ;;  %v5533_v13 = vmax.f32 %v5531_v35, %v5532_v46  ;;  %v1810_v48 = vcombine.high %v1802_v9, %v1802_v9  ;;  %9758 = vst [vmem:[#allocation46_spill] sm:$0xff] %v8555_v36  ;;  %v9760_v35 = vld [vmem:[#allocation24_spill] sm:$0xff] }
 0x20a   :  { %v5556_v11 = vrot.slane %v5555_v41, 1  ;;  %v8553_v16 = vsel %vm4982_vm2, %v3571_v63, -inf  ;;  %v1811_v49 = vcombine.high %v1809_v6, %v1809_v6  ;;  %v2610_v21 = vcombine.high %v2608_v53, %v2608_v53  ;;  %9759 = vst [vmem:[#allocation47_spill] sm:$0xff] %v8567_v62 }
 0x20b   :  { %v4404_v28 = vcombine.low %v4396_v17, %v9757_v59  ;;  %v8558_v15 = vsel %vm9686_vm3, %v5530_v20, -inf  ;;  %v5212_v52 = vrot.slane %v5211_v4, 2  ;;  %v5534_v31 = vrot.slane %v5533_v13, 4 }
 0x20c   :  { %v5557_v14 = vmax.f32 %v5555_v41, %v5556_v11  ;;  %v3532_v19 = vrot.slane %v8543_v7, %v7512_v2  ;;  %v8565_v63 = vrot.slane %v1082_v54, %v7512_v2  ;;  %v8569_v17 = vcombine.low %v1802_v9, %v1810_v48 }
 0x20d   :  { %v5540_v18 = vsel %vm9686_vm3, %v4404_v28, -inf  ;;  %v5535_v46 = vmax.f32 %v5533_v13, %v5534_v31  ;;  %v8571_v20 = vcombine.low %v2608_v53, %v2610_v21  ;;  %v733_v59 = vadd.f32 %v8408_v23, %v9760_v35 }
 0x20e   :  { %v5542_v58 = vmax.f32 %v5540_v18, %v8477_v42  ;;  %v8575_v41 = vcombine.low %v1809_v6, %v1811_v49  ;;  %v922_v7 = vadd.f32 %v8408_v23, %v8090_v51  ;;  %v933_v42 = vadd.f32 %v8408_v23, %v8096_v39 }
 0x20f   :  { %v8581_v54 = vmax.f32 %v5211_v4, %v5212_v52  ;;  %v5536_v11 = vrot.slane %v5535_v46, 2  ;;  %v1033_v53 = vmax.f32 %v733_v59, 0.0  ;;  %v8586_v48 = vsel %vm9686_vm3, %v5557_v14, -inf }
 0x210   :  { %v5543_v28 = vrot.slane %v5542_v58, 4  ;;  %9761 = vst [vmem:[#allocation24_spill] sm:$0xff] %v8586_v48  ;;  %v1080_v21 = vmax.f32 %v922_v7, 0.0  ;;  %v1083_v6 = vmax.f32 %v933_v42, 0.0  ;;  %v4492_v51 = vrot.slane %v8571_v20, %v7512_v2 }
 0x211   :  { %v5537_v49 = vmax.f32 %v5535_v46, %v5536_v11  ;;  %v1761_v31 = vcombine.high %v1033_v53, %v1033_v53  ;;  %v1768_v39 = vrot.slane %v1033_v53, %v7512_v2  ;;  %v925_v20 = vadd.f32 %v8408_v23, %v8104_v44 }
 0x212   :  { %v5544_v13 = vmax.f32 %v5542_v58, %v5543_v28  ;;  %v2560_v52 = vcombine.high %v1080_v21, %v1080_v21  ;;  %v2567_v18 = vrot.slane %v1080_v21, %v7512_v2  ;;  %v2611_v35 = vcombine.high %v1083_v6, %v1083_v6  ;;  %v8600_v21 = vpop.f32.mrb[47].mxu1 }
 0x213   :  { %v5538_v9 = vrot.slane %v5537_v49, 1  ;;  %v1775_v58 = vrot.slane %v1761_v31, %v7512_v2  ;;  %v1776_v59 = vcombine.high %v1768_v39, %v1768_v39  ;;  %v2618_v14 = vrot.slane %v1083_v6, %v7512_v2 }
 0x214   :  { %v5545_v4 = vrot.slane %v5544_v13, 2  ;;  %v2574_v46 = vrot.slane %v2560_v52, %v7512_v2  ;;  %v2575_v7 = vcombine.high %v2567_v18, %v2567_v18  ;;  %v8598_v27 = vrot.slane %v2611_v35, %v7512_v2 }
 0x215   :  { %v5539_v42 = vmax.f32 %v5537_v49, %v5538_v9  ;;  %v1777_v11 = vcombine.high %v1775_v58, %v1775_v58  ;;  %v3525_v53 = vcombine.low %v1768_v39, %v1776_v59  ;;  %v2626_v3 = vcombine.high %v2618_v14, %v2618_v14 }
 0x216   :  { %v5546_v28 = vmax.f32 %v5544_v13, %v5545_v4  ;;  %v2576_v31 = vcombine.high %v2574_v46, %v2574_v46  ;;  %v4436_v36 = vcombine.low %v2567_v18, %v2575_v7  ;;  %v3547_v4 = vrot.slane %v1775_v58, %v7512_v2 }
 0x217   :  { %v8603_v13 = vsel %vm9686_vm3, %v5539_v42, -inf  ;;  %v3539_v6 = vrot.slane %v3525_v53, %v7512_v2  ;;  %v3548_v44 = vcombine.low %v1777_v11, %v8487_v37  ;;  %v4485_v59 = vcombine.low %v2618_v14, %v2626_v3 }
 0x218   :  { %v5547_v62 = vrot.slane %v5546_v28, 1  ;;  %9762 = vst [vmem:[#allocation48_spill] sm:$0xff] %v8603_v13  ;;  %v4437_v39 = vcombine.low %v2574_v46, %v2576_v31  ;;  %v4444_v52 = vrot.slane %v4436_v36, %v7512_v2  ;;  %v4507_v7 = vrot.slane %v8598_v27, %v7512_v2  ;;  %v8627_v31 = vpop.f32.mrb[48].mxu0 }
 0x219   :  { %v3540_v35 = vcombine.low %v3532_v19, %v3539_v6  ;;  %v3556_v18 = vrot.slane %v3548_v44, %v7512_v2  ;;  %v1081_v53 = vmax.f32 %v925_v20, 0.0  ;;  %v946_v37 = vadd.f32 %v8408_v23, %v8134_v50 }
 0x21a   :  { %v5548_v9 = vmax.f32 %v5546_v28, %v5547_v62  ;;  %v4451_v42 = vrot.slane %v4437_v39, %v7512_v2  ;;  %v9763_v62 = vrot.slane %v8520_v1, %v7512_v2  ;;  %v5217_v3 = vsel %vm4982_vm2, %v3547_v4, -inf }
 0x21b   :  { %v5216_v19 = vsel %vm9686_vm3, %v3540_v35, -inf  ;;  %v4499_v14 = vrot.slane %v4485_v59, %v7512_v2  ;;  %v2577_v11 = vcombine.high %v1081_v53, %v1081_v53  ;;  %v2584_v20 = vrot.slane %v1081_v53, %v7512_v2 }
 0x21c   :  { %v8616_v58 = vsel %vm9686_vm3, %v5548_v9, -inf  ;;  %v3564_v36 = vcombine.low %v3556_v18, %v9763_v62  ;;  %v5218_v28 = vmax.f32 %v5216_v19, %v5217_v3  ;;  %v4452_v46 = vcombine.low %v4444_v52, %v4451_v42  ;;  %v8633_v9 = vpop.f32.mrb[49].mxu0 }
 0x21d   :  { %v4500_v50 = vcombine.low %v4492_v51, %v4499_v14  ;;  %v5577_v44 = vsel %vm4982_vm2, %v4507_v7, -inf  ;;  %v2591_v52 = vrot.slane %v2577_v11, %v7512_v2  ;;  %v2592_v35 = vcombine.high %v2584_v20, %v2584_v20  ;;  %v8642_v42 = vpop.f32.mrb[50].mxu0 }
 0x21e   :  { %v5225_v6 = vsel %vm9686_vm3, %v3564_v36, -inf  ;;  %v5219_v4 = vrot.slane %v5218_v28, 4  ;;  %v5509_v18 = vrot.slane %v8541_v55, 2  ;;  %v3587_v59 = vrot.slane %v8575_v41, %v7512_v2 }
 0x21f   :  { %v5227_v39 = vmax.f32 %v5225_v6, %v8553_v16  ;;  %v5576_v51 = vsel %vm9686_vm3, %v4500_v50, -inf  ;;  %v4459_v7 = vrot.slane %v2584_v20, %v7512_v2  ;;  %v2593_v62 = vcombine.high %v2591_v52, %v2591_v52 }
 0x220   :  { %v5578_v53 = vmax.f32 %v5576_v51, %v5577_v44  ;;  %v5558_v36 = vsel %vm9686_vm3, %v4452_v46, -inf  ;;  %v1086_v19 = vmax.f32 %v946_v37, 0.0  ;;  %v5214_v16 = vrot.slane %v8581_v54, 1 }
 0x221   :  { %v9764_v3 = vcombine.high %v8565_v63, %v8565_v63  ;;  %v4460_v11 = vcombine.low %v2592_v35, %v2591_v52  ;;  %v5559_v41 = vsel %vm4982_vm2, %v4459_v7, -inf  ;;  %v3580_v20 = vrot.slane %v8569_v17, %v7512_v2 }
 0x222   :  { %v5220_v6 = vmax.f32 %v5218_v28, %v5219_v4  ;;  %v5579_v50 = vrot.slane %v5578_v53, 4  ;;  %v4461_v44 = vcombine.low %v2593_v62, %v8565_v63  ;;  %v8655_v46 = vmax.f32 %v8541_v55, %v5509_v18 }
 0x223   :  { %v4483_v14 = vrot.slane %v9764_v3, %v7512_v2  ;;  %v4468_v51 = vrot.slane %v4460_v11, %v7512_v2  ;;  %v5560_v49 = vmax.f32 %v5558_v36, %v5559_v41  ;;  %v8659_v1 = vcombine.low %v3580_v20, %v3587_v59 }
 0x224   :  { %v5580_v52 = vmax.f32 %v5578_v53, %v5579_v50  ;;  %v4475_v35 = vrot.slane %v4461_v44, %v7512_v2  ;;  %v2662_v7 = vcombine.high %v1086_v19, %v1086_v19  ;;  %v8663_v17 = vmax.f32 %v8581_v54, %v5214_v16 }
 0x225   :  { %v5568_v28 = vsel %vm4982_vm2, %v4483_v14, -inf  ;;  %v5561_v63 = vrot.slane %v5560_v49, 4  ;;  %v938_v55 = vadd.f32 %v8408_v23, %v8140_v12  ;;  %v5221_v4 = vrot.slane %v5220_v6, 2 }
 0x226   :  { %v5581_v18 = vrot.slane %v5580_v52, 2  ;;  %v4476_v62 = vcombine.low %v4468_v51, %v4475_v35  ;;  %v2669_v36 = vrot.slane %v1086_v19, %v7512_v2  ;;  %v5228_v59 = vrot.slane %v5227_v39, 4 }
 0x227   :  { %v5562_v3 = vmax.f32 %v5560_v49, %v5561_v63  ;;  %v1084_v53 = vmax.f32 %v938_v55, 0.0  ;;  %v754_v11 = vadd.f32 %v8408_v23, %v8167_v32  ;;  %v2676_v16 = vrot.slane %v2662_v7, %v7512_v2 }
 0x228   :  { %v5582_v41 = vmax.f32 %v5580_v52, %v5581_v18  ;;  %v5567_v54 = vsel %vm9686_vm3, %v4476_v62, -inf  ;;  %v2627_v14 = vcombine.high %v8598_v27, %v8598_v27  ;;  %v5222_v19 = vmax.f32 %v5220_v6, %v5221_v4 }
 0x229   :  { %v5563_v12 = vrot.slane %v5562_v3, 2  ;;  %v5569_v20 = vmax.f32 %v5567_v54, %v5568_v28  ;;  %v2628_v50 = vcombine.high %v1084_v53, %v1084_v53  ;;  %v2635_v44 = vrot.slane %v1084_v53, %v7512_v2 }
 0x22a   :  { %v5583_v51 = vrot.slane %v5582_v41, 1  ;;  %v2677_v49 = vcombine.high %v2669_v36, %v2669_v36  ;;  %v1038_v35 = vmax.f32 %v754_v11, 0.0  ;;  %v5229_v18 = vmax.f32 %v5227_v39, %v5228_v59 }
 0x22b   :  { %v5564_v63 = vmax.f32 %v5562_v3, %v5563_v12  ;;  %v5570_v55 = vrot.slane %v5569_v20, 4  ;;  %v2642_v32 = vrot.slane %v2628_v50, %v7512_v2  ;;  %v2643_v52 = vcombine.high %v2635_v44, %v2635_v44 }
 0x22c   :  { %v4555_v7 = vrot.slane %v2669_v36, %v7512_v2  ;;  %v4508_v62 = vcombine.low %v2627_v14, %v2635_v44  ;;  %v949_v27 = vadd.f32 %v8408_v23, %v8195_v0  ;;  %v5584_v28 = vmax.f32 %v5582_v41, %v5583_v51 }
 0x22d   :  { %v5565_v54 = vrot.slane %v5564_v63, 1  ;;  %v2644_v37 = vcombine.high %v2642_v32, %v2642_v32  ;;  %v4509_v53 = vcombine.low %v2643_v52, %v2642_v32  ;;  %v5223_v6 = vrot.slane %v5222_v19, 1 }
 0x22e   :  { %v4556_v4 = vcombine.low %v2677_v49, %v2676_v16  ;;  %v4516_v11 = vrot.slane %v4508_v62, %v7512_v2  ;;  %v1853_v3 = vrot.slane %v1038_v35, %v7512_v2  ;;  %v5571_v50 = vmax.f32 %v5569_v20, %v5570_v55 }
 0x22f   :  { %v5566_v12 = vmax.f32 %v5564_v63, %v5565_v54  ;;  %v4523_v39 = vrot.slane %v4509_v53, %v7512_v2  ;;  %v4531_v36 = vrot.slane %v2644_v37, %v7512_v2  ;;  %v5230_v59 = vrot.slane %v5229_v18, 2 }
 0x230   :  { %v1846_v14 = vcombine.high %v1038_v35, %v1038_v35  ;;  %v8684_v44 = vmax.f32 %v949_v27, 0.0  ;;  %v2678_v0 = vcombine.high %v2676_v16, %v2676_v16  ;;  %v8687_v41 = vsel %vm9686_vm3, %v5584_v28, -inf }
 0x231   :  { %v5819_v51 = vsel %vm9686_vm3, %v5566_v12, -inf  ;;  %v4524_v49 = vcombine.low %v4516_v11, %v4523_v39  ;;  %v5586_v32 = vsel %vm4982_vm2, %v4531_v36, -inf  ;;  %v5224_v52 = vmax.f32 %v5222_v19, %v5223_v6 }
 0x232   :  { %v9765_v20 = vmax.f32 %v8558_v15, %v8616_v58  ;;  %v4564_v37 = vrot.slane %v4556_v4, %v7512_v2  ;;  %v2686_v35 = vrot.slane %v8684_v44, %v7512_v2  ;;  %v5572_v16 = vrot.slane %v5571_v50, 2 }
 0x233   :  { %v5585_v55 = vsel %vm9686_vm3, %v4524_v49, -inf  ;;  %v1861_v62 = vcombine.high %v1853_v3, %v1853_v3  ;;  %v746_v27 = vadd.f32 %v8408_v23, %v8207_v30  ;;  %v8706_v58 = vsel %vm9686_vm3, %v8663_v17, -inf }
 0x234   :  { %v8694_v63 = vmax.f32 %v9765_v20, %v5819_v51  ;;  %v5587_v28 = vmax.f32 %v5585_v55, %v5586_v32  ;;  %v2694_v54 = vcombine.high %v2686_v35, %v2686_v35  ;;  %v4557_v15 = vcombine.low %v2678_v0, %v2686_v35 }
 0x235   :  { %v8709_v53 = vsel %vm4982_vm2, %v4555_v7, -inf  ;;  %v1860_v6 = vrot.slane %v1846_v14, %v7512_v2  ;;  %v1036_v4 = vmax.f32 %v746_v27, 0.0  ;;  %v8712_v11 = vmax.f32 %v5229_v18, %v5230_v59 }
 0x236   :  { %v4571_v30 = vrot.slane %v4557_v15, %v7512_v2  ;;  %v4579_v12 = vrot.slane %v2694_v54, %v7512_v2  ;;  %v941_v39 = vadd.f32 %v8408_v23, %v8236_v38  ;;  %v8719_v36 = vsel %vm9686_vm3, %v5224_v52, -inf }
 0x237   :  { %v8721_v17 = vcombine.low %v1853_v3, %v1861_v62  ;;  %v1819_v7 = vrot.slane %v1036_v4, %v7512_v2  ;;  %v757_v14 = vadd.f32 %v8408_v23, %v8246_v40  ;;  %v5573_v0 = vmax.f32 %v5571_v50, %v5572_v16 }
 0x238   :  { %v4572_v18 = vcombine.low %v4564_v37, %v4571_v30  ;;  %v5604_v59 = vsel %vm4982_vm2, %v4579_v12, -inf  ;;  %v1085_v51 = vmax.f32 %v941_v39, 0.0  ;;  %v3643_v49 = vrot.slane %v1860_v6, %v7512_v2 }
 0x239   :  { %v2679_v38 = vcombine.high %v8684_v44, %v8684_v44  ;;  %v3595_v32 = vrot.slane %v1819_v7, %v7512_v2  ;;  %v5234_v3 = vsel %vm9686_vm3, %v8659_v1, -inf  ;;  %v1812_v20 = vcombine.high %v1036_v4, %v1036_v4 }
 0x23a   :  { %v5603_v52 = vsel %vm9686_vm3, %v4572_v18, -inf  ;;  %v2645_v35 = vcombine.high %v1085_v51, %v1085_v51  ;;  %v2652_v40 = vrot.slane %v1085_v51, %v7512_v2  ;;  %v1039_v55 = vmax.f32 %v757_v14, 0.0 }
 0x23b   :  { %v5605_v37 = vmax.f32 %v5603_v52, %v5604_v59  ;;  %v5235_v16 = vsel %vm4982_vm2, %v3595_v32, -inf  ;;  %v5574_v62 = vrot.slane %v5573_v0, 1  ;;  %v5588_v15 = vrot.slane %v5587_v28, 4 }
 0x23c   :  { %v5236_v44 = vmax.f32 %v5234_v3, %v5235_v16  ;;  %v2659_v27 = vrot.slane %v2645_v35, %v7512_v2  ;;  %v2660_v54 = vcombine.high %v2652_v40, %v2652_v40  ;;  %v8740_v1 = vsel %vm4982_vm2, %v3643_v49, -inf }
 0x23d   :  { %v1862_v4 = vcombine.high %v1860_v6, %v1860_v6  ;;  %v1863_v30 = vcombine.high %v1039_v55, %v1039_v55  ;;  %v1826_v12 = vrot.slane %v1812_v20, %v7512_v2  ;;  %v1827_v39 = vcombine.high %v1819_v7, %v1819_v7 }
 0x23e   :  { %v2661_v18 = vcombine.high %v2659_v27, %v2659_v27  ;;  %v4532_v51 = vcombine.low %v2652_v40, %v2660_v54  ;;  %v5606_v59 = vrot.slane %v5605_v37, 4  ;;  %v1870_v32 = vrot.slane %v1039_v55, %v7512_v2 }
 0x23f   :  { %v1877_v14 = vrot.slane %v1863_v30, %v7512_v2  ;;  %v749_v3 = vadd.f32 %v8408_v23, %v8267_v26  ;;  %v8747_v52 = vmax.f32 %v5573_v0, %v5574_v62  ;;  %v2693_v49 = vrot.slane %v2679_v38, %v7512_v2 }
 0x240   :  { %v4533_v35 = vcombine.low %v2659_v27, %v2661_v18  ;;  %v4540_v6 = vrot.slane %v4532_v51, %v7512_v2  ;;  %v5589_v16 = vmax.f32 %v5587_v28, %v5588_v15  ;;  %v1878_v20 = vcombine.high %v1870_v32, %v1870_v32  ;;  %v8755_v28 = vpop.f32.mrb[51].mxu0 }
 0x241   :  { %9766 = vst [vmem:[#allocation49_spill] sm:$0xff] %v8747_v52  ;;  %v1879_v7 = vcombine.high %v1877_v14, %v1877_v14  ;;  %v3644_v19 = vcombine.low %v1862_v4, %v1870_v32  ;;  %v3596_v40 = vcombine.low %v1827_v39, %v1826_v12  ;;  %v5237_v54 = vrot.slane %v5236_v44, 4 }
 0x242   :  { %v4547_v55 = vrot.slane %v4533_v35, %v7512_v2  ;;  %v1037_v50 = vmax.f32 %v749_v3, 0.0  ;;  %v5607_v30 = vmax.f32 %v5605_v37, %v5606_v59  ;;  %v3645_v48 = vcombine.low %v1878_v20, %v1877_v14 }
 0x243   :  { %v3652_v26 = vrot.slane %v3644_v19, %v7512_v2  ;;  %v1828_v0 = vcombine.high %v1826_v12, %v1826_v12  ;;  %v3667_v38 = vrot.slane %v1879_v7, %v7512_v2  ;;  %v5590_v15 = vrot.slane %v5589_v16, 2 }
 0x244   :  { %v4548_v62 = vcombine.low %v4540_v6, %v4547_v55  ;;  %v1829_v27 = vcombine.high %v1037_v50, %v1037_v50  ;;  %v1836_v18 = vrot.slane %v1037_v50, %v7512_v2  ;;  %v2695_v4 = vcombine.high %v2693_v49, %v2693_v49 }
 0x245   :  { %v3659_v39 = vrot.slane %v3645_v48, %v7512_v2  ;;  %v962_v51 = vadd.f32 %v8408_v23, %v8293_v56  ;;  %v5238_v37 = vmax.f32 %v5236_v44, %v5237_v54  ;;  %v3604_v32 = vrot.slane %v3596_v40, %v7512_v2 }
 0x246   :  { %v5594_v59 = vsel %vm9686_vm3, %v4548_v62, -inf  ;;  %v1843_v19 = vrot.slane %v1829_v27, %v7512_v2  ;;  %v1844_v12 = vcombine.high %v1836_v18, %v1836_v18  ;;  %v3597_v3 = vcombine.low %v1828_v0, %v1836_v18 }
 0x247   :  { %v5596_v14 = vmax.f32 %v5594_v59, %v8709_v53  ;;  %v3660_v50 = vcombine.low %v3652_v26, %v3659_v39  ;;  %v5608_v35 = vrot.slane %v5607_v30, 2  ;;  %v5262_v6 = vsel %vm4982_vm2, %v3667_v38, -inf }
 0x248   :  { %v1845_v20 = vcombine.high %v1843_v19, %v1843_v19  ;;  %v1090_v48 = vmax.f32 %v962_v51, 0.0  ;;  %v3611_v56 = vrot.slane %v3597_v3, %v7512_v2  ;;  %v3619_v44 = vrot.slane %v1844_v12, %v7512_v2 }
 0x249   :  { %v5261_v7 = vsel %vm9686_vm3, %v3660_v50, -inf  ;;  %v954_v54 = vadd.f32 %v8408_v23, %v8311_v47  ;;  %v4580_v55 = vcombine.low %v2693_v49, %v2695_v4  ;;  %v5239_v40 = vrot.slane %v5238_v37, 2 }
 0x24a   :  { %v5263_v62 = vmax.f32 %v5261_v7, %v5262_v6  ;;  %v3620_v53 = vcombine.low %v1843_v19, %v1845_v20  ;;  %v5591_v26 = vmax.f32 %v5589_v16, %v5590_v15  ;;  %v3612_v0 = vcombine.low %v3604_v32, %v3611_v56 }
 0x24b   :  { %v2730_v27 = vcombine.high %v1090_v48, %v1090_v48  ;;  %v2737_v38 = vrot.slane %v1090_v48, %v7512_v2  ;;  %v5609_v18 = vmax.f32 %v5607_v30, %v5608_v35  ;;  %v5597_v39 = vrot.slane %v5596_v14, 4 }
 0x24c   :  { %v3628_v51 = vrot.slane %v3620_v53, %v7512_v2  ;;  %v1088_v59 = vmax.f32 %v954_v54, 0.0  ;;  %v5243_v50 = vsel %vm9686_vm3, %v3612_v0, -inf  ;;  %v5244_v12 = vsel %vm4982_vm2, %v3619_v44, -inf }
 0x24d   :  { %v2744_v47 = vrot.slane %v2730_v27, %v7512_v2  ;;  %v2745_v49 = vcombine.high %v2737_v38, %v2737_v38  ;;  %v5240_v4 = vmax.f32 %v5238_v37, %v5239_v40  ;;  %v9767_v16 = vrot.slane %v8721_v17, %v7512_v2 }
 0x24e   :  { %v5245_v19 = vmax.f32 %v5243_v50, %v5244_v12  ;;  %v2696_v32 = vcombine.high %v1088_v59, %v1088_v59  ;;  %v2703_v35 = vrot.slane %v1088_v59, %v7512_v2  ;;  %v965_v6 = vadd.f32 %v8408_v23, %v8331_v43 }
 0x24f   :  { %v3636_v15 = vcombine.low %v3628_v51, %v9767_v16  ;;  %v2746_v3 = vcombine.high %v2744_v47, %v2744_v47  ;;  %v4628_v30 = vcombine.low %v2737_v38, %v2745_v49  ;;  %v5592_v20 = vrot.slane %v5591_v26, 1 }
 0x250   :  { %v5246_v48 = vrot.slane %v5245_v19, 4  ;;  %v2710_v56 = vrot.slane %v2696_v32, %v7512_v2  ;;  %v5598_v37 = vmax.f32 %v5596_v14, %v5597_v39  ;;  %v4588_v40 = vrot.slane %v4580_v55, %v7512_v2 }
 0x251   :  { %v5252_v7 = vsel %vm9686_vm3, %v3636_v15, -inf  ;;  %v4629_v17 = vcombine.low %v2744_v47, %v2746_v3  ;;  %v4636_v54 = vrot.slane %v4628_v30, %v7512_v2  ;;  %v5610_v53 = vrot.slane %v5609_v18, 1 }
 0x252   :  { %v5254_v44 = vmax.f32 %v5252_v7, %v8740_v1  ;;  %v5241_v0 = vrot.slane %v5240_v4, 1  ;;  %v2711_v27 = vcombine.high %v2703_v35, %v2703_v35  ;;  %v5264_v38 = vrot.slane %v5263_v62, 4 }
 0x253   :  { %v5247_v51 = vmax.f32 %v5245_v19, %v5246_v48  ;;  %v4643_v43 = vrot.slane %v4629_v17, %v7512_v2  ;;  %v1091_v59 = vmax.f32 %v965_v6, 0.0  ;;  %v8787_v50 = vmax.f32 %v5591_v26, %v5592_v20 }
 0x254   :  { %v4581_v12 = vcombine.low %v2703_v35, %v2711_v27  ;;  %v4603_v14 = vrot.slane %v2710_v56, %v7512_v2  ;;  %v957_v1 = vadd.f32 %v8408_v23, %v8337_v5  ;;  %v5599_v39 = vrot.slane %v5598_v37, 2 }
 0x255   :  { %9768 = vst [vmem:[#allocation50_spill] sm:$0xff] %v8787_v50  ;;  %v5255_v47 = vrot.slane %v5254_v44, 4  ;;  %v4644_v49 = vcombine.low %v4636_v54, %v4643_v43  ;;  %v2754_v55 = vrot.slane %v1091_v59, %v7512_v2  ;;  %v8793_v16 = vmax.f32 %v5609_v18, %v5610_v53  ;;  %v9791_v50 = vld [vmem:[#allocation25_spill] sm:$0xff] }
 0x256   :  { %v5242_v15 = vmax.f32 %v5240_v4, %v5241_v0  ;;  %v4595_v19 = vrot.slane %v4581_v12, %v7512_v2  ;;  %v1089_v32 = vmax.f32 %v957_v1, 0.0  ;;  %v5265_v3 = vmax.f32 %v5263_v62, %v5264_v38 }
 0x257   :  { %9769 = vst [vmem:[#allocation51_spill] sm:$0xff] %v8793_v16  ;;  %v5248_v26 = vrot.slane %v5247_v51, 2  ;;  %v4651_v30 = vrot.slane %v2754_v55, %v7512_v2  ;;  %v2712_v35 = vcombine.high %v2710_v56, %v2710_v56  ;;  %v5613_v20 = vsel %vm4982_vm2, %v4603_v14, -inf }
 0x258   :  { %v4596_v6 = vcombine.low %v4588_v40, %v4595_v19  ;;  %v5630_v5 = vsel %vm9686_vm3, %v4644_v49, -inf  ;;  %v2713_v48 = vcombine.high %v1089_v32, %v1089_v32  ;;  %v5600_v7 = vmax.f32 %v5598_v37, %v5599_v39 }
 0x259   :  { %v5256_v17 = vmax.f32 %v5254_v44, %v5255_v47  ;;  %v5631_v18 = vsel %vm4982_vm2, %v4651_v30, -inf  ;;  %v2720_v4 = vrot.slane %v1089_v32, %v7512_v2  ;;  %v2747_v53 = vcombine.high %v1091_v59, %v1091_v59  ;;  %v8808_v59 = vld [vmem:[#allocation4] ss:$0 sm:$0xff] }
 0x25a   :  { %v5612_v54 = vsel %vm9686_vm3, %v4596_v6, -inf  ;;  %v5632_v62 = vmax.f32 %v5630_v5, %v5631_v18  ;;  %v2727_v0 = vrot.slane %v2713_v48, %v7512_v2  ;;  %v5249_v27 = vmax.f32 %v5247_v51, %v5248_v26 }
 0x25b   :  { %v5614_v56 = vmax.f32 %v5612_v54, %v5613_v20  ;;  %v2728_v40 = vcombine.high %v2720_v4, %v2720_v4  ;;  %v4604_v38 = vcombine.low %v2712_v35, %v2720_v4  ;;  %v770_v37 = vadd.f32 %v8408_v23, %v8352_v33 }
 0x25c   :  { %v5633_v43 = vrot.slane %v5632_v62, 4  ;;  %v2729_v12 = vcombine.high %v2727_v0, %v2727_v0  ;;  %v978_v44 = vadd.f32 %v8408_v23, %v8389_v45  ;;  %v762_v51 = vadd.f32 %v8808_v59, %v8396_v25 }
 0x25d   :  { %v5615_v14 = vrot.slane %v5614_v56, 4  ;;  %v4605_v1 = vcombine.low %v2728_v40, %v2727_v0  ;;  %v4612_v39 = vrot.slane %v4604_v38, %v7512_v2  ;;  %v1042_v19 = vmax.f32 %v770_v37, 0.0 }
 0x25e   :  { %v5634_v47 = vmax.f32 %v5632_v62, %v5633_v43  ;;  %v4627_v49 = vrot.slane %v2729_v12, %v7512_v2  ;;  %v1094_v32 = vmax.f32 %v978_v44, 0.0  ;;  %v2762_v30 = vcombine.high %v2754_v55, %v2754_v55 }
 0x25f   :  { %v5616_v26 = vmax.f32 %v5614_v56, %v5615_v14  ;;  %v4619_v33 = vrot.slane %v4605_v1, %v7512_v2  ;;  %v1040_v35 = vmax.f32 %v762_v51, 0.0  ;;  %v5601_v45 = vrot.slane %v5600_v7, 1 }
 0x260   :  { %v5266_v23 = vrot.slane %v5265_v3, 2  ;;  %v5635_v6 = vrot.slane %v5634_v47, 2  ;;  %v1914_v20 = vcombine.high %v1042_v19, %v1042_v19  ;;  %v2761_v5 = vrot.slane %v2747_v53, %v7512_v2 }
 0x261   :  { %v4620_v48 = vcombine.low %v4612_v39, %v4619_v33  ;;  %v5622_v18 = vsel %vm4982_vm2, %v4627_v49, -inf  ;;  %v8817_v25 = vrot.slane %v1042_v19, %v7512_v2  ;;  %v5257_v4 = vrot.slane %v5256_v17, 2 }
 0x262   :  { %v5617_v54 = vrot.slane %v5616_v26, 2  ;;  %v2798_v62 = vcombine.high %v1094_v32, %v1094_v32  ;;  %v8820_v55 = vrot.slane %v1094_v32, %v7512_v2  ;;  %v5250_v0 = vrot.slane %v5249_v27, 1 }
 0x263   :  { %v4652_v56 = vcombine.low %v2762_v30, %v2761_v5  ;;  %v5621_v40 = vsel %vm9686_vm3, %v4620_v48, -inf  ;;  %v1880_v38 = vcombine.high %v1040_v35, %v1040_v35  ;;  %v5636_v43 = vmax.f32 %v5634_v47, %v5635_v6 }
 0x264   :  { %v8823_v12 = vmax.f32 %v5621_v40, %v5622_v18  ;;  %v1928_v53 = vrot.slane %v1914_v20, %v7512_v2  ;;  %v970_v37 = vadd.f32 %v8808_v59, %v8412_v29  ;;  %v8829_v44 = vsel %vm9686_vm3, %v5242_v15, -inf }
 0x265   :  { %v8831_v14 = vmax.f32 %v5265_v3, %v5266_v23  ;;  %v1929_v1 = vcombine.high %v8817_v25, %v8817_v25  ;;  %v1887_v39 = vrot.slane %v1040_v35, %v7512_v2  ;;  %v8836_v51 = vmax.f32 %v5600_v7, %v5601_v45 }
 0x266   :  { %v8838_v47 = vmax.f32 %v5616_v26, %v5617_v54  ;;  %v8841_v49 = vrot.slane %v2798_v62, %v7512_v2  ;;  %v2813_v29 = vcombine.high %v8820_v55, %v8820_v55  ;;  %v8845_v19 = vmax.f32 %v5249_v27, %v5250_v0 }
 0x267   :  { %v8847_v15 = vmax.f32 %v5256_v17, %v5257_v4  ;;  %v4660_v3 = vrot.slane %v4652_v56, %v7512_v2  ;;  %v1894_v32 = vrot.slane %v1880_v38, %v7512_v2  ;;  %v5637_v30 = vrot.slane %v5636_v43, 1 }
 0x268   :  { %v1930_v33 = vcombine.high %v1928_v53, %v1928_v53  ;;  %v1895_v7 = vcombine.high %v1887_v39, %v1887_v39  ;;  %v1092_v35 = vmax.f32 %v970_v37, 0.0  ;;  %v3715_v26 = vrot.slane %v1929_v1, %v7512_v2 }
 0x269   :  { %v1896_v45 = vcombine.high %v1894_v32, %v1894_v32  ;;  %v2763_v23 = vcombine.high %v2761_v5, %v2761_v5  ;;  %v773_v6 = vadd.f32 %v8808_v59, %v8424_v34  ;;  %v5619_v27 = vrot.slane %v8838_v47, 1 }
 0x26a   :  { %v2814_v17 = vcombine.high %v8841_v49, %v8841_v49  ;;  %v8858_v20 = vcombine.low %v2813_v29, %v8841_v49  ;;  %v2771_v48 = vrot.slane %v1092_v35, %v7512_v2  ;;  %v981_v54 = vadd.f32 %v8808_v59, %v8431_v24 }
 0x26b   :  { %v3669_v18 = vcombine.low %v1894_v32, %v1896_v45  ;;  %v1043_v4 = vmax.f32 %v773_v6, 0.0  ;;  %v765_v5 = vadd.f32 %v8808_v59, %v8440_v57  ;;  %v3716_v62 = vcombine.low %v1928_v53, %v1930_v33 }
 0x26c   :  { %v3668_v34 = vcombine.low %v1887_v39, %v1895_v7  ;;  %v2764_v0 = vcombine.high %v1092_v35, %v1092_v35  ;;  %v2779_v56 = vcombine.high %v2771_v48, %v2771_v48  ;;  %v8865_v40 = vmax.f32 %v5636_v43, %v5637_v30 }
 0x26d   :  { %v4653_v38 = vcombine.low %v2763_v23, %v2771_v48  ;;  %v1931_v37 = vcombine.high %v1043_v4, %v1043_v4  ;;  %v1938_v1 = vrot.slane %v1043_v4, %v7512_v2  ;;  %v3683_v29 = vrot.slane %v3669_v18, %v7512_v2 }
 0x26e   :  { %v4675_v32 = vrot.slane %v2779_v56, %v7512_v2  ;;  %v1095_v45 = vmax.f32 %v981_v54, 0.0  ;;  %v1041_v6 = vmax.f32 %v765_v5, 0.0  ;;  %v5624_v24 = vrot.slane %v8823_v12, 4 }
 0x26f   :  { %v4667_v57 = vrot.slane %v4653_v38, %v7512_v2  ;;  %v8873_v53 = vrot.slane %v1931_v37, %v7512_v2  ;;  %v1946_v39 = vcombine.high %v1938_v1, %v1938_v1  ;;  %v3724_v43 = vrot.slane %v3716_v62, %v7512_v2 }
 0x270   :  { %v3676_v30 = vrot.slane %v3668_v34, %v7512_v2  ;;  %v2778_v33 = vrot.slane %v2764_v0, %v7512_v2  ;;  %v2815_v7 = vcombine.high %v1095_v45, %v1095_v45  ;;  %v5640_v23 = vsel %vm4982_vm2, %v4675_v32, -inf }
 0x271   :  { %v4668_v35 = vcombine.low %v4660_v3, %v4667_v57  ;;  %v3717_v48 = vcombine.low %v1938_v1, %v1946_v39  ;;  %v1897_v18 = vcombine.high %v1041_v6, %v1041_v6  ;;  %v3739_v54 = vrot.slane %v8873_v53, %v7512_v2 }
 0x272   :  { %v3684_v4 = vcombine.low %v3676_v30, %v3683_v29  ;;  %v2822_v5 = vrot.slane %v1095_v45, %v7512_v2  ;;  %v1904_v56 = vrot.slane %v1041_v6, %v7512_v2  ;;  %v2829_v0 = vrot.slane %v2815_v7, %v7512_v2 }
 0x273   :  { %v5639_v62 = vsel %vm9686_vm3, %v4668_v35, -inf  ;;  %v3731_v34 = vrot.slane %v3717_v48, %v7512_v2  ;;  %v1911_v3 = vrot.slane %v1897_v18, %v7512_v2  ;;  %v5280_v38 = vsel %vm4982_vm2, %v3715_v26, -inf }
 0x274   :  { %v5641_v1 = vmax.f32 %v5639_v62, %v5640_v23  ;;  %v1912_v29 = vcombine.high %v1904_v56, %v1904_v56  ;;  %v2780_v32 = vcombine.high %v2778_v33, %v2778_v33  ;;  %v3691_v6 = vrot.slane %v1904_v56, %v7512_v2 }
 0x275   :  { %v3732_v57 = vcombine.low %v3724_v43, %v3731_v34  ;;  %v1913_v45 = vcombine.high %v1911_v3, %v1911_v3  ;;  %v5289_v39 = vsel %vm4982_vm2, %v3739_v54, -inf  ;;  %v2830_v30 = vcombine.high %v2822_v5, %v2822_v5 }
 0x276   :  { %v3692_v35 = vcombine.low %v1912_v29, %v1911_v3  ;;  %v5270_v7 = vsel %vm9686_vm3, %v3684_v4, -inf  ;;  %v2831_v18 = vcombine.high %v2829_v0, %v2829_v0  ;;  %v973_v23 = vadd.f32 %v8808_v59, %v8451_v61 }
 0x277   :  { %v5288_v48 = vsel %vm9686_vm3, %v3732_v57, -inf  ;;  %v3693_v26 = vcombine.low %v1913_v45, %v8817_v25  ;;  %v5642_v62 = vrot.slane %v5641_v1, 4  ;;  %v5271_v56 = vsel %vm4982_vm2, %v3691_v6, -inf }
 0x278   :  { %v5290_v37 = vmax.f32 %v5288_v48, %v5289_v39  ;;  %v3700_v43 = vrot.slane %v3692_v35, %v7512_v2  ;;  %v5272_v34 = vmax.f32 %v5270_v7, %v5271_v56  ;;  %v1093_v3 = vmax.f32 %v973_v23, 0.0 }
 0x279   :  { %v3707_v54 = vrot.slane %v3693_v26, %v7512_v2  ;;  %v786_v4 = vadd.f32 %v8808_v59, %v8506_v10  ;;  %v5625_v29 = vmax.f32 %v8823_v12, %v5624_v24  ;;  %v4723_v61 = vrot.slane %v2814_v17, %v7512_v2 }
 0x27a   :  { %v4676_v25 = vcombine.low %v2778_v33, %v2780_v32  ;;  %v5291_v57 = vrot.slane %v5290_v37, 4  ;;  %v4724_v45 = vcombine.low %v2822_v5, %v2830_v30  ;;  %v2781_v35 = vcombine.high %v1093_v3, %v1093_v3 }
 0x27b   :  { %v3708_v39 = vcombine.low %v3700_v43, %v3707_v54  ;;  %v2788_v6 = vrot.slane %v1093_v3, %v7512_v2  ;;  %v5643_v48 = vmax.f32 %v5641_v1, %v5642_v62  ;;  %v4725_v7 = vcombine.low %v2829_v0, %v2831_v18 }
 0x27c   :  { %v5273_v26 = vrot.slane %v5272_v34, 4  ;;  %v1046_v23 = vmax.f32 %v786_v4, 0.0  ;;  %v5292_v56 = vmax.f32 %v5290_v37, %v5291_v57  ;;  %v2795_v12 = vrot.slane %v2781_v35, %v7512_v2 }
 0x27d   :  { %v5279_v10 = vsel %vm9686_vm3, %v3708_v39, -inf  ;;  %v2796_v24 = vcombine.high %v2788_v6, %v2788_v6  ;;  %v4684_v49 = vrot.slane %v4676_v25, %v7512_v2  ;;  %v994_v0 = vadd.f32 %v8808_v59, %v8508_v22 }
 0x27e   :  { %v8911_v17 = vmax.f32 %v5279_v10, %v5280_v38  ;;  %v1982_v33 = vcombine.high %v1046_v23, %v1046_v23  ;;  %v1989_v5 = vrot.slane %v1046_v23, %v7512_v2  ;;  %v2797_v32 = vcombine.high %v2795_v12, %v2795_v12 }
 0x27f   :  { %v4677_v30 = vcombine.low %v2788_v6, %v2796_v24  ;;  %v4699_v1 = vrot.slane %v2795_v12, %v7512_v2  ;;  %v5626_v37 = vrot.slane %v5625_v29, 2  ;;  %v4732_v18 = vrot.slane %v4724_v45, %v7512_v2 }
 0x280   :  { %v4739_v62 = vrot.slane %v4725_v7, %v7512_v2  ;;  %v5274_v43 = vmax.f32 %v5272_v34, %v5273_v26  ;;  %v5644_v54 = vrot.slane %v5643_v48, 2  ;;  %v5293_v3 = vrot.slane %v5292_v56, 2 }
 0x281   :  { %v4691_v38 = vrot.slane %v4677_v30, %v7512_v2  ;;  %v4700_v4 = vcombine.low %v2797_v32, %v8820_v55  ;;  %v8924_v25 = vmax.f32 %v8838_v47, %v5619_v27  ;;  %v5658_v57 = vsel %vm4982_vm2, %v4723_v61, -inf }
 0x282   :  { %v8928_v22 = vrot.slane %v1982_v33, %v7512_v2  ;;  %v1997_v45 = vcombine.high %v1989_v5, %v1989_v5  ;;  %v5649_v35 = vsel %vm4982_vm2, %v4699_v1, -inf  ;;  %v1098_v6 = vmax.f32 %v994_v0, 0.0 }
 0x283   :  { %v4692_v39 = vcombine.low %v4684_v49, %v4691_v38  ;;  %v4708_v34 = vrot.slane %v4700_v4, %v7512_v2  ;;  %v8932_v7 = vmax.f32 %v5625_v29, %v5626_v37  ;;  %v4740_v55 = vcombine.low %v4732_v18, %v4739_v62 }
 0x284   :  { %v5275_v26 = vrot.slane %v5274_v43, 2  ;;  %v778_v47 = vadd.f32 %v8808_v59, %v8511_v60  ;;  %v8936_v27 = vmax.f32 %v5643_v48, %v5644_v54  ;;  %v8938_v61 = vmax.f32 %v5292_v56, %v5293_v3  ;;  %v9771_v56 = vld [vmem:[#allocation23_spill] sm:$0xff]  ;;  %v9772_v54 = vld [vmem:[#allocation45_spill] sm:$0xff] }
 0x285   :  { %v9770_v23 = vrot.slane %v8858_v20, %v7512_v2  ;;  %v5648_v12 = vsel %vm9686_vm3, %v4692_v39, -inf  ;;  %v3787_v49 = vrot.slane %v1989_v5, %v7512_v2  ;;  %v8946_v29 = vcombine.low %v1997_v45, %v8928_v22 }
 0x286   :  { %v5650_v24 = vmax.f32 %v5648_v12, %v5649_v35  ;;  %v1044_v33 = vmax.f32 %v778_v47, 0.0  ;;  %v2866_v48 = vcombine.high %v1098_v6, %v1098_v6  ;;  %v986_v30 = vadd.f32 %v8808_v59, %v9771_v56 }
 0x287   :  { %v4716_v10 = vcombine.low %v4708_v34, %v9770_v23  ;;  %v8952_v1 = vmax.f32 %v5274_v43, %v5275_v26  ;;  %v2873_v0 = vrot.slane %v1098_v6, %v7512_v2  ;;  %v1947_v5 = vcombine.high %v8873_v53, %v8873_v53 }
 0x288   :  { %v1948_v37 = vcombine.high %v1044_v33, %v1044_v33  ;;  %v1955_v18 = vrot.slane %v1044_v33, %v7512_v2  ;;  %v1096_v62 = vmax.f32 %v986_v30, 0.0  ;;  %v789_v3 = vadd.f32 %v8808_v59, %v9772_v54 }
 0x289   :  { %v5657_v60 = vsel %vm9686_vm3, %v4716_v10, -inf  ;;  %v3796_v38 = vrot.slane %v8946_v29, %v7512_v2  ;;  %v8965_v43 = vsel %vm4982_vm2, %v3787_v49, -inf  ;;  %v2880_v39 = vrot.slane %v2866_v48, %v7512_v2 }
 0x28a   :  { %v8954_v20 = vmax.f32 %v5657_v60, %v5658_v57  ;;  %v1962_v4 = vrot.slane %v1948_v37, %v7512_v2  ;;  %v9773_v57 = vld [vmem:[#allocation46_spill] sm:$0xff]  ;;  %v1963_v53 = vcombine.high %v1955_v18, %v1955_v18  ;;  %v3740_v34 = vcombine.low %v1947_v5, %v1955_v18 }
 0x28b   :  { %v997_v45 = vadd.f32 %v8808_v59, %v9773_v57  ;;  %v2839_v35 = vrot.slane %v1096_v62, %v7512_v2  ;;  %v5651_v6 = vrot.slane %v5650_v24, 4  ;;  %v2881_v26 = vcombine.high %v2873_v0, %v2873_v0 }
 0x28c   :  { %v1964_v47 = vcombine.high %v1962_v4, %v1962_v4  ;;  %v1047_v23 = vmax.f32 %v789_v3, 0.0  ;;  %v4795_v10 = vrot.slane %v2880_v39, %v7512_v2  ;;  %v3741_v12 = vcombine.low %v1963_v53, %v1962_v4 }
 0x28d   :  { %v5666_v49 = vsel %vm9686_vm3, %v4740_v55, -inf  ;;  %v1998_v29 = vcombine.high %v8928_v22, %v8928_v22  ;;  %v2832_v33 = vcombine.high %v1096_v62, %v1096_v62  ;;  %v4747_v60 = vrot.slane %v2839_v35, %v7512_v2 }
 0x28e   :  { %v1999_v48 = vcombine.high %v1047_v23, %v1047_v23  ;;  %v1099_v56 = vmax.f32 %v997_v45, 0.0  ;;  %v3748_v30 = vrot.slane %v3740_v34, %v7512_v2  ;;  %v3755_v37 = vrot.slane %v3741_v12, %v7512_v2 }
 0x28f   :  { %v3763_v5 = vrot.slane %v1964_v47, %v7512_v2  ;;  %v2006_v18 = vrot.slane %v1047_v23, %v7512_v2  ;;  %v8981_v54 = vmax.f32 %v5650_v24, %v5651_v6  ;;  %v8983_v3 = vcombine.low %v2873_v0, %v2881_v26  ;;  %v9774_v6 = vld [vmem:[#allocation47_spill] sm:$0xff] }
 0x290   :  { %v2847_v55 = vcombine.high %v2839_v35, %v2839_v35  ;;  %v5667_v22 = vsel %vm4982_vm2, %v4747_v60, -inf  ;;  %v3756_v62 = vcombine.low %v3748_v30, %v3755_v37  ;;  %v2882_v53 = vcombine.high %v2880_v39, %v2880_v39 }
 0x291   :  { %v5668_v4 = vmax.f32 %v5666_v49, %v5667_v22  ;;  %v2014_v57 = vcombine.high %v2006_v18, %v2006_v18  ;;  %v2013_v45 = vrot.slane %v1999_v48, %v7512_v2  ;;  %v3789_v34 = vcombine.low %v1998_v29, %v2006_v18 }
 0x292   :  { %v2883_v32 = vcombine.high %v1099_v56, %v1099_v56  ;;  %v2890_v12 = vrot.slane %v1099_v56, %v7512_v2  ;;  %v5297_v47 = vsel %vm9686_vm3, %v3756_v62, -inf  ;;  %v5298_v24 = vsel %vm4982_vm2, %v3763_v5, -inf }
 0x293   :  { %v2846_v0 = vrot.slane %v2832_v33, %v7512_v2  ;;  %v781_v35 = vadd.f32 %v8808_v59, %v9774_v6  ;;  %v8993_v26 = vmax.f32 %v5297_v47, %v5298_v24  ;;  %v3803_v23 = vrot.slane %v3789_v34, %v7512_v2 }
 0x294   :  { %v3811_v39 = vrot.slane %v2014_v57, %v7512_v2  ;;  %v2897_v49 = vrot.slane %v2883_v32, %v7512_v2  ;;  %v4787_v29 = vrot.slane %v8983_v3, %v7512_v2  ;;  %v9001_v60 = vsel %vm4982_vm2, %v4795_v10, -inf }
 0x295   :  { %v2898_v48 = vcombine.high %v2890_v12, %v2890_v12  ;;  %v4796_v56 = vcombine.low %v2882_v53, %v2890_v12  ;;  %v4748_v33 = vcombine.low %v2847_v55, %v2846_v0  ;;  %v2015_v30 = vcombine.high %v2013_v45, %v2013_v45 }
 0x296   :  { %v3804_v37 = vcombine.low %v3796_v38, %v3803_v23  ;;  %v2899_v5 = vcombine.high %v2897_v49, %v2897_v49  ;;  %v5653_v18 = vrot.slane %v8981_v54, 2  ;;  %v1045_v57 = vmax.f32 %v781_v35, 0.0 }
 0x297   :  { %v4797_v22 = vcombine.low %v2898_v48, %v2897_v49  ;;  %v4804_v62 = vrot.slane %v4796_v56, %v7512_v2  ;;  %v5316_v34 = vsel %vm4982_vm2, %v3811_v39, -inf  ;;  %v989_v10 = vadd.f32 %v8808_v59, %v8600_v21 }
 0x298   :  { %v5315_v32 = vsel %vm9686_vm3, %v3804_v37, -inf  ;;  %v4819_v47 = vrot.slane %v2899_v5, %v7512_v2  ;;  %v5669_v53 = vrot.slane %v5668_v4, 4  ;;  %v1965_v12 = vcombine.high %v1045_v57, %v1045_v57 }
 0x299   :  { %v9010_v55 = vmax.f32 %v5315_v32, %v5316_v34  ;;  %v4811_v38 = vrot.slane %v4797_v22, %v7512_v2  ;;  %v4756_v24 = vrot.slane %v4748_v33, %v7512_v2  ;;  %v9014_v6 = vcombine.low %v2013_v45, %v2015_v30 }
 0x29a   :  { %v1972_v35 = vrot.slane %v1045_v57, %v7512_v2  ;;  %v1097_v23 = vmax.f32 %v989_v10, 0.0  ;;  %v5694_v39 = vsel %vm4982_vm2, %v4819_v47, -inf  ;;  %v1979_v48 = vrot.slane %v1965_v12, %v7512_v2 }
 0x29b   :  { %v4812_v49 = vcombine.low %v4804_v62, %v4811_v38  ;;  %v2848_v56 = vcombine.high %v2846_v0, %v2846_v0  ;;  %v802_v22 = vadd.f32 %v8808_v59, %v8627_v31  ;;  %v9022_v32 = vmax.f32 %v5668_v4, %v5669_v53 }
 0x29c   :  { %v1980_v21 = vcombine.high %v1972_v35, %v1972_v35  ;;  %v2849_v37 = vcombine.high %v1097_v23, %v1097_v23  ;;  %v2856_v5 = vrot.slane %v1097_v23, %v7512_v2  ;;  %v1981_v33 = vcombine.high %v1979_v48, %v1979_v48 }
 0x29d   :  { %v5693_v45 = vsel %vm9686_vm3, %v4812_v49, -inf  ;;  %v794_v30 = vadd.f32 %v8808_v59, %v8633_v9  ;;  %v1050_v38 = vmax.f32 %v802_v22, 0.0  ;;  %v805_v23 = vadd.f32 %v8808_v59, %v8642_v42 }
 0x29e   :  { %v9027_v62 = vmax.f32 %v5693_v45, %v5694_v39  ;;  %v3764_v57 = vcombine.low %v1972_v35, %v1980_v21  ;;  %v2863_v0 = vrot.slane %v2849_v37, %v7512_v2  ;;  %v2864_v34 = vcombine.high %v2856_v5, %v2856_v5 }
 0x29f   :  { %v3765_v47 = vcombine.low %v1979_v48, %v1981_v33  ;;  %v4749_v10 = vcombine.low %v2848_v56, %v2856_v5  ;;  %v1048_v12 = vmax.f32 %v794_v30, 0.0  ;;  %v2050_v35 = vcombine.high %v1050_v38, %v1050_v38 }
 0x2a0   :  { %v3772_v31 = vrot.slane %v3764_v57, %v7512_v2  ;;  %v2865_v4 = vcombine.high %v2863_v0, %v2863_v0  ;;  %v4771_v53 = vrot.slane %v2864_v34, %v7512_v2  ;;  %v2057_v39 = vrot.slane %v1050_v38, %v7512_v2 }
 0x2a1   :  { %v3779_v9 = vrot.slane %v3765_v47, %v7512_v2  ;;  %v4763_v49 = vrot.slane %v4749_v10, %v7512_v2  ;;  %v2016_v56 = vcombine.high %v1048_v12, %v1048_v12  ;;  %v2023_v37 = vrot.slane %v1048_v12, %v7512_v2 }
 0x2a2   :  { %v4772_v21 = vcombine.low %v2863_v0, %v2865_v4  ;;  %v5676_v48 = vsel %vm4982_vm2, %v4771_v53, -inf  ;;  %v2064_v45 = vrot.slane %v2050_v35, %v7512_v2  ;;  %v2065_v33 = vcombine.high %v2057_v39, %v2057_v39 }
 0x2a3   :  { %v3780_v5 = vcombine.low %v3772_v31, %v3779_v9  ;;  %v4764_v22 = vcombine.low %v4756_v24, %v4763_v49  ;;  %v9042_v30 = vrot.slane %v2016_v56, %v7512_v2  ;;  %v2031_v57 = vcombine.high %v2023_v37, %v2023_v37 }
 0x2a4   :  { %v4780_v42 = vrot.slane %v4772_v21, %v7512_v2  ;;  %v1051_v34 = vmax.f32 %v805_v23, 0.0  ;;  %v2066_v10 = vcombine.high %v2064_v45, %v2064_v45  ;;  %v3860_v38 = vcombine.low %v2057_v39, %v2065_v33 }
 0x2a5   :  { %v5306_v47 = vsel %vm9686_vm3, %v3780_v5, -inf  ;;  %v5675_v0 = vsel %vm9686_vm3, %v4764_v22, -inf  ;;  %v3813_v4 = vcombine.low %v2023_v37, %v2031_v57  ;;  %v5277_v53 = vrot.slane %v8952_v1, 1 }
 0x2a6   :  { %v5308_v12 = vmax.f32 %v5306_v47, %v8965_v43  ;;  %v4788_v24 = vcombine.low %v4780_v42, %v4787_v29  ;;  %v9050_v31 = vmax.f32 %v5675_v0, %v5676_v48  ;;  %v9056_v23 = vmax.f32 %v8981_v54, %v5653_v18 }
 0x2a7   :  { %v3861_v9 = vcombine.low %v2064_v45, %v2066_v10  ;;  %v2067_v49 = vcombine.high %v1051_v34, %v1051_v34  ;;  %v3820_v35 = vrot.slane %v9014_v6, %v7512_v2  ;;  %v3827_v3 = vrot.slane %v3813_v4, %v7512_v2 }
 0x2a8   :  { %v5684_v43 = vsel %vm9686_vm3, %v4788_v24, -inf  ;;  %v3835_v29 = vrot.slane %v9042_v30, %v7512_v2  ;;  %v3868_v21 = vrot.slane %v3860_v38, %v7512_v2  ;;  %v2074_v18 = vrot.slane %v1051_v34, %v7512_v2 }
 0x2a9   :  { %v9065_v39 = vmax.f32 %v5684_v43, %v9001_v60  ;;  %v3875_v54 = vrot.slane %v3861_v9, %v7512_v2  ;;  %v5300_v48 = vrot.slane %v8993_v26, 4  ;;  %v5671_v6 = vrot.slane %v9022_v32, 2  ;;  %v9776_v9 = vld [vmem:[#allocation10_spill] sm:$0xff] }
 0x2aa   :  { %v3828_v56 = vcombine.low %v3820_v35, %v3827_v3  ;;  %v2081_v37 = vrot.slane %v2067_v49, %v7512_v2  ;;  %v5318_v5 = vrot.slane %v9010_v55, 4  ;;  %v2082_v45 = vcombine.high %v2074_v18, %v2074_v18 }
 0x2ab   :  { %v3876_v22 = vcombine.low %v3868_v21, %v3875_v54  ;;  %v3883_v60 = vrot.slane %v2074_v18, %v7512_v2  ;;  %v5309_v33 = vrot.slane %v5308_v12, 4  ;;  %v5325_v57 = vsel %vm4982_vm2, %v3835_v29, -inf  ;;  %v9785_v29 = vld [vmem:[#allocation14_spill] sm:$0xff] }
 0x2ac   :  { %v5324_v42 = vsel %vm9686_vm3, %v3828_v56, -inf  ;;  %v2083_v47 = vcombine.high %v2081_v37, %v2081_v37  ;;  %v3884_v0 = vcombine.low %v2082_v45, %v2081_v37  ;;  %v9775_v24 = vrot.slane %v8911_v17, 4  ;;  %v9777_v45 = vld [vmem:[#allocation20_spill] sm:$0xff] }
 0x2ad   :  { %v5326_v34 = vmax.f32 %v5324_v42, %v5325_v57  ;;  %v5342_v10 = vsel %vm9686_vm3, %v3876_v22, -inf  ;;  %v5343_v38 = vsel %vm4982_vm2, %v3883_v60, -inf  ;;  %v797_v43 = vadd.f32 %v8808_v59, %v8755_v28  ;;  %v9778_v42 = vld [vmem:[#allocation30_spill] sm:$0xff] }
 0x2ae   :  { %v9082_v4 = vmax.f32 %v8911_v17, %v9775_v24  ;;  %v3885_v49 = vcombine.low %v2083_v47, %v9776_v9  ;;  %v5344_v35 = vmax.f32 %v5342_v10, %v5343_v38  ;;  %v9088_v3 = vmax.f32 %v8952_v1, %v5277_v53  ;;  %v9780_v10 = vld [vmem:[#allocation17_spill] sm:$0xff]  ;;  %v9781_v9 = vld [vmem:[#allocation28_spill] sm:$0xff] }
 0x2af   :  { %v9092_v21 = vmax.f32 %v8993_v26, %v5300_v48  ;;  %v9095_v54 = vmax.f32 %v9022_v32, %v5671_v6  ;;  %v3892_v17 = vrot.slane %v3884_v0, %v7512_v2  ;;  %v1049_v37 = vmax.f32 %v797_v43, 0.0 }
 0x2b0   :  { %v3899_v18 = vrot.slane %v3885_v49, %v7512_v2  ;;  %v5345_v56 = vrot.slane %v5344_v35, 4  ;;  %v9100_v22 = vmax.f32 %v9010_v55, %v5318_v5  ;;  %v9102_v28 = vmax.f32 %v5308_v12, %v5309_v33  ;;  %v9779_v12 = vld [vmem:[#allocation37_spill] sm:$0xff] }
 0x2b1   :  { %v2032_v1 = vcombine.high %v9042_v30, %v9042_v30  ;;  %v2033_v32 = vcombine.high %v1049_v37, %v1049_v37  ;;  %v2040_v48 = vrot.slane %v1049_v37, %v7512_v2  ;;  %v5779_v60 = vsel %vm9686_vm3, %v9777_v45, -inf }
 0x2b2   :  { %v3900_v26 = vcombine.low %v3892_v17, %v3899_v18  ;;  %v5346_v53 = vmax.f32 %v5344_v35, %v5345_v56  ;;  %v9113_v55 = vsel %vm9686_vm3, %v9778_v42, -inf  ;;  %v5140_v5 = vrot.slane %v9779_v12, 2  ;;  %v9783_v56 = vld [vmem:[#allocation34_spill] sm:$0xff] }
 0x2b3   :  { %v2047_v30 = vrot.slane %v2033_v32, %v7512_v2  ;;  %v2048_v47 = vcombine.high %v2040_v48, %v2040_v48  ;;  %v5327_v0 = vrot.slane %v5326_v34, 4  ;;  %v3836_v24 = vcombine.low %v2032_v1, %v2040_v48  ;;  %v9786_v1 = vld [vmem:[#allocation22_spill] sm:$0xff] }
 0x2b4   :  { %v5347_v33 = vrot.slane %v5346_v53, 2  ;;  %v5351_v57 = vsel %vm9686_vm3, %v3900_v26, -inf  ;;  %v9782_v49 = vrot.slane %v9781_v9, 2  ;;  %v9784_v37 = vrot.slane %v9783_v56, 2 }
 0x2b5   :  { %v5353_v38 = vmax.f32 %v5351_v57, %v9780_v10  ;;  %v2049_v17 = vcombine.high %v2047_v30, %v2047_v30  ;;  %v3837_v18 = vcombine.low %v2048_v47, %v2047_v30  ;;  %v3844_v26 = vrot.slane %v3836_v24, %v7512_v2  ;;  %v9787_v10 = vld [vmem:[#allocation19_spill] sm:$0xff] }
 0x2b6   :  { %v5114_v35 = vmax.f32 %v9781_v9, %v9782_v49  ;;  %v5348_v43 = vmax.f32 %v5346_v53, %v5347_v33  ;;  %v5150_v45 = vmax.f32 %v9783_v56, %v9784_v37  ;;  %v5141_v32 = vmax.f32 %v9779_v12, %v5140_v5  ;;  %v9788_v49 = vld [vmem:[#allocation29_spill] sm:$0xff] }
 0x2b7   :  { %v5354_v42 = vrot.slane %v5353_v38, 4  ;;  %v5158_v6 = vrot.slane %v9785_v29, 2  ;;  %v9130_v48 = vsel %vm9686_vm3, %v9786_v1, -inf  ;;  %v3851_v53 = vrot.slane %v3837_v18, %v7512_v2 }
 0x2b8   :  { %v5349_v57 = vrot.slane %v5348_v43, 1  ;;  %v3859_v33 = vrot.slane %v2049_v17, %v7512_v2  ;;  %v5328_v30 = vmax.f32 %v5326_v34, %v5327_v0  ;;  %v5088_v9 = vrot.slane %v9787_v10, 1 }
 0x2b9   :  { %v5355_v47 = vmax.f32 %v5353_v38, %v5354_v42  ;;  %v5124_v56 = vrot.slane %v9788_v49, 1  ;;  %v3852_v37 = vcombine.low %v3844_v26, %v3851_v53  ;;  %v5115_v12 = vrot.slane %v5114_v35, 1 }
 0x2ba   :  { %v5350_v24 = vmax.f32 %v5348_v43, %v5349_v57  ;;  %v5151_v5 = vrot.slane %v5150_v45, 1  ;;  %v5142_v16 = vrot.slane %v5141_v32, 1  ;;  %v5159_v13 = vmax.f32 %v9785_v29, %v5158_v6  ;;  %v9789_v29 = vld [vmem:[#allocation36_spill] sm:$0xff] }
 0x2bb   :  { %v5356_v59 = vrot.slane %v5355_v47, 2  ;;  %v5232_v1 = vrot.slane %v8712_v11, 1  ;;  %v5333_v17 = vsel %vm9686_vm3, %v3852_v37, -inf  ;;  %v5334_v34 = vsel %vm4982_vm2, %v3859_v33, -inf }
 0x2bc   :  { %v5778_v18 = vsel %vm9686_vm3, %v5350_v24, -inf  ;;  %v5284_v0 = vrot.slane %v9082_v4, 2  ;;  %v5335_v43 = vmax.f32 %v5333_v17, %v5334_v34  ;;  %v5089_v26 = vmax.f32 %v9787_v10, %v5088_v9 }
 0x2bd   :  { %v5357_v38 = vmax.f32 %v5355_v47, %v5356_v59  ;;  %v5780_v42 = vmax.f32 %v5778_v18, %v5779_v60  ;;  %v5116_v57 = vmax.f32 %v5114_v35, %v5115_v12  ;;  %v9144_v53 = vmax.f32 %v9788_v49, %v5124_v56 }
 0x2be   :  { %v9790_v6 = vrot.slane %v9789_v29, 1  ;;  %v5259_v24 = vrot.slane %v8847_v15, 1  ;;  %v5152_v52 = vmax.f32 %v5150_v45, %v5151_v5  ;;  %v5311_v59 = vrot.slane %v9102_v28, 2 }
 0x2bf   :  { %v5358_v37 = vrot.slane %v5357_v38, 1  ;;  %v9151_v33 = vmax.f32 %v5780_v42, %v9791_v50  ;;  %v5143_v60 = vmax.f32 %v5141_v32, %v5142_v16  ;;  %v5160_v47 = vrot.slane %v5159_v13, 1  ;;  %v9792_v32 = vld [vmem:[#allocation21_spill] sm:$0xff] }
 0x2c0   :  { %v5134_v2 = vmax.f32 %v9789_v29, %v9790_v6  ;;  %v5233_v35 = vmax.f32 %v8712_v11, %v5232_v1  ;;  %v5285_v10 = vmax.f32 %v9082_v4, %v5284_v0  ;;  %v5268_v56 = vrot.slane %v8831_v14, 1  ;;  %v9793_v29 = vld [vmem:[#allocation9_spill] sm:$0xff] }
 0x2c1   :  { %v5359_v9 = vmax.f32 %v5357_v38, %v5358_v37  ;;  %v5784_v49 = vmax.f32 %v9151_v33, %v9113_v55  ;;  %v5302_v12 = vrot.slane %v9092_v21, 2  ;;  %v5260_v50 = vmax.f32 %v8847_v15, %v5259_v24  ;;  %v9794_v24 = vld [vmem:[#allocation27_spill] sm:$0xff] }
 0x2c2   :  { %v5320_v45 = vrot.slane %v9100_v22, 2  ;;  %v5329_v5 = vrot.slane %v5328_v30, 2  ;;  %v5336_v18 = vrot.slane %v5335_v43, 4  ;;  %v5295_v11 = vrot.slane %v8938_v61, 1 }
 0x2c3   :  { %v9163_v16 = vsel %vm9686_vm3, %v5359_v9, -inf  ;;  %v5312_v4 = vmax.f32 %v9102_v28, %v5311_v59  ;;  %v5711_v1 = vsel %vm9686_vm3, %v9792_v32, -inf  ;;  %v5161_v34 = vmax.f32 %v5159_v13, %v5160_v47 }
 0x2c4   :  { %v5286_v0 = vrot.slane %v5285_v10, 1  ;;  %v5337_v15 = vmax.f32 %v5335_v43, %v5336_v18  ;;  %v5269_v38 = vmax.f32 %v8831_v14, %v5268_v56  ;;  %v5303_v42 = vmax.f32 %v9092_v21, %v5302_v12  ;;  %v9795_v43 = vld [vmem:[#allocation16_spill] sm:$0xff] }
 0x2c5   :  { %v5712_v6 = vmax.f32 %v9793_v29, %v5711_v1  ;;  %v5713_v37 = vsel %vm9686_vm3, %v9794_v24, -inf  ;;  %v5321_v28 = vmax.f32 %v9100_v22, %v5320_v45  ;;  %v5330_v59 = vmax.f32 %v5328_v30, %v5329_v5  ;;  %v9796_v18 = vld [vmem:[#allocation8_spill] sm:$0xff]  ;;  %v9797_v22 = vld [vmem:[#allocation18_spill] sm:$0xff]  ;;  %v9798_v45 = vld [vmem:[#allocation41_spill] sm:$0xff] }
 0x2c6   :  { %v5338_v9 = vrot.slane %v5337_v15, 2  ;;  %v5715_v32 = vsel %vm9686_vm3, %v5116_v57, -inf  ;;  %v5296_v17 = vmax.f32 %v8938_v61, %v5295_v11  ;;  %v5313_v13 = vrot.slane %v5312_v4, 1  ;;  %v9799_v11 = vld [vmem:[#allocation32_spill] sm:$0xff] }
 0x2c7   :  { %v5714_v47 = vmax.f32 %v5712_v6, %v5713_v37  ;;  %v5727_v14 = vmax.f32 %v9796_v18, %v9795_v43  ;;  %v5287_v56 = vmax.f32 %v5285_v10, %v5286_v0  ;;  %v5717_v12 = vsel %vm9686_vm3, %v5134_v2, -inf }
 0x2c8   :  { %v5339_v21 = vmax.f32 %v5337_v15, %v5338_v9  ;;  %v5730_v1 = vsel %vm9686_vm3, %v5089_v26, -inf  ;;  %v5304_v29 = vrot.slane %v5303_v42, 1  ;;  %v5746_v57 = vmax.f32 %v9798_v45, %v8719_v36  ;;  %v9801_v36 = vld [vmem:[#allocation15_spill] sm:$0xff] }
 0x2c9   :  { %v5716_v24 = vmax.f32 %v5714_v47, %v5715_v32  ;;  %v5729_v30 = vmax.f32 %v5727_v14, %v9797_v22  ;;  %v5322_v5 = vrot.slane %v5321_v28, 1  ;;  %v5331_v61 = vrot.slane %v5330_v59, 1  ;;  %v9800_v47 = vld [vmem:[#allocation44_spill] sm:$0xff] }
 0x2ca   :  { %v5732_v6 = vsel %vm9686_vm3, %v9799_v11, -inf  ;;  %v5749_v37 = vsel %vm9686_vm3, %v5260_v50, -inf  ;;  %v5314_v10 = vmax.f32 %v5312_v4, %v5313_v13  ;;  %v5748_v2 = vmax.f32 %v5746_v57, %v8829_v44 }
 0x2cb   :  { %v5718_v0 = vmax.f32 %v5716_v24, %v5717_v12  ;;  %v5731_v15 = vmax.f32 %v5729_v30, %v5730_v1  ;;  %v5340_v26 = vrot.slane %v5339_v21, 1  ;;  %v5719_v9 = vsel %vm9686_vm3, %v5152_v52, -inf }
 0x2cc   :  { %v5751_v32 = vsel %vm9686_vm3, %v9088_v3, -inf  ;;  %v5761_v43 = vmax.f32 %v9801_v36, %v9800_v47  ;;  %v5750_v22 = vmax.f32 %v5748_v2, %v5749_v37  ;;  %v5764_v45 = vsel %vm9686_vm3, %v5233_v35, -inf }
 0x2cd   :  { %v5720_v18 = vmax.f32 %v5718_v0, %v5719_v9  ;;  %v5733_v14 = vmax.f32 %v5731_v15, %v5732_v6  ;;  %v5332_v50 = vmax.f32 %v5330_v59, %v5331_v61  ;;  %v5734_v4 = vsel %vm9686_vm3, %v9144_v53, -inf }
 0x2ce   :  { %v5736_v44 = vsel %vm9686_vm3, %v5143_v60, -inf  ;;  %v5763_v13 = vmax.f32 %v5761_v43, %v8706_v58  ;;  %v5305_v52 = vmax.f32 %v5303_v42, %v5304_v29  ;;  %v5752_v1 = vmax.f32 %v5750_v22, %v5751_v32  ;;  %v9805_v22 = vld [vmem:[#allocation35_spill] sm:$0xff] }
 0x2cf   :  { %v5735_v12 = vmax.f32 %v5733_v14, %v5734_v4  ;;  %v5766_v3 = vsel %vm9686_vm3, %v8845_v19, -inf  ;;  %v5738_v24 = vsel %vm9686_vm3, %v5161_v34, -inf  ;;  %v5753_v30 = vsel %vm9686_vm3, %v5296_v17, -inf }
 0x2d0   :  { %v5755_v35 = vsel %vm9686_vm3, %v5314_v10, -inf  ;;  %v5765_v59 = vmax.f32 %v5763_v13, %v5764_v45  ;;  %v5323_v57 = vmax.f32 %v5321_v28, %v5322_v5  ;;  %v5341_v61 = vmax.f32 %v5339_v21, %v5340_v26  ;;  %v9806_v45 = vld [vmem:[#allocation42_spill] sm:$0xff] }
 0x2d1   :  { %v5737_v53 = vmax.f32 %v5735_v12, %v5736_v44  ;;  %v5754_v11 = vmax.f32 %v5752_v1, %v5753_v30  ;;  %v5757_v60 = vsel %vm9686_vm3, %v5332_v50, -inf  ;;  %v9802_v42 = vrot.slane %v8466_v8, 4 }
 0x2d2   :  { %v5767_v58 = vmax.f32 %v5765_v59, %v5766_v3  ;;  %v5768_v34 = vsel %vm9686_vm3, %v5269_v38, -inf  ;;  %v5770_v17 = vsel %vm9686_vm3, %v5287_v56, -inf  ;;  %v5673_v37 = vrot.slane %v9095_v54, 1  ;;  %v9812_v59 = vld [vmem:[#allocation13_spill] sm:$0xff] }
 0x2d3   :  { %v5517_v29 = vmax.f32 %v8466_v8, %v9802_v42  ;;  %v5739_v19 = vmax.f32 %v5737_v53, %v5738_v24  ;;  %v5756_v6 = vmax.f32 %v5754_v11, %v5755_v35  ;;  %v5772_v10 = vsel %vm9686_vm3, %v5305_v52, -inf  ;;  %v9808_v52 = vld [vmem:[#allocation43_spill] sm:$0xff]  ;;  %v9810_v24 = vld [vmem:[#allocation33_spill] sm:$0xff] }
 0x2d4   :  { %v5769_v28 = vmax.f32 %v5767_v58, %v5768_v34  ;;  %v5660_v15 = vrot.slane %v8954_v20, 4  ;;  %v9803_v8 = vrot.slane %v9050_v31, 4  ;;  %v5774_v38 = vsel %vm9686_vm3, %v5323_v57, -inf }
 0x2d5   :  { %v5518_v21 = vrot.slane %v5517_v29, 2  ;;  %v5758_v5 = vmax.f32 %v5756_v6, %v5757_v60  ;;  %v5863_v0 = vsel %vm5862_vm4, %v5739_v19, %v5720_v18  ;;  %v5776_v56 = vsel %vm9686_vm3, %v5341_v61, -inf  ;;  %v9813_v19 = vld [vmem:[#allocation39_spill] sm:$0xff] }
 0x2d6   :  { %v5679_v2 = vmax.f32 %v9050_v31, %v9803_v8  ;;  %v5771_v26 = vmax.f32 %v5769_v28, %v5770_v17  ;;  %v5661_v32 = vmax.f32 %v8954_v20, %v5660_v15  ;;  %v9804_v47 = vrot.slane %v9065_v39, 4  ;;  %v9814_v17 = vld [vmem:[#allocation31_spill] sm:$0xff] }
 0x2d7   :  { %v5865_v9 = vsel %vm5864_vm5, %v5758_v5, %v5863_v0  ;;  %v5696_v43 = vrot.slane %v9027_v62, 4  ;;  %v5519_v14 = vmax.f32 %v5517_v29, %v5518_v21  ;;  %v5786_v31 = vmax.f32 %v5784_v49, %v9805_v22 }
 0x2d8   :  { %v5688_v36 = vmax.f32 %v9065_v39, %v9804_v47  ;;  %v5773_v18 = vmax.f32 %v5771_v26, %v5772_v10  ;;  %v9807_v50 = vrot.slane %v9806_v45, 1  ;;  %v5511_v20 = vrot.slane %v8655_v46, 1  ;;  %v9818_v47 = vld [vmem:[#allocation38_spill] sm:$0xff] }
 0x2d9   :  { %v5628_v44 = vrot.slane %v8932_v7, 1  ;;  %v9809_v12 = vrot.slane %v9808_v52, 1  ;;  %v5646_v3 = vrot.slane %v8936_v27, 1  ;;  %v5788_v30 = vmax.f32 %v5786_v31, %v9810_v24 }
 0x2da   :  { %v5485_v4 = vmax.f32 %v9806_v45, %v9807_v50  ;;  %v5689_v13 = vrot.slane %v5688_v36, 2  ;;  %v5775_v39 = vmax.f32 %v5773_v18, %v5774_v38  ;;  %v9811_v55 = vrot.slane %v9056_v23, 1  ;;  %v9817_v38 = vld [vmem:[#allocation26_spill] sm:$0xff] }
 0x2db   :  { %v5503_v1 = vmax.f32 %v9808_v52, %v9809_v12  ;;  %v5662_v49 = vrot.slane %v5661_v32, 2  ;;  %v5697_v35 = vmax.f32 %v9027_v62, %v5696_v43  ;;  %v5789_v57 = vsel %vm9686_vm3, %v9812_v59, -inf  ;;  %v9824_v52 = vld [vmem:[#allocation48_spill] sm:$0xff] }
 0x2dc   :  { %v5656_v33 = vmax.f32 %v9056_v23, %v9811_v55  ;;  %v5777_v61 = vmax.f32 %v5775_v39, %v5776_v56  ;;  %v5520_v53 = vrot.slane %v5519_v14, 1  ;;  %v5680_v11 = vrot.slane %v5679_v2, 2  ;;  %v9825_v12 = vld [vmem:[#allocation24_spill] sm:$0xff] }
 0x2dd   :  { %v5790_v60 = vmax.f32 %v5788_v30, %v5789_v57  ;;  %v5512_v58 = vmax.f32 %v8655_v46, %v5511_v20  ;;  %v5629_v42 = vmax.f32 %v8932_v7, %v5628_v44  ;;  %v5690_v29 = vmax.f32 %v5688_v36, %v5689_v13  ;;  %v9816_v7 = vld [vmem:[#allocation40_spill] sm:$0xff]  ;;  %v9822_v44 = vld [vmem:[#allocation50_spill] sm:$0xff] }
 0x2de   :  { %v5791_v6 = vsel %vm9686_vm3, %v9813_v19, -inf  ;;  %v5867_v23 = vsel %vm5866_vm6, %v5777_v61, %v5865_v9  ;;  %v5647_v34 = vmax.f32 %v8936_v27, %v5646_v3  ;;  %v9815_v28 = vmax.f32 %v9163_v16, %v9130_v48  ;;  %v9823_v13 = vld [vmem:[#allocation12_spill] sm:$0xff] }
 0x2df   :  { %v5792_v62 = vmax.f32 %v5790_v60, %v5791_v6  ;;  %5873 = vxpose.xlu0.b32.start.end [1/1] (short) (narrow) %v5867_v23, 64  ;;  %v5663_v5 = vmax.f32 %v5661_v32, %v5662_v49  ;;  %v5674_v46 = vmax.f32 %v9095_v54, %v5673_v37  ;;  %v5698_v10 = vrot.slane %v5697_v35, 2  ;;  %v9827_v49 = vld [vmem:[#allocation51_spill] sm:$0xff] }
 0x2e0   :  { %v5801_v21 = vmax.f32 %v9815_v28, %v9814_v17  ;;  %v5793_v0 = vsel %vm9686_vm3, %v9816_v7, -inf  ;;  %v5521_v15 = vmax.f32 %v5519_v14, %v5520_v53  ;;  %v5681_v8 = vmax.f32 %v5679_v2, %v5680_v11  ;;  %v9820_v14 = vld [vmem:[#allocation11_spill] sm:$0xff] }
 0x2e1   :  { %v5794_v26 = vmax.f32 %v5792_v62, %v5793_v0  ;;  %v5691_v27 = vrot.slane %v5690_v29, 1  ;;  %v5795_v9 = vsel %vm9686_vm3, %v5512_v58, -inf  ;;  %v5804_v48 = vsel %vm9686_vm3, %v9818_v47, -inf }
 0x2e2   :  { %v5803_v56 = vmax.f32 %v5801_v21, %v9817_v38  ;;  %v5823_v16 = vsel %vm9686_vm3, %v8836_v51, -inf  ;;  %v9819_v37 = vmax.f32 %v8694_v63, %v8687_v41  ;;  %v5825_v2 = vsel %vm9686_vm3, %v8924_v25, -inf  ;;  %v9821_v51 = vld [vmem:[#allocation49_spill] sm:$0xff] }
 0x2e3   :  { %v5796_v32 = vmax.f32 %v5794_v26, %v5795_v9  ;;  %v5664_v43 = vrot.slane %v5663_v5, 1  ;;  %v5699_v18 = vmax.f32 %v5697_v35, %v5698_v10  ;;  %v5806_v22 = vsel %vm9686_vm3, %v9820_v14, -inf  ;;  %v9828_v14 = vld [vmem:[#allocation7_spill] sm:$0xff] }
 0x2e4   :  { %v5805_v54 = vmax.f32 %v5803_v56, %v5804_v48  ;;  %v5824_v36 = vmax.f32 %v9819_v37, %v5823_v16  ;;  %v5827_v31 = vsel %vm9686_vm3, %v8865_v40, -inf  ;;  %v5838_v20 = vsel %vm9686_vm3, %v9821_v51, -inf }
 0x2e5   :  { %v5840_v41 = vsel %vm9686_vm3, %v9822_v44, -inf  ;;  %v5692_v63 = vmax.f32 %v5690_v29, %v5691_v27  ;;  %v5808_v25 = vsel %vm9686_vm3, %v9823_v13, -inf  ;;  %v5829_v39 = vsel %vm9686_vm3, %v5656_v33, -inf }
 0x2e6   :  { %v5807_v45 = vmax.f32 %v5805_v54, %v5806_v22  ;;  %v5826_v50 = vmax.f32 %v5824_v36, %v5825_v2  ;;  %v9826_v3 = vmax.f32 %v9824_v52, %v9825_v12  ;;  %v5682_v30 = vrot.slane %v5681_v8, 1 }
 0x2e7   :  { %v5842_v35 = vsel %vm9686_vm3, %v9827_v49, -inf  ;;  %v5665_v59 = vmax.f32 %v5663_v5, %v5664_v43  ;;  %v5810_v57 = vsel %vm9686_vm3, %v5485_v4, -inf  ;;  %v5831_v61 = vsel %vm9686_vm3, %v5674_v46, -inf }
 0x2e8   :  { %v5839_v24 = vmax.f32 %v9826_v3, %v5838_v20  ;;  %v5809_v40 = vmax.f32 %v5807_v45, %v5808_v25  ;;  %v5828_v55 = vmax.f32 %v5826_v50, %v5827_v31  ;;  %v5700_v11 = vrot.slane %v5699_v18, 1  ;;  %v9829_v45 = vld [vmem:[#allocation6_spill] sm:$0xff] }
 0x2e9   :  { %v5844_v33 = vsel %vm9686_vm3, %v5629_v42, -inf  ;;  %v5812_v29 = vsel %vm9686_vm3, %v5503_v1, -inf  ;;  %v5833_v19 = vsel %vm9686_vm3, %v5692_v63, -inf  ;;  %v5683_v23 = vmax.f32 %v5681_v8, %v5682_v30 }
 0x2ea   :  { %v5841_v53 = vmax.f32 %v5839_v24, %v5840_v41  ;;  %v5811_v60 = vmax.f32 %v5809_v40, %v5810_v57  ;;  %v5830_v58 = vmax.f32 %v5828_v55, %v5829_v39  ;;  %v5846_v28 = vsel %vm9686_vm3, %v5647_v34, -inf }
 0x2eb   :  { %v5814_v4 = vsel %vm9686_vm3, %v5521_v15, -inf  ;;  %v5701_v5 = vmax.f32 %v5699_v18, %v5700_v11  ;;  %v5848_v7 = vsel %vm9686_vm3, %v5665_v59, -inf  ;;  %v5850_v42 = vsel %vm9686_vm3, %v5683_v23, -inf }
 0x2ec   :  { %v5843_v6 = vmax.f32 %v5841_v53, %v5842_v35  ;;  %v5813_v62 = vmax.f32 %v5811_v60, %v5812_v29  ;;  %v5832_v17 = vmax.f32 %v5830_v58, %v5831_v61  ;;  %v7232_v37 = vmov 1934713408  }
 0x2ed   :  { %v5852_v38 = vsel %vm9686_vm3, %v5701_v5, -inf  ;;  %v5970_v36 = vunpack.c.l.s4 %v7232_v37  ;;  %v7233_v63 = vmov 0.0   ;;  %vm9682_vm2 = vcmask 359424  }
 0x2ee   :  { %v5845_v21 = vmax.f32 %v5843_v6, %v5844_v33  ;;  %v5815_v46 = vmax.f32 %v5813_v62, %v5814_v4  ;;  %v5834_v10 = vmax.f32 %v5832_v17, %v5833_v19 }
 0x2ef   :  { %v5971_v43 = vunpack.c.0.s8 %v5970_v36 }
 0x2f0   :  { %v5847_v0 = vmax.f32 %v5845_v21, %v5846_v28  ;;  %v5868_v1 = vsel %vm5862_vm4, %v5815_v46, %v5796_v32  ;;  %vm9683_vm4 = vcmask 392192  }
 0x2f1   :  { %v5869_v8 = vsel %vm5864_vm5, %v5834_v10, %v5868_v1  ;;  %v9312_v50 = vsub.s32 %v5971_v43, %v9829_v45  ;;  %vm9684_vm5 = vcmask 424960  }
 0x2f2   :  { %v5849_v26 = vmax.f32 %v5847_v0, %v5848_v7 }
 0x2f4   :  { %v5851_v56 = vmax.f32 %v5849_v26, %v5850_v42 }
 0x2f6   :  { %v5853_v34 = vmax.f32 %v5851_v56, %v5852_v38 }
 0x2f8   :  { %v5870_v15 = vsel %vm5866_vm6, %v5853_v34, %v5869_v8  ;;  %vm9685_vm6 = vcmask 457728  }
 0x2fc   :  { %5905 = vxpose.xlu0.b32.start.end [1/1] (short) (narrow) %v5870_v15, 64 }
 0x35f   :  { %v5889_v27 = vpop.trf.xlu0 }
 0x360   :  { %v5944_v22 = vrot.slane %v5889_v27, %v9828_v14  ;;  %v5937_v3 = vcombine.high %v5889_v27, %v7233_v63 }
 0x362   :  { %v5951_v53 = vrot.slane %v5937_v3, %v9828_v14 }
 0x363   :  { %v9299_v9 = vpop.trf.xlu0 }
 0x364   :  { %v9318_v41 = vrot.slane %v9299_v9, %v9828_v14 }
 0x367   :  { %v9301_v47 = vpop.trf.xlu0 }
 0x368   :  { %v6069_v12 = vcombine.high %v9301_v47, %v7233_v63 }
 0x36a   :  { %v6083_v57 = vrot.slane %v6069_v12, %v9828_v14 }
 0x36b   :  { %v5892_v48 = vpop.trf.xlu0 }
 0x36c   :  { %v6135_v55 = vcombine.high %v5892_v48, %v7233_v63  ;;  %v6142_v11 = vrot.slane %v5892_v48, %v9828_v14 }
 0x36e   :  { %v6149_v23 = vrot.slane %v6135_v55, %v9828_v14 }
 0x36f   :  { %v5893_v16 = vpop.trf.xlu0 }
 0x370   :  { %v6201_v60 = vcombine.high %v5893_v16, %v7233_v63  ;;  %v6208_v46 = vrot.slane %v5893_v16, %v9828_v14 }
 0x372   :  { %v6215_v10 = vrot.slane %v6201_v60, %v9828_v14 }
 0x373   :  { %v9303_v54 = vpop.trf.xlu0 }
 0x374   :  { %v6267_v27 = vcombine.high %v9303_v54, %v7233_v63  ;;  %v6274_v36 = vrot.slane %v9303_v54, %v9828_v14 }
 0x376   :  { %v6281_v12 = vrot.slane %v6267_v27, %v9828_v14 }
 0x377   :  { %v9305_v32 = vpop.trf.xlu0 }
 0x37b   :  { %v9307_v2 = vpop.trf.xlu0 }
 0x37f   :  { %v5921_v18 = vpop.trf.xlu0 }
 0x380   :  { %v5959_v31 = vrot.slane %v5921_v18, %v9828_v14  ;;  %v5952_v13 = vcombine.high %v5921_v18, %v7233_v63 }
 0x382   :  { %v5967_v51 = vcombine.low %v5944_v22, %v5959_v31  ;;  %v5968_v20 = vcombine.high %v5944_v22, %v5959_v31  ;;  %v5966_v49 = vrot.slane %v5952_v13, %v9828_v14 }
 0x383   :  { %v9314_v44 = vpop.trf.xlu0 }
 0x384   :  { %v9322_v25 = vrot.slane %v5967_v51, %v9312_v50  ;;  %v9326_v39 = vrot.slane %v9314_v44, %v9828_v14  ;;  %v5982_v52 = vrot.slane %v5968_v20, %v9312_v50  ;;  %v5983_v62 = vcombine.low %v5951_v53, %v5966_v49 }
 0x385   :  { %v5984_v38 = vcombine.high %v5951_v53, %v5966_v49 }
 0x386   :  { %v6034_v24 = vcombine.high %v9318_v41, %v9326_v39  ;;  %6470 = vrot.lane.b32.xlu1 %v5982_v52, %s7234_s0  ;;  %v5999_v35 = vcombine.high %v9322_v25, %v7233_v63  ;;  %v6000_v17 = vcombine.high %v5982_v52, %v7233_v63  ;;  %v5991_v56 = vrot.slane %v5983_v62, %v9312_v50 }
 0x387   :  { %v9335_v30 = vpop.trf.xlu0  ;;  %v5998_v13 = vrot.slane %v5984_v38, %v9312_v50 }
 0x388   :  { %v6084_v40 = vcombine.high %v9335_v30, %v7233_v63  ;;  %v9344_v59 = vrot.slane %v6034_v24, %v9312_v50  ;;  %v6001_v53 = vcombine.high %v5991_v56, %v7233_v63 }
 0x38a   :  { %v6098_v61 = vrot.slane %v6084_v40, %v9828_v14  ;;  %6466 = vrot.lane.b32.xlu1 %v5999_v35, %s7235_s10  ;;  %6502 = vrot.lane.b32.xlu0 %v9344_v59, %s7236_s11 }
 0x38b   :  { %v5924_v58 = vpop.trf.xlu0 }
 0x38c   :  { %v6115_v33 = vcombine.low %v6083_v57, %v6098_v61  ;;  %v6116_v29 = vcombine.high %v6083_v57, %v6098_v61  ;;  %v6150_v19 = vcombine.high %v5924_v58, %v7233_v63  ;;  %v6157_v6 = vrot.slane %v5924_v58, %v9828_v14 }
 0x38d   :  { %v6399_v61 = vcombine.high %v9307_v2, %v7233_v63 }
 0x38e   :  { %v6164_v28 = vrot.slane %v6150_v19, %v9828_v14  ;;  %v6165_v4 = vcombine.low %v6142_v11, %v6157_v6  ;;  %v6166_v21 = vcombine.high %v6142_v11, %v6157_v6  ;;  %v9360_v5 = vrot.slane %v6115_v33, %v9312_v50  ;;  %6474 = vrot.lane.b32.xlu1 %v6000_v17, %s7237_s12 }
 0x38f   :  { %v5925_v7 = vpop.trf.xlu0  ;;  %v9366_v0 = vrot.slane %v6116_v29, %v9312_v50  ;;  %v6340_v6 = vrot.slane %v9305_v32, %v9828_v14 }
 0x390   :  { %v6181_v42 = vcombine.low %v6149_v23, %v6164_v28  ;;  %v6182_v1 = vcombine.high %v6149_v23, %v6164_v28  ;;  %v6216_v26 = vcombine.high %v5925_v7, %v7233_v63  ;;  %v6223_v8 = vrot.slane %v5925_v7, %v9828_v14 }
 0x391   :  { %v9372_v34 = vrot.slane %v6165_v4, %v9312_v50  ;;  %v9375_v15 = vrot.slane %v6166_v21, %v9312_v50  ;;  %v9425_v23 = vrot.slane %v9307_v2, %v9828_v14  ;;  %v6413_v28 = vrot.slane %v6399_v61, %v9828_v14 }
 0x392   :  { %v6230_v48 = vrot.slane %v6216_v26, %v9828_v14  ;;  %v6231_v16 = vcombine.low %v6208_v46, %v6223_v8  ;;  %v6232_v37 = vcombine.high %v6208_v46, %v6223_v8  ;;  %6478 = vrot.lane.b32.xlu1 %v5991_v56, %s7238_s13  ;;  %v9384_v18 = vrot.slane %v6181_v42, %v9312_v50 }
 0x393   :  { %v5926_v43 = vpop.trf.xlu0  ;;  %v9396_v52 = vrot.slane %v6182_v1, %v9312_v50  ;;  %v6033_v4 = vcombine.low %v9318_v41, %v9326_v39  ;;  %v6002_v21 = vcombine.high %v5998_v13, %v7233_v63  ;;  %v6018_v41 = vcombine.high %v9314_v44, %v7233_v63 }
 0x394   :  { %v9387_v22 = vrot.slane %v6231_v16, %v9312_v50  ;;  %v6247_v31 = vcombine.low %v6215_v10, %v6230_v48  ;;  %v6248_v45 = vcombine.high %v6215_v10, %v6230_v48  ;;  %v6282_v51 = vcombine.high %v5926_v43, %v7233_v63 }
 0x395   :  { %v6289_v20 = vrot.slane %v5926_v43, %v9828_v14  ;;  %v9393_v54 = vrot.slane %v6232_v37, %v9312_v50  ;;  %v6041_v39 = vrot.slane %v6033_v4, %v9312_v50  ;;  %v6003_v48 = vcombine.high %v9299_v9, %v7233_v63 }
 0x396   :  { %v6296_v3 = vrot.slane %v6282_v51, %v9828_v14  ;;  %v9401_v24 = vrot.slane %v6247_v31, %v9312_v50  ;;  %v9404_v40 = vrot.slane %v6248_v45, %v9312_v50  ;;  %6486 = vrot.lane.b32.xlu1 %v5998_v13, %s7239_s14  ;;  %v6032_v44 = vrot.slane %v6018_v41, %v9828_v14 }
 0x397   :  { %v6297_v55 = vcombine.low %v6274_v36, %v6289_v20  ;;  %v6298_v49 = vcombine.high %v6274_v36, %v6289_v20  ;;  %v5927_v35 = vpop.trf.xlu0  ;;  %v6065_v16 = vcombine.high %v6041_v39, %v7233_v63  ;;  %v6017_v43 = vrot.slane %v6003_v48, %v9828_v14 }
 0x398   :  { %v6313_v57 = vcombine.low %v6281_v12, %v6296_v3  ;;  %v6314_v58 = vcombine.high %v6281_v12, %v6296_v3  ;;  %v6355_v33 = vrot.slane %v5927_v35, %v9828_v14  ;;  %v6348_v37 = vcombine.high %v5927_v35, %v7233_v63 }
 0x399   :  { %v9411_v11 = vrot.slane %v6297_v55, %v9312_v50  ;;  %v9414_v60 = vrot.slane %v6298_v49, %v9312_v50  ;;  %v6333_v9 = vcombine.high %v9305_v32, %v7233_v63  ;;  %v6049_v31 = vcombine.low %v6017_v43, %v6032_v44 }
 0x39a   :  { %v9418_v29 = vrot.slane %v6313_v57, %v9312_v50  ;;  %6482 = vrot.lane.b32.xlu1 %v6001_v53, %s7240_s15  ;;  %v6363_v46 = vcombine.low %v6340_v6, %v6355_v33  ;;  %v9441_v7 = vrot.slane %v6314_v58, %v9312_v50  ;;  %v6364_v8 = vcombine.high %v6340_v6, %v6355_v33 }
 0x39b   :  { %v5928_v19 = vpop.trf.xlu0  ;;  %v6066_v45 = vcombine.high %v9344_v59, %v7233_v63  ;;  %v6362_v51 = vrot.slane %v6348_v37, %v9828_v14  ;;  %v6347_v13 = vrot.slane %v6333_v9, %v9828_v14  ;;  %v6050_v32 = vcombine.high %v6017_v43, %v6032_v44 }
 0x39c   :  { %v6414_v62 = vcombine.high %v5928_v19, %v7233_v63  ;;  %v9429_v17 = vrot.slane %v5928_v19, %v9828_v14  ;;  %6634 = vrot.lane.b32.xlu0 %v9418_v29, %s7241_s16  ;;  %v6371_v38 = vrot.slane %v6363_v46, %v9312_v50  ;;  %v6378_v36 = vrot.slane %v6364_v8, %v9312_v50 }
 0x39d   :  { %v6057_v12 = vrot.slane %v6049_v31, %v9312_v50  ;;  %v6379_v3 = vcombine.low %v6347_v13, %v6362_v51  ;;  %v6064_v59 = vrot.slane %v6050_v32, %v9312_v50  ;;  %v6380_v49 = vcombine.high %v6347_v13, %v6362_v51 }
 0x39e   :  { %v6428_v2 = vrot.slane %v6414_v62, %v9828_v14  ;;  %v6430_v10 = vcombine.high %v9425_v23, %v9429_v17  ;;  %6490 = vrot.lane.b32.xlu1 %v6002_v21, %s7242_s17  ;;  %v6395_v20 = vcombine.high %v6371_v38, %v7233_v63  ;;  %v6396_v55 = vcombine.high %v6378_v36, %v7233_v63 }
 0x39f   :  { %v6387_v35 = vrot.slane %v6379_v3, %v9312_v50  ;;  %v6091_v57 = vrot.slane %v9335_v30, %v9828_v14  ;;  %v6067_v61 = vcombine.high %v6057_v12, %v7233_v63  ;;  %v6394_v53 = vrot.slane %v6380_v49, %v9312_v50 }
 0x3a0   :  { %v6445_v42 = vcombine.low %v6413_v28, %v6428_v2  ;;  %v6446_v1 = vcombine.high %v6413_v28, %v6428_v2  ;;  %6642 = vrot.lane.b32.xlu0 %v9441_v7, %s7243_s18  ;;  %v9450_v26 = vrot.slane %v6430_v10, %v9312_v50  ;;  %v6076_v58 = vrot.slane %v9301_v47, %v9828_v14 }
 0x3a1   :  { %v6068_v19 = vcombine.high %v6064_v59, %v7233_v63  ;;  %v6397_v6 = vcombine.high %v6387_v35, %v7233_v63  ;;  %v6429_v14 = vcombine.low %v9425_v23, %v9429_v17  ;;  %v6398_v62 = vcombine.high %v6394_v53, %v7233_v63 }
 0x3a2   :  { %v9454_v56 = vrot.slane %v6445_v42, %v9312_v50  ;;  %v9457_v27 = vrot.slane %v6446_v1, %v9312_v50  ;;  %6494 = vrot.lane.b32.xlu1 %v6041_v39, %s7244_s2  ;;  %v6099_v33 = vcombine.low %v6076_v58, %v6091_v57  ;;  %v6100_v30 = vcombine.high %v6076_v58, %v6091_v57 }
 0x3a3   :  { %v6437_v4 = vrot.slane %v6429_v14, %v9312_v50  ;;  %v6133_v46 = vcombine.high %v9360_v5, %v7233_v63  ;;  %v6134_v2 = vcombine.high %v9366_v0, %v7233_v63  ;;  %v6263_v1 = vcombine.high %v9387_v22, %v7233_v63 }
 0x3a4   :  { %6650 = vrot.lane.b32.xlu0 %v6371_v38, %s7245_s19  ;;  %v6107_v47 = vrot.slane %v6099_v33, %v9312_v50  ;;  %v6114_v28 = vrot.slane %v6100_v30, %v9312_v50  ;;  %v6462_v50 = vcombine.high %v9450_v26, %v7233_v63  ;;  %v6463_v10 = vcombine.high %v9454_v56, %v7233_v63 }
 0x3a5   :  { %v6461_v17 = vcombine.high %v6437_v4, %v7233_v63  ;;  %v6464_v42 = vcombine.high %v9457_v27, %v7233_v63  ;;  %v6264_v41 = vcombine.high %v9393_v54, %v7233_v63  ;;  %v6329_v37 = vcombine.high %v9411_v11, %v7233_v63 }
 0x3a6   :  { %6498 = vrot.lane.b32.xlu1 %v6065_v16, %s7246_s20  ;;  %v6131_v21 = vcombine.high %v6107_v47, %v7233_v63  ;;  %v6132_v23 = vcombine.high %v6114_v28, %v7233_v63  ;;  %v6330_v9 = vcombine.high %v9414_v60, %v7233_v63  ;;  %v6331_v51 = vcombine.high %v9418_v29, %v7233_v63 }
 0x3a8   :  { %6658 = vrot.lane.b32.xlu0 %v6378_v36, %s7247_s21 }
 0x3aa   :  { %6506 = vrot.lane.b32.xlu1 %v6066_v45, %s7248_s22 }
 0x3ac   :  { %6654 = vrot.lane.b32.xlu0 %v6395_v20, %s7249_s23 }
 0x3ae   :  { %6510 = vrot.lane.b32.xlu1 %v6057_v12, %s7241_s16  ;;  %s7264_s16 = smov 124  }
 0x3b0   :  { %6662 = vrot.lane.b32.xlu0 %v6396_v55, %s7250_s24 }
 0x3b2   :  { %6518 = vrot.lane.b32.xlu1 %v6064_v59, %s7243_s18  ;;  %v6199_v59 = vcombine.high %v9384_v18, %v7233_v63 }
 0x3b4   :  { %6666 = vrot.lane.b32.xlu0 %v6387_v35, %s7251_s25 }
 0x3b6   :  { %6514 = vrot.lane.b32.xlu1 %v6067_v61, %s7252_s26  ;;  %v6200_v61 = vcombine.high %v9396_v52, %v7233_v63 }
 0x3b8   :  { %6674 = vrot.lane.b32.xlu0 %v6394_v53, %s7253_s27 }
 0x3ba   :  { %6522 = vrot.lane.b32.xlu1 %v6068_v19, %s7254_s28 }
 0x3bc   :  { %6670 = vrot.lane.b32.xlu0 %v6397_v6, %s7255_s29 }
 0x3be   :  { %6526 = vrot.lane.b32.xlu1 %v6107_v47, %s7245_s19 }
 0x3c0   :  { %6678 = vrot.lane.b32.xlu0 %v6398_v62, %s7256_s30 }
 0x3c2   :  { %6534 = vrot.lane.b32.xlu1 %v6114_v28, %s7247_s21 }
 0x3c4   :  { %6682 = vrot.lane.b32.xlu0 %v6437_v4, %s7257_s4 }
 0x3c6   :  { %6530 = vrot.lane.b32.xlu1 %v6131_v21, %s7249_s23 }
 0x3c8   :  { %6690 = vrot.lane.b32.xlu0 %v9450_v26, %s7258_s1 }
 0x3ca   :  { %6538 = vrot.lane.b32.xlu1 %v6132_v23, %s7250_s24 }
 0x3cc   :  { %6686 = vrot.lane.b32.xlu0 %v6461_v17, %s7259_s5 }
 0x3ce   :  { %6542 = vrot.lane.b32.xlu1 %v9360_v5, %s7251_s25  ;;  %v6197_v5 = vcombine.high %v9372_v34, %v7233_v63 }
 0x3d0   :  { %6694 = vrot.lane.b32.xlu0 %v6462_v50, %s7260_s6 }
 0x3d2   :  { %6550 = vrot.lane.b32.xlu1 %v9366_v0, %s7253_s27  ;;  %v6198_v0 = vcombine.high %v9375_v15, %v7233_v63 }
 0x3d4   :  { %6698 = vrot.lane.b32.xlu0 %v9454_v56, %s7261_s7 }
 0x3d6   :  { %6546 = vrot.lane.b32.xlu1 %v6133_v46, %s7255_s29 }
 0x3d8   :  { %6706 = vrot.lane.b32.xlu0 %v9457_v27, %s7262_s8  ;;  %v6266_v27 = vcombine.high %v9404_v40, %v7233_v63 }
 0x3da   :  { %6554 = vrot.lane.b32.xlu1 %v6134_v2, %s7256_s30 }
 0x3dc   :  { %6702 = vrot.lane.b32.xlu0 %v6463_v10, %s7263_s9 }
 0x3de   :  { %6558 = vrot.lane.b32.xlu1 %v9372_v34, %s7257_s4 }
 0x3e0   :  { %6710 = vrot.lane.b32.xlu0 %v6464_v42, %s7264_s16 }
 0x3e2   :  { %6566 = vrot.lane.b32.xlu1 %v9375_v15, %s7258_s1 }
 0x3e6   :  { %6562 = vrot.lane.b32.xlu1 %v6197_v5, %s7259_s5 }
 0x3ea   :  { %6570 = vrot.lane.b32.xlu1 %v6198_v0, %s7260_s6 }
 0x3ee   :  { %6594 = vrot.lane.b32.xlu1 %v9393_v54, %s7234_s0  ;;  %v6265_v54 = vcombine.high %v9401_v24, %v7233_v63  ;;  %s7265_s0 = smov [#allocation2]  }
 0x3f2   :  { %6590 = vrot.lane.b32.xlu1 %v6263_v1, %s7235_s10  ;;  %s6822_s10 = sshll.u32 %s7265_s0, 4  ;;  %s6823_s10 = int_to_ptr.vmem [resolvable:$true] %s6822_s10 }
 0x3f3   :  { %p7212_p1 = scmp.lt.s32.totalorder %s6823_s10, %s6823_s10 }
 0x3f6   :  { %6598 = vrot.lane.b32.xlu1 %v6264_v41, %s7237_s12 }
 0x3f8   :  { %v6471_v39 = vpop.permute.xlu1 %6470 }
 0x3fa   :  { %6602 = vrot.lane.b32.xlu1 %v9401_v24, %s7238_s13 }
 0x3fc   :  { %v6467_v34 = vpop.permute.xlu1 %6466  ;;  %v6503_v20 = vpop.permute.xlu0 %6502 }
 0x3fd   :  { %v6714_v15 = vsel %vm6713_vm7, %v9322_v25, %v6467_v34 }
 0x3fe   :  { %6610 = vrot.lane.b32.xlu1 %v9404_v40, %s7239_s14  ;;  %v6716_v26 = vsel %vm6715_vm8, %v6714_v15, %v6471_v39 }
 0x400   :  { %v6475_v8 = vpop.permute.xlu1 %6474 }
 0x401   :  { %v6718_v38 = vsel %vm6717_vm9, %v6716_v26, %v6475_v8 }
 0x402   :  { %6606 = vrot.lane.b32.xlu1 %v6265_v54, %s7240_s15 }
 0x404   :  { %v6479_v56 = vpop.permute.xlu1 %6478 }
 0x405   :  { %v6720_v25 = vsel %vm6719_vm10, %v6718_v38, %v6479_v56 }
 0x406   :  { %6614 = vrot.lane.b32.xlu1 %v6266_v27, %s7242_s17 }
 0x408   :  { %v6487_v48 = vpop.permute.xlu1 %6486 }
 0x40a   :  { %6618 = vrot.lane.b32.xlu1 %v9411_v11, %s7244_s2 }
 0x40c   :  { %v6483_v24 = vpop.permute.xlu1 %6482 }
 0x40d   :  { %v6722_v44 = vsel %vm6721_vm11, %v6720_v25, %v6483_v24 }
 0x40e   :  { %6626 = vrot.lane.b32.xlu1 %v9414_v60, %s7236_s11  ;;  %v6724_v16 = vsel %vm6723_vm12, %v6722_v44, %v6487_v48  ;;  %v6332_v60 = vcombine.high %v9441_v7, %v7233_v63  ;;  %v9602_v30 = vpop.permute.xlu0 %6634  ;;  %s7207_s11 = scalar_lea.vmem %s6823_s10, 64 }
 0x40f   :  { %p7208_p0 = scmp.ne.s32.totalorder %s6823_s10, %s7207_s11  ;;  %p7213_p2 = scmp.lt.s32.totalorder %s7207_s11, %s7207_s11 }
 0x410   :  { %v6491_v40 = vpop.permute.xlu1 %6490 }
 0x411   :  { %v6726_v36 = vsel %vm6725_vm13, %v6724_v16, %v6491_v40  ;;  %p7214_p3 = por %p7213_p2, %p7212_p1 }
 0x412   :  { %6622 = vrot.lane.b32.xlu1 %v6329_v37, %s7246_s20 }
 0x413   :  { %p7215_p4 = pnand %p7214_p3, %p7208_p0 }
 0x414   :  { %v6495_v43 = vpop.permute.xlu1 %6494 }
 0x415   :  { %v6728_v31 = vsel %vm6727_vm14, %v6726_v36, %v6495_v43 }
 0x416   :  { %6630 = vrot.lane.b32.xlu1 %v6330_v9, %s7248_s22 }
 0x418   :  { %v6499_v45 = vpop.permute.xlu1 %6498 }
 0x419   :  { %v6730_v11 = vsel %vm6729_vm15, %v6728_v31, %v6499_v45 }
 0x41a   :  { %6638 = vrot.lane.b32.xlu1 %v6331_v51, %s7252_s26  ;;  %v6732_v32 = vsel %vm6731_vm1, %v6730_v11, %v6503_v20 }
 0x41c   :  { %v6507_v13 = vpop.permute.xlu1 %6506 }
 0x41d   :  { %v6734_v12 = vsel %vm9682_vm2, %v6732_v32, %v6507_v13  ;;  %vm9687_vm2 = vcmask 490496  }
 0x41e   :  { %6646 = vrot.lane.b32.xlu1 %v6332_v60, %s7254_s28 }
 0x420   :  { %v6511_v3 = vpop.permute.xlu1 %6510 }
 0x421   :  { %v6736_v29 = vsel %vm9683_vm4, %v6734_v12, %v6511_v3  ;;  %vm9688_vm4 = vcmask 556032  }
 0x422   :  { %6574 = vrot.lane.b32.xlu1 %v9384_v18, %s7261_s7 }
 0x424   :  { %v6519_v55 = vpop.permute.xlu1 %6518 }
 0x426   :  { %6578 = vrot.lane.b32.xlu1 %v6199_v59, %s7263_s9 }
 0x428   :  { %v6515_v7 = vpop.permute.xlu1 %6514 }
 0x429   :  { %v6738_v49 = vsel %vm9684_vm5, %v6736_v29, %v6515_v7  ;;  %vm9689_vm5 = vcmask 621568  }
 0x42a   :  { %6582 = vrot.lane.b32.xlu1 %v9396_v52, %s7262_s8  ;;  %v6740_v35 = vsel %vm9685_vm6, %v6738_v49, %v6519_v55  ;;  %vm9690_vm6 = vcmask 654336   ;;  %v9606_v52 = vpop.permute.xlu0 %6642 }
 0x42c   :  { %v6523_v57 = vpop.permute.xlu1 %6522 }
 0x42d   :  { %v6742_v53 = vsel %vm9687_vm2, %v6740_v35, %v6523_v57  ;;  %vm6753_vm2 = vcmask 719872  }
 0x42e   :  { %6586 = vrot.lane.b32.xlu1 %v6200_v61, %s7264_s16  ;;  %v6651_v21 = vpop.permute.xlu0 %6650 }
 0x430   :  { %v6527_v18 = vpop.permute.xlu1 %6526 }
 0x431   :  { %v6743_v58 = vsel %vm9686_vm3, %v6742_v53, %v6527_v18  ;;  %vm9692_vm3 = vcmask 687104  }
 0x432   :  { %v6659_v46 = vpop.permute.xlu0 %6658 }
 0x434   :  { %v6535_v33 = vpop.permute.xlu1 %6534 }
 0x436   :  { %v6655_v0 = vpop.permute.xlu0 %6654 }
 0x438   :  { %v6531_v19 = vpop.permute.xlu1 %6530 }
 0x439   :  { %v6745_v6 = vsel %vm9688_vm4, %v6743_v58, %v6531_v19  ;;  %vm6755_vm4 = vcmask 752640  }
 0x43a   :  { %v6746_v47 = vsel %vm9691_vm0, %v6745_v6, %v6535_v33  ;;  %vm6761_vm0 = vcmask 850944   ;;  %v6663_v41 = vpop.permute.xlu0 %6662 }
 0x43c   :  { %v6539_v14 = vpop.permute.xlu1 %6538 }
 0x43d   :  { %v6748_v63 = vsel %vm9689_vm5, %v6746_v47, %v6539_v14  ;;  %vm6757_vm5 = vcmask 785408  }
 0x43e   :  { %v6667_v54 = vpop.permute.xlu0 %6666 }
 0x440   :  { %v6543_v62 = vpop.permute.xlu1 %6542 }
 0x441   :  { %v6750_v28 = vsel %vm9690_vm6, %v6748_v63, %v6543_v62  ;;  %vm6759_vm6 = vcmask 818176  }
 0x442   :  { %v6675_v56 = vpop.permute.xlu0 %6674 }
 0x444   :  { %v6551_v4 = vpop.permute.xlu1 %6550 }
 0x446   :  { %v6671_v48 = vpop.permute.xlu0 %6670 }
 0x448   :  { %v6547_v23 = vpop.permute.xlu1 %6546 }
 0x449   :  { %v6752_v17 = vsel %vm9692_vm3, %v6750_v28, %v6547_v23  ;;  %vm6763_vm3 = vcmask 883712  }
 0x44a   :  { %v6754_v50 = vsel %vm6753_vm2, %v6752_v17, %v6551_v4  ;;  %v6679_v44 = vpop.permute.xlu0 %6678 }
 0x44c   :  { %v6555_v2 = vpop.permute.xlu1 %6554 }
 0x44d   :  { %v6756_v10 = vsel %vm6755_vm4, %v6754_v50, %v6555_v2 }
 0x44e   :  { %v6683_v37 = vpop.permute.xlu0 %6682 }
 0x450   :  { %v6559_v42 = vpop.permute.xlu1 %6558 }
 0x451   :  { %v6758_v5 = vsel %vm6757_vm5, %v6756_v10, %v6559_v42 }
 0x452   :  { %v6691_v9 = vpop.permute.xlu0 %6690 }
 0x454   :  { %v6567_v1 = vpop.permute.xlu1 %6566 }
 0x456   :  { %v6687_v32 = vpop.permute.xlu0 %6686 }
 0x458   :  { %v6563_v39 = vpop.permute.xlu1 %6562 }
 0x459   :  { %v6760_v34 = vsel %vm6759_vm6, %v6758_v5, %v6563_v39 }
 0x45a   :  { %v6762_v15 = vsel %vm6761_vm0, %v6760_v34, %v6567_v1  ;;  %v6695_v55 = vpop.permute.xlu0 %6694 }
 0x45c   :  { %v6571_v26 = vpop.permute.xlu1 %6570 }
 0x45d   :  { %v6764_v8 = vsel %vm6763_vm3, %v6762_v15, %v6571_v26 }
 0x45e   :  { %v6699_v53 = vpop.permute.xlu0 %6698 }
 0x460   :  { %v6595_v38 = vpop.permute.xlu1 %6594 }
 0x462   :  { %v6707_v47 = vpop.permute.xlu0 %6706 }
 0x464   :  { %v6591_v27 = vpop.permute.xlu1 %6590 }
 0x465   :  { %v6773_v43 = vsel %vm6713_vm7, %v9387_v22, %v6591_v27  ;;  %vm9830_vm7 = vcmask 359424  }
 0x466   :  { %v6774_v31 = vsel %vm6715_vm8, %v6773_v43, %v6595_v38  ;;  %vm9831_vm8 = vcmask 392192   ;;  %v6703_v17 = vpop.permute.xlu0 %6702 }
 0x468   :  { %v6599_v25 = vpop.permute.xlu1 %6598 }
 0x469   :  { %v6775_v51 = vsel %vm6717_vm9, %v6774_v31, %v6599_v25  ;;  %vm9832_vm9 = vcmask 424960  }
 0x46c   :  { %v6603_v24 = vpop.permute.xlu1 %6602 }
 0x46d   :  { %v6776_v11 = vsel %vm6719_vm10, %v6775_v51, %v6603_v24  ;;  %vm9833_vm10 = vcmask 457728  }
 0x470   :  { %v6611_v16 = vpop.permute.xlu1 %6610 }
 0x474   :  { %v6607_v40 = vpop.permute.xlu1 %6606 }
 0x475   :  { %v6777_v20 = vsel %vm6721_vm11, %v6776_v11, %v6607_v40  ;;  %vm9834_vm11 = vcmask 490496  }
 0x476   :  { %v6778_v60 = vsel %vm6723_vm12, %v6777_v20, %v6611_v16  ;;  %vm9835_vm12 = vcmask 523264  }
 0x478   :  { %v6615_v36 = vpop.permute.xlu1 %6614 }
 0x479   :  { %v6779_v12 = vsel %vm6725_vm13, %v6778_v60, %v6615_v36  ;;  %vm9836_vm13 = vcmask 556032  }
 0x47c   :  { %v6619_v45 = vpop.permute.xlu1 %6618 }
 0x47d   :  { %v6780_v3 = vsel %vm6727_vm14, %v6779_v12, %v6619_v45  ;;  %vm9837_vm14 = vcmask 588800  }
 0x480   :  { %v6627_v13 = vpop.permute.xlu1 %6626 }
 0x484   :  { %v6623_v29 = vpop.permute.xlu1 %6622 }
 0x485   :  { %v6781_v22 = vsel %vm6729_vm15, %v6780_v3, %v6623_v29  ;;  %vm9838_vm15 = vcmask 621568  }
 0x486   :  { %v6782_v59 = vsel %vm6731_vm1, %v6781_v22, %v6627_v13  ;;  %vm9839_vm1 = vcmask 654336  }
 0x488   :  { %v6631_v7 = vpop.permute.xlu1 %6630 }
 0x489   :  { %v6783_v49 = vsel %vm9830_vm7, %v6782_v59, %v6631_v7  ;;  %vm9840_vm7 = vcmask 687104  }
 0x48a   :  { %v6784_v57 = vsel %vm9831_vm8, %v6783_v49, %v9602_v30  ;;  %vm6765_vm8 = vcmask 916480  }
 0x48c   :  { %v6639_v35 = vpop.permute.xlu1 %6638 }
 0x48d   :  { %v6785_v61 = vsel %vm9832_vm9, %v6784_v57, %v6639_v35  ;;  %vm6767_vm9 = vcmask 949248  }
 0x48e   :  { %v6786_v58 = vsel %vm9833_vm10, %v6785_v61, %v9606_v52  ;;  %vm6769_vm10 = vcmask 982016  }
 0x490   :  { %v6647_v18 = vpop.permute.xlu1 %6646 }
 0x491   :  { %v6787_v33 = vsel %vm9834_vm11, %v6786_v58, %v6647_v18  ;;  %vm6771_vm11 = vcmask 1014784  }
 0x492   :  { %v6788_v19 = vsel %vm9835_vm12, %v6787_v33, %v6651_v21 }
 0x493   :  { %v6789_v6 = vsel %vm9836_vm13, %v6788_v19, %v6655_v0 }
 0x494   :  { %v6790_v14 = vsel %vm9837_vm14, %v6789_v6, %v6659_v46  ;;  %v6575_v63 = vpop.permute.xlu1 %6574 }
 0x495   :  { %v6791_v62 = vsel %vm9838_vm15, %v6790_v14, %v6663_v41  ;;  %v6766_v42 = vsel %vm6765_vm8, %v6764_v8, %v6575_v63  ;;  %v6711_v41 = vpop.permute.xlu0 %6710 }
 0x496   :  { %v6792_v30 = vsel %vm9839_vm1, %v6791_v62, %v6667_v54 }
 0x497   :  { %v6793_v28 = vsel %vm9840_vm7, %v6792_v30, %v6671_v48 }
 0x498   :  { %v6794_v4 = vsel %vm6753_vm2, %v6793_v28, %v6675_v56  ;;  %v6579_v23 = vpop.permute.xlu1 %6578 }
 0x499   :  { %v6795_v52 = vsel %vm6755_vm4, %v6794_v4, %v6679_v44  ;;  %v6768_v0 = vsel %vm6767_vm9, %v6766_v42, %v6579_v23 }
 0x49a   :  { %v6796_v21 = vsel %vm6757_vm5, %v6795_v52, %v6683_v37 }
 0x49b   :  { %v6797_v50 = vsel %vm6759_vm6, %v6796_v21, %v6687_v32 }
 0x49c   :  { %v6798_v46 = vsel %vm6761_vm0, %v6797_v50, %v6691_v9  ;;  %v6583_v2 = vpop.permute.xlu1 %6582 }
 0x49d   :  { %v6799_v10 = vsel %vm6763_vm3, %v6798_v46, %v6695_v55  ;;  %v6770_v39 = vsel %vm6769_vm10, %v6768_v0, %v6583_v2 }
 0x49e   :  { %v6800_v5 = vsel %vm6765_vm8, %v6799_v10, %v6699_v53 }
 0x49f   :  { %v6801_v1 = vsel %vm6767_vm9, %v6800_v5, %v6703_v17 }
 0x4a0   :  { %v6587_v34 = vpop.permute.xlu1 %6586  ;;  %v6802_v15 = vsel %vm6769_vm10, %v6801_v1, %v6707_v47 }
 0x4a1   :  { %v6772_v26 = vsel %vm6771_vm11, %v6770_v39, %v6587_v34  ;;  %v6803_v54 = vsel %vm6771_vm11, %v6802_v15, %v6711_v41 }
 0x4a2   :  { %v6806_v38 = vcombine.low %v6772_v26, %v6803_v54 }
 0x4a4   :  { %6936 = vst.sshfl [vmem:[#allocation2] sm:$0x33 pattern:$0x76325410] %v6806_v38 }
 0x4a5   :  { %7218 = shalt.err (!%p7215_p4)
}
 0x4a6   :  { %s7219_s14 = scalar_lea.hbm %s9661_s3, 64 }
 0x4a7   :  { %p7220_p5 = scmp.ne.s32.totalorder %s9661_s3, %s7219_s14  ;;  %p7223_p6 = scmp.lt.u32.totalorder %s7219_s14, %s9661_s3 }
 0x4a9   :  { %p7225_p7 = pnand %p7223_p6, %p7220_p5 }
 0x4ab   :  { %7228 = shalt.err (!%p7225_p7)
}
 0x4ac   :  { %6825 = dma.vmem_to_hbm [thread:$0]  %s6823_s10, 64, %s9661_s3, [#allocation3]  }
 0x4ad   :  { %7229 = dma.done.wait [#allocation3], 64  }
 0x4ae   :  { %7230 = vsyncadd [#allocation3], 4294967232 }
 0x4af   :  { %6829 = vsyncpa [#allocation3], 1 }

</bundles_post_ra>
